<compile_context>
chip_gen: v5e
topology: v5e:2x2
jax: 0.10.0
libtpu: 0.0.40
codegen_flags: <defaults>
</compile_context>

<pallas_src>
import functools

import jax
import jax.numpy as jnp
import numpy as np
from jax import lax
from jax.experimental import pallas as pl
from jax.experimental.pallas import tpu as pltpu


# ----------------------------------------------------------------------------
# Fused kernel: OSA Levenshtein DP + online-softmax CE + regularization sum.
# ----------------------------------------------------------------------------
def _fused_ce_lev_kernel(x_ref, w_ref, pred_ref, gold_ref,
                         ce_out_ref, reg_out_ref,
                         m_sc, l_sc, g_sc, r_sc,
                         *, L, num_changes, n_rows, n_classes):
    bi = pl.program_id(0)
    ci = pl.program_id(1)
    n_ci = pl.num_programs(1)

    @pl.when(ci == 0)
    def _init():
        m_sc[...] = jnp.full_like(m_sc, -jnp.inf)
        l_sc[...] = jnp.zeros_like(l_sc)
        g_sc[...] = jnp.zeros_like(g_sc)
        r_sc[...] = jnp.zeros_like(r_sc)

    logits = pred_ref[...].astype(jnp.float32)                 # (Bt, Ct)
    Bt, Ct = logits.shape

    row_id = bi * Bt + lax.broadcasted_iota(jnp.int32, (Bt, 1), 0)
    col_id = ci * Ct + lax.broadcasted_iota(jnp.int32, (Bt, Ct), 1)
    row_ok = row_id < n_rows                                   # (Bt, 1)
    col_ok = col_id < n_classes                                # (Bt, Ct)
    valid = col_ok & row_ok                                    # (Bt, Ct)

    # --- online log-sum-exp across class tiles (logp never materialized) ----
    lx = jnp.where(col_ok, logits, -jnp.inf)
    m_prev = m_sc[...]
    m_new = jnp.maximum(m_prev, jnp.max(lx, axis=1, keepdims=True))
    alpha = jnp.exp(m_prev - m_new)
    l_sc[...] = alpha * l_sc[...] + jnp.sum(jnp.exp(lx - m_new),
                                            axis=1, keepdims=True)
    m_sc[...] = m_new

    # --- gold-logit gather (the gold column lives in exactly one C tile) ----
    gold = gold_ref[...]                                       # (Bt, 1) int32
    g_sc[...] += jnp.sum(jnp.where(col_id == gold, logits, 0.0),
                         axis=1, keepdims=True)

    # --- OSA Damerau-Levenshtein DP, vectorized over the (Bt, Ct) pair tile --
    # Statically unrolled over (i, j); every DP cell is a full-lane VPU op.
    xch = x_ref[...]                                           # (Bt, L) int32
    wch = w_ref[...]                                           # (L, Ct) int32
    prev2 = None
    prev = [float(j) for j in range(L + 1)]                    # DP row 0
    for i in range(1, L + 1):
        ai = xch[:, i - 1:i]                                   # (Bt, 1)
        cur = [float(i)]
        for j in range(1, L + 1):
            bj = wch[j - 1:j, :]                               # (1, Ct)
            cost = jnp.where(ai == bj, 0.0, 1.0)
            d = jnp.minimum(jnp.minimum(prev[j] + 1.0, cur[j - 1] + 1.0),
                            prev[j - 1] + cost)
            if i > 1 and j > 1:
                trans = (ai == wch[j - 2:j - 1, :]) & (xch[:, i - 2:i - 1] == bj)
                d = jnp.where(trans, jnp.minimum(d, prev2[j - 2] + 1.0), d)
            cur.append(d)
        prev2 = prev
        prev = cur
    dist = prev[L]                                             # (Bt, Ct) f32
    lev_c = jnp.maximum(dist - float(num_changes), 0.0)
    r_sc[...] += jnp.sum(jnp.where(valid, lev_c * logits, 0.0), keepdims=True)

    # --- finalize on the last class tile: per-B-tile partial sums -----------
    @pl.when(ci == n_ci - 1)
    def _fin():
        ce_rows = m_sc[...] + jnp.log(l_sc[...]) - g_sc[...]   # (Bt, 1)
        ce_sum = jnp.sum(jnp.where(row_ok, ce_rows, 0.0), keepdims=True)
        ce_out_ref[...] = jnp.broadcast_to(ce_sum.reshape(1, 1, 1),
                                           ce_out_ref.shape)
        reg_out_ref[...] = jnp.broadcast_to(r_sc[...].reshape(1, 1, 1),
                                            reg_out_ref.shape)


# ----------------------------------------------------------------------------
# Wrapper: pad to lane-dense tiles, run the fused kernel, reduce partials.
# ----------------------------------------------------------------------------
def ce_with_levenshtein_loss(pred, gold, x_chars, word_chars_T, *,
                             num_changes, reg_lambda,
                             b_tile=8, c_tile=128):
    B, C = pred.shape
    L = x_chars.shape[1]
    assert word_chars_T.shape == (L, C)

    Bp = ((B + b_tile - 1) // b_tile) * b_tile
    Cp = ((C + c_tile - 1) // c_tile) * c_tile      # lane-dense class axis
    nbt, nct = Bp // b_tile, Cp // c_tile

    pred_p = jnp.pad(pred, ((0, Bp - B), (0, Cp - C)))        # keep native dtype
    gold_p = jnp.pad(gold.astype(jnp.int32), (0, Bp - B)).reshape(Bp, 1)
    x_p = jnp.pad(x_chars.astype(jnp.int32), ((0, Bp - B), (0, 0)))
    w_p = jnp.pad(word_chars_T.astype(jnp.int32), ((0, 0), (0, Cp - C)))

    kernel = functools.partial(_fused_ce_lev_kernel, L=int(L),
                               num_changes=float(num_changes),
                               n_rows=int(B), n_classes=int(C))

    grid_spec = pltpu.PrefetchScalarGridSpec(
        num_scalar_prefetch=0,
        grid=(nbt, nct),
        in_specs=[
            pl.BlockSpec((b_tile, L), lambda bi, ci: (bi, 0)),        # X chars
            pl.BlockSpec((L, c_tile), lambda bi, ci: (0, ci)),        # word chars
            pl.BlockSpec((b_tile, c_tile), lambda bi, ci: (bi, ci)),  # pred
            pl.BlockSpec((b_tile, 1), lambda bi, ci: (bi, 0)),        # gold
        ],
        out_specs=(
            pl.BlockSpec((1, 8, 128), lambda bi, ci: (bi, 0, 0)),     # CE parts
            pl.BlockSpec((1, 8, 128), lambda bi, ci: (bi, 0, 0)),     # reg parts
        ),
        scratch_shapes=[
            pltpu.VMEM((b_tile, 1), jnp.float32),   # running max
            pltpu.VMEM((b_tile, 1), jnp.float32),   # running sum-exp
            pltpu.VMEM((b_tile, 1), jnp.float32),   # gold-logit accumulator
            pltpu.VMEM((1, 1), jnp.float32),        # reg partial sum
        ],
    )

    ce_parts, reg_parts = pl.pallas_call(
        kernel,
        out_shape=(jax.ShapeDtypeStruct((nbt, 8, 128), jnp.float32),
                   jax.ShapeDtypeStruct((nbt, 8, 128), jnp.float32)),
        grid_spec=grid_spec,
        compiler_params=pltpu.CompilerParams(
            dimension_semantics=("parallel", "arbitrary"),
            vmem_limit_bytes=32 * 1024 * 1024),
    )(x_p, w_p, pred_p, gold_p)

    # Folded scalar constants: mean CE (1/B) and reg_lambda / numel.
    ce = jnp.sum(ce_parts[:, 0, 0]) / jnp.float32(B)
    reg = jnp.sum(reg_parts[:, 0, 0]) * jnp.float32(reg_lambda / (B * C))
    return ce + reg


# ----------------------------------------------------------------------------
# Module-equivalent wrapper.
# ----------------------------------------------------------------------------
class CELWithLevenshteinRegularization:
    def __init__(self, words, reg_lambda, num_changes, num_chars):
        # words: (W, 1, num_chars, L) one-hot -> squeeze(1) -> (W, num_chars, L)
        words = jnp.squeeze(words, axis=1)
        # Store as (L, W) so the word/class axis maps onto TPU lanes.
        self.word_chars_T = jnp.argmax(words, axis=1).astype(jnp.int32).T
        self.reg_lambda = float(reg_lambda)
        self.num_changes = float(num_changes)
        self.num_chars = num_chars

    def __call__(self, pred, gold, X):
        # TODO(synk): the reference LevenshteinDistance.DamerauLevenshtein class
        # is not available; the OSA (restricted Damerau-Levenshtein) distance on
        # argmax character ids is assumed, matching the original port.
        x_chars = jnp.argmax(X, axis=1).astype(jnp.int32)       # (B, L)
        return ce_with_levenshtein_loss(
            pred, gold, x_chars, self.word_chars_T,
            num_changes=self.num_changes, reg_lambda=self.reg_lambda)


# ----------------------------------------------------------------------------
# Host-side OSA reference (tiny, for the silent correctness check only).
# ----------------------------------------------------------------------------
def _osa_np(a, b):
    la, lb = len(a), len(b)
    d = np.zeros((la + 1, lb + 1), np.float32)
    d[:, 0] = np.arange(la + 1)
    d[0, :] = np.arange(lb + 1)
    for i in range(1, la + 1):
        for j in range(1, lb + 1):
            cost = 0.0 if a[i - 1] == b[j - 1] else 1.0
            d[i, j] = min(d[i - 1, j] + 1, d[i, j - 1] + 1, d[i - 1, j - 1] + cost)
            if i > 1 and j > 1 and a[i - 1] == b[j - 2] and a[i - 2] == b[j - 1]:
                d[i, j] = min(d[i, j], d[i - 2, j - 2] + 1)
    return d[la, lb]


if __name__ == "__main__":
    key = jax.random.PRNGKey(0)
    k_words, k_x, k_pred, k_gold = jax.random.split(key, 4)

    B, W, L, num_chars = 8, 16, 8, 12      # W == number of classes in pred
    reg_lambda, num_changes = 0.01, 1

    # Deterministic synthetic dictionary (one-hot, pre-squeeze layout).
    word_chars = jax.random.randint(k_words, (W, L), 0, num_chars)
    words = jax.nn.one_hot(word_chars, num_chars, axis=1)[:, None]  # (W,1,nc,L)

    # Inputs for the forward pass.
    x_chars = jax.random.randint(k_x, (B, L), 0, num_chars)
    X = jax.nn.one_hot(x_chars, num_chars, axis=1).astype(jnp.float32)  # (B,nc,L)
    pred = jax.random.normal(k_pred, (B, W), dtype=jnp.float32)
    gold = jax.random.randint(k_gold, (B,), 0, W)

    module = CELWithLevenshteinRegularization(words, reg_lambda, num_changes,
                                              num_chars)
    loss = module(pred, gold, X)
    jax.block_until_ready(loss)

    # Pure numpy/JAX reference for a silent correctness check.
    xc, wc = np.asarray(x_chars), np.asarray(word_chars)
    lev = np.array([[_osa_np(xc[b], wc[w]) for w in range(W)] for b in range(B)],
                   np.float32)
    lev_c = np.maximum(lev - num_changes, 0.0)
    logp = jax.nn.log_softmax(pred, axis=1)
    ce_ref = float(-jnp.mean(logp[jnp.arange(B), gold]))
    ref = ce_ref + float(np.sum(lev_c * np.asarray(pred))) * (reg_lambda / (B * W))
    assert abs(float(loss) - ref) < 1e-4, (float(loss), ref)

    print("KERNEL_OK")
</pallas_src>

<mosaic_0001>
module attributes {stable_mosaic.version = 11 : i64} {
  func.func @_fused_ce_lev_kernel(%arg0: i32, %arg1: i32, %arg2: memref<8x8xi32, #tpu.memory_space<vmem>>, %arg3: memref<8x128xi32, #tpu.memory_space<vmem>>, %arg4: memref<8x128xf32, #tpu.memory_space<vmem>>, %arg5: memref<8x1xi32, #tpu.memory_space<vmem>>, %arg6: memref<1x8x128xf32, #tpu.memory_space<vmem>>, %arg7: memref<1x8x128xf32, #tpu.memory_space<vmem>>, %arg8: memref<8x1xf32, #tpu.memory_space<vmem>>, %arg9: memref<8x1xf32, #tpu.memory_space<vmem>>, %arg10: memref<8x1xf32, #tpu.memory_space<vmem>>, %arg11: memref<1x1xf32, #tpu.memory_space<vmem>>) attributes {dimension_semantics = [#tpu.dimension_semantics<parallel>, #tpu.dimension_semantics<arbitrary>], iteration_bounds = array<i64: 1, 1>, scalar_prefetch = 0 : i64, scratch_operands = 4 : i64, tpu.core_type = #tpu.core_type<tc>, window_params = [{transform_indices = @transform_0, window_bounds = array<i64: 8, 8>}, {transform_indices = @transform_1, window_bounds = array<i64: 8, 128>}, {transform_indices = @transform_2, window_bounds = array<i64: 8, 128>}, {transform_indices = @transform_3, window_bounds = array<i64: 8, 1>}, {transform_indices = @transform_4, window_bounds = array<i64: 1, 8, 128>}, {transform_indices = @transform_5, window_bounds = array<i64: 1, 8, 128>}]} {
    %c0_i32 = arith.constant 0 : i32
    %0 = arith.cmpi eq, %arg1, %c0_i32 : i32
    %1 = arith.extui %0 : i1 to i32
    %c0_i32_0 = arith.constant 0 : i32
    %2 = arith.cmpi ne, %1, %c0_i32_0 : i32
    scf.if %2 {
      %cst_355 = arith.constant 0xFF800000 : f32
      %1592 = vector.broadcast %cst_355 : f32 to vector<8x1xf32>
      %c0_356 = arith.constant 0 : index
      %c0_357 = arith.constant 0 : index
      %1593 = vector.load %arg8[%c0_356, %c0_357] : memref<8x1xf32, #tpu.memory_space<vmem>>, vector<8x1xf32>
      tpu.vector_store %arg8[%c0_356, %c0_357], %1592 {strides = array<i32>} : memref<8x1xf32, #tpu.memory_space<vmem>>, vector<8x1xf32>,
      %cst_358 = arith.constant 0.000000e+00 : f32
      %1594 = vector.broadcast %cst_358 : f32 to vector<8x1xf32>
      %c0_359 = arith.constant 0 : index
      %c0_360 = arith.constant 0 : index
      %1595 = vector.load %arg9[%c0_359, %c0_360] : memref<8x1xf32, #tpu.memory_space<vmem>>, vector<8x1xf32>
      tpu.vector_store %arg9[%c0_359, %c0_360], %1594 {strides = array<i32>} : memref<8x1xf32, #tpu.memory_space<vmem>>, vector<8x1xf32>,
      %cst_361 = arith.constant 0.000000e+00 : f32
      %1596 = vector.broadcast %cst_361 : f32 to vector<8x1xf32>
      %c0_362 = arith.constant 0 : index
      %c0_363 = arith.constant 0 : index
      %1597 = vector.load %arg10[%c0_362, %c0_363] : memref<8x1xf32, #tpu.memory_space<vmem>>, vector<8x1xf32>
      tpu.vector_store %arg10[%c0_362, %c0_363], %1596 {strides = array<i32>} : memref<8x1xf32, #tpu.memory_space<vmem>>, vector<8x1xf32>,
      %cst_364 = arith.constant 0.000000e+00 : f32
      %1598 = vector.broadcast %cst_364 : f32 to vector<1x1xf32>
      %c0_365 = arith.constant 0 : index
      %c0_366 = arith.constant 0 : index
      %1599 = vector.load %arg11[%c0_365, %c0_366] : memref<1x1xf32, #tpu.memory_space<vmem>>, vector<1x1xf32>
      tpu.vector_store %arg11[%c0_365, %c0_366], %1598 {strides = array<i32>} : memref<1x1xf32, #tpu.memory_space<vmem>>, vector<1x1xf32>,
    } else {
    }
    %c0 = arith.constant 0 : index
    %c0_1 = arith.constant 0 : index
    %3 = vector.load %arg4[%c0, %c0_1] : memref<8x128xf32, #tpu.memory_space<vmem>>, vector<8x128xf32>
    %c8_i32 = arith.constant 8 : i32
    %4 = arith.muli %arg0, %c8_i32 : i32
    %5 = tpu.iota {dimensions = array<i32: 0>} : vector<8x1xi32>
    %6 = vector.broadcast %4 : i32 to vector<8x1xi32>
    %7 = arith.addi %6, %5 : vector<8x1xi32>
    %c128_i32 = arith.constant 128 : i32
    %8 = arith.muli %arg1, %c128_i32 : i32
    %9 = tpu.iota {dimensions = array<i32: 1>} : vector<8x128xi32>
    %10 = vector.broadcast %8 : i32 to vector<8x128xi32>
    %11 = arith.addi %10, %9 : vector<8x128xi32>
    %c8_i32_2 = arith.constant 8 : i32
    %12 = vector.broadcast %c8_i32_2 : i32 to vector<8x1xi32>
    %13 = arith.cmpi slt, %7, %12 : vector<8x1xi32>
    %c16_i32 = arith.constant 16 : i32
    %14 = vector.broadcast %c16_i32 : i32 to vector<8x128xi32>
    %15 = arith.cmpi slt, %11, %14 : vector<8x128xi32>
    %16 = vector.broadcast %13 : vector<8x1xi1> to vector<8x128xi1>
    %17 = arith.andi %15, %16 : vector<8x128xi1>
    %cst = arith.constant 0xFF800000 : f32
    %18 = vector.broadcast %cst : f32 to vector<8x128xf32>
    %19 = arith.select %15, %3, %18 : vector<8x128xi1>, vector<8x128xf32>
    %c0_3 = arith.constant 0 : index
    %c0_4 = arith.constant 0 : index
    %20 = vector.load %arg8[%c0_3, %c0_4] : memref<8x1xf32, #tpu.memory_space<vmem>>, vector<8x1xf32>
    %cst_5 = arith.constant dense<0xFF800000> : vector<8xf32>
    %21 = vector.multi_reduction <maximumf>, %19, %cst_5 [1] : vector<8x128xf32> to vector<8xf32>
    %22 = vector.shape_cast %21 : vector<8xf32> to vector<8x1xf32>
    %23 = arith.maximumf %20, %22 : vector<8x1xf32>
    %24 = arith.subf %20, %23 : vector<8x1xf32>
    %25 = math.exp %24 : vector<8x1xf32>
    %c0_6 = arith.constant 0 : index
    %c0_7 = arith.constant 0 : index
    %26 = vector.load %arg9[%c0_6, %c0_7] : memref<8x1xf32, #tpu.memory_space<vmem>>, vector<8x1xf32>
    %27 = arith.mulf %25, %26 : vector<8x1xf32>
    %28 = vector.broadcast %23 : vector<8x1xf32> to vector<8x128xf32>
    %29 = arith.subf %19, %28 : vector<8x128xf32>
    %30 = math.exp %29 : vector<8x128xf32>
    %cst_8 = arith.constant dense<0.000000e+00> : vector<8xf32>
    %31 = vector.multi_reduction <add>, %30, %cst_8 [1] : vector<8x128xf32> to vector<8xf32>
    %32 = vector.shape_cast %31 : vector<8xf32> to vector<8x1xf32>
    %33 = arith.addf %27, %32 : vector<8x1xf32>
    %c0_9 = arith.constant 0 : index
    %c0_10 = arith.constant 0 : index
    %34 = vector.load %arg9[%c0_9, %c0_10] : memref<8x1xf32, #tpu.memory_space<vmem>>, vector<8x1xf32>
    tpu.vector_store %arg9[%c0_9, %c0_10], %33 {strides = array<i32>} : memref<8x1xf32, #tpu.memory_space<vmem>>, vector<8x1xf32>,
    %c0_11 = arith.constant 0 : index
    %c0_12 = arith.constant 0 : index
    %35 = vector.load %arg8[%c0_11, %c0_12] : memref<8x1xf32, #tpu.memory_space<vmem>>, vector<8x1xf32>
    tpu.vector_store %arg8[%c0_11, %c0_12], %23 {strides = array<i32>} : memref<8x1xf32, #tpu.memory_space<vmem>>, vector<8x1xf32>,
    %c0_13 = arith.constant 0 : index
    %c0_14 = arith.constant 0 : index
    %36 = vector.load %arg5[%c0_13, %c0_14] : memref<8x1xi32, #tpu.memory_space<vmem>>, vector<8x1xi32>
    %c0_15 = arith.constant 0 : index
    %c0_16 = arith.constant 0 : index
    %37 = vector.load %arg10[%c0_15, %c0_16] : memref<8x1xf32, #tpu.memory_space<vmem>>, vector<8x1xf32>
    %38 = vector.broadcast %36 : vector<8x1xi32> to vector<8x128xi32>
    %39 = arith.cmpi eq, %11, %38 : vector<8x128xi32>
    %cst_17 = arith.constant 0.000000e+00 : f32
    %40 = vector.broadcast %cst_17 : f32 to vector<8x128xf32>
    %41 = arith.select %39, %3, %40 : vector<8x128xi1>, vector<8x128xf32>
    %cst_18 = arith.constant dense<0.000000e+00> : vector<8xf32>
    %42 = vector.multi_reduction <add>, %41, %cst_18 [1] : vector<8x128xf32> to vector<8xf32>
    %43 = vector.shape_cast %42 : vector<8xf32> to vector<8x1xf32>
    %44 = arith.addf %37, %43 : vector<8x1xf32>
    %c0_19 = arith.constant 0 : index
    %c0_20 = arith.constant 0 : index
    %45 = vector.load %arg10[%c0_19, %c0_20] : memref<8x1xf32, #tpu.memory_space<vmem>>, vector<8x1xf32>
    tpu.vector_store %arg10[%c0_19, %c0_20], %44 {strides = array<i32>} : memref<8x1xf32, #tpu.memory_space<vmem>>, vector<8x1xf32>,
    %c0_21 = arith.constant 0 : index
    %c0_22 = arith.constant 0 : index
    %46 = vector.load %arg2[%c0_21, %c0_22] : memref<8x8xi32, #tpu.memory_space<vmem>>, vector<8x8xi32>
    %c0_23 = arith.constant 0 : index
    %c0_24 = arith.constant 0 : index
    %47 = vector.load %arg3[%c0_23, %c0_24] : memref<8x128xi32, #tpu.memory_space<vmem>>, vector<8x128xi32>
    %48 = vector.extract_strided_slice %46 {offsets = [0, 0], sizes = [8, 1], strides = [1, 1]} : vector<8x8xi32> to vector<8x1xi32>
    %49 = vector.extract_strided_slice %47 {offsets = [0, 0], sizes = [1, 128], strides = [1, 1]} : vector<8x128xi32> to vector<1x128xi32>
    %50 = vector.broadcast %48 : vector<8x1xi32> to vector<8x128xi32>
    %51 = vector.broadcast %49 : vector<1x128xi32> to vector<8x128xi32>
    %52 = arith.cmpi eq, %50, %51 : vector<8x128xi32>
    %cst_25 = arith.constant 0.000000e+00 : f32
    %cst_26 = arith.constant 1.000000e+00 : f32
    %53 = vector.broadcast %cst_25 : f32 to vector<8x128xf32>
    %54 = vector.broadcast %cst_26 : f32 to vector<8x128xf32>
    %55 = arith.select %52, %53, %54 : vector<8x128xi1>, vector<8x128xf32>
    %cst_27 = arith.constant 2.000000e+00 : f32
    %cst_28 = arith.constant 2.000000e+00 : f32
    %56 = arith.minimumf %cst_27, %cst_28 : f32
    %cst_29 = arith.constant 0.000000e+00 : f32
    %57 = vector.broadcast %cst_29 : f32 to vector<8x128xf32>
    %58 = arith.addf %57, %55 : vector<8x128xf32>
    %59 = vector.broadcast %56 : f32 to vector<8x128xf32>
    %60 = arith.minimumf %59, %58 : vector<8x128xf32>
    %61 = vector.extract_strided_slice %47 {offsets = [1, 0], sizes = [1, 128], strides = [1, 1]} : vector<8x128xi32> to vector<1x128xi32>
    %62 = vector.broadcast %48 : vector<8x1xi32> to vector<8x128xi32>
    %63 = vector.broadcast %61 : vector<1x128xi32> to vector<8x128xi32>
    %64 = arith.cmpi eq, %62, %63 : vector<8x128xi32>
    %cst_30 = arith.constant 0.000000e+00 : f32
    %cst_31 = arith.constant 1.000000e+00 : f32
    %65 = vector.broadcast %cst_30 : f32 to vector<8x128xf32>
    %66 = vector.broadcast %cst_31 : f32 to vector<8x128xf32>
    %67 = arith.select %64, %65, %66 : vector<8x128xi1>, vector<8x128xf32>
    %cst_32 = arith.constant 1.000000e+00 : f32
    %68 = vector.broadcast %cst_32 : f32 to vector<8x128xf32>
    %69 = arith.addf %60, %68 : vector<8x128xf32>
    %cst_33 = arith.constant 3.000000e+00 : f32
    %70 = vector.broadcast %cst_33 : f32 to vector<8x128xf32>
    %71 = arith.minimumf %70, %69 : vector<8x128xf32>
    %cst_34 = arith.constant 1.000000e+00 : f32
    %72 = vector.broadcast %cst_34 : f32 to vector<8x128xf32>
    %73 = arith.addf %72, %67 : vector<8x128xf32>
    %74 = arith.minimumf %71, %73 : vector<8x128xf32>
    %75 = vector.extract_strided_slice %47 {offsets = [2, 0], sizes = [1, 128], strides = [1, 1]} : vector<8x128xi32> to vector<1x128xi32>
    %76 = vector.broadcast %48 : vector<8x1xi32> to vector<8x128xi32>
    %77 = vector.broadcast %75 : vector<1x128xi32> to vector<8x128xi32>
    %78 = arith.cmpi eq, %76, %77 : vector<8x128xi32>
    %cst_35 = arith.constant 0.000000e+00 : f32
    %cst_36 = arith.constant 1.000000e+00 : f32
    %79 = vector.broadcast %cst_35 : f32 to vector<8x128xf32>
    %80 = vector.broadcast %cst_36 : f32 to vector<8x128xf32>
    %81 = arith.select %78, %79, %80 : vector<8x128xi1>, vector<8x128xf32>
    %cst_37 = arith.constant 1.000000e+00 : f32
    %82 = vector.broadcast %cst_37 : f32 to vector<8x128xf32>
    %83 = arith.addf %74, %82 : vector<8x128xf32>
    %cst_38 = arith.constant 4.000000e+00 : f32
    %84 = vector.broadcast %cst_38 : f32 to vector<8x128xf32>
    %85 = arith.minimumf %84, %83 : vector<8x128xf32>
    %cst_39 = arith.constant 2.000000e+00 : f32
    %86 = vector.broadcast %cst_39 : f32 to vector<8x128xf32>
    %87 = arith.addf %86, %81 : vector<8x128xf32>
    %88 = arith.minimumf %85, %87 : vector<8x128xf32>
    %89 = vector.extract_strided_slice %47 {offsets = [3, 0], sizes = [1, 128], strides = [1, 1]} : vector<8x128xi32> to vector<1x128xi32>
    %90 = vector.broadcast %48 : vector<8x1xi32> to vector<8x128xi32>
    %91 = vector.broadcast %89 : vector<1x128xi32> to vector<8x128xi32>
    %92 = arith.cmpi eq, %90, %91 : vector<8x128xi32>
    %cst_40 = arith.constant 0.000000e+00 : f32
    %cst_41 = arith.constant 1.000000e+00 : f32
    %93 = vector.broadcast %cst_40 : f32 to vector<8x128xf32>
    %94 = vector.broadcast %cst_41 : f32 to vector<8x128xf32>
    %95 = arith.select %92, %93, %94 : vector<8x128xi1>, vector<8x128xf32>
    %cst_42 = arith.constant 1.000000e+00 : f32
    %96 = vector.broadcast %cst_42 : f32 to vector<8x128xf32>
    %97 = arith.addf %88, %96 : vector<8x128xf32>
    %cst_43 = arith.constant 5.000000e+00 : f32
    %98 = vector.broadcast %cst_43 : f32 to vector<8x128xf32>
    %99 = arith.minimumf %98, %97 : vector<8x128xf32>
    %cst_44 = arith.constant 3.000000e+00 : f32
    %100 = vector.broadcast %cst_44 : f32 to vector<8x128xf32>
    %101 = arith.addf %100, %95 : vector<8x128xf32>
    %102 = arith.minimumf %99, %101 : vector<8x128xf32>
    %103 = vector.extract_strided_slice %47 {offsets = [4, 0], sizes = [1, 128], strides = [1, 1]} : vector<8x128xi32> to vector<1x128xi32>
    %104 = vector.broadcast %48 : vector<8x1xi32> to vector<8x128xi32>
    %105 = vector.broadcast %103 : vector<1x128xi32> to vector<8x128xi32>
    %106 = arith.cmpi eq, %104, %105 : vector<8x128xi32>
    %cst_45 = arith.constant 0.000000e+00 : f32
    %cst_46 = arith.constant 1.000000e+00 : f32
    %107 = vector.broadcast %cst_45 : f32 to vector<8x128xf32>
    %108 = vector.broadcast %cst_46 : f32 to vector<8x128xf32>
    %109 = arith.select %106, %107, %108 : vector<8x128xi1>, vector<8x128xf32>
    %cst_47 = arith.constant 1.000000e+00 : f32
    %110 = vector.broadcast %cst_47 : f32 to vector<8x128xf32>
    %111 = arith.addf %102, %110 : vector<8x128xf32>
    %cst_48 = arith.constant 6.000000e+00 : f32
    %112 = vector.broadcast %cst_48 : f32 to vector<8x128xf32>
    %113 = arith.minimumf %112, %111 : vector<8x128xf32>
    %cst_49 = arith.constant 4.000000e+00 : f32
    %114 = vector.broadcast %cst_49 : f32 to vector<8x128xf32>
    %115 = arith.addf %114, %109 : vector<8x128xf32>
    %116 = arith.minimumf %113, %115 : vector<8x128xf32>
    %117 = vector.extract_strided_slice %47 {offsets = [5, 0], sizes = [1, 128], strides = [1, 1]} : vector<8x128xi32> to vector<1x128xi32>
    %118 = vector.broadcast %48 : vector<8x1xi32> to vector<8x128xi32>
    %119 = vector.broadcast %117 : vector<1x128xi32> to vector<8x128xi32>
    %120 = arith.cmpi eq, %118, %119 : vector<8x128xi32>
    %cst_50 = arith.constant 0.000000e+00 : f32
    %cst_51 = arith.constant 1.000000e+00 : f32
    %121 = vector.broadcast %cst_50 : f32 to vector<8x128xf32>
    %122 = vector.broadcast %cst_51 : f32 to vector<8x128xf32>
    %123 = arith.select %120, %121, %122 : vector<8x128xi1>, vector<8x128xf32>
    %cst_52 = arith.constant 1.000000e+00 : f32
    %124 = vector.broadcast %cst_52 : f32 to vector<8x128xf32>
    %125 = arith.addf %116, %124 : vector<8x128xf32>
    %cst_53 = arith.constant 7.000000e+00 : f32
    %126 = vector.broadcast %cst_53 : f32 to vector<8x128xf32>
    %127 = arith.minimumf %126, %125 : vector<8x128xf32>
    %cst_54 = arith.constant 5.000000e+00 : f32
    %128 = vector.broadcast %cst_54 : f32 to vector<8x128xf32>
    %129 = arith.addf %128, %123 : vector<8x128xf32>
    %130 = arith.minimumf %127, %129 : vector<8x128xf32>
    %131 = vector.extract_strided_slice %47 {offsets = [6, 0], sizes = [1, 128], strides = [1, 1]} : vector<8x128xi32> to vector<1x128xi32>
    %132 = vector.broadcast %48 : vector<8x1xi32> to vector<8x128xi32>
    %133 = vector.broadcast %131 : vector<1x128xi32> to vector<8x128xi32>
    %134 = arith.cmpi eq, %132, %133 : vector<8x128xi32>
    %cst_55 = arith.constant 0.000000e+00 : f32
    %cst_56 = arith.constant 1.000000e+00 : f32
    %135 = vector.broadcast %cst_55 : f32 to vector<8x128xf32>
    %136 = vector.broadcast %cst_56 : f32 to vector<8x128xf32>
    %137 = arith.select %134, %135, %136 : vector<8x128xi1>, vector<8x128xf32>
    %cst_57 = arith.constant 1.000000e+00 : f32
    %138 = vector.broadcast %cst_57 : f32 to vector<8x128xf32>
    %139 = arith.addf %130, %138 : vector<8x128xf32>
    %cst_58 = arith.constant 8.000000e+00 : f32
    %140 = vector.broadcast %cst_58 : f32 to vector<8x128xf32>
    %141 = arith.minimumf %140, %139 : vector<8x128xf32>
    %cst_59 = arith.constant 6.000000e+00 : f32
    %142 = vector.broadcast %cst_59 : f32 to vector<8x128xf32>
    %143 = arith.addf %142, %137 : vector<8x128xf32>
    %144 = arith.minimumf %141, %143 : vector<8x128xf32>
    %145 = vector.extract_strided_slice %47 {offsets = [7, 0], sizes = [1, 128], strides = [1, 1]} : vector<8x128xi32> to vector<1x128xi32>
    %146 = vector.broadcast %48 : vector<8x1xi32> to vector<8x128xi32>
    %147 = vector.broadcast %145 : vector<1x128xi32> to vector<8x128xi32>
    %148 = arith.cmpi eq, %146, %147 : vector<8x128xi32>
    %cst_60 = arith.constant 0.000000e+00 : f32
    %cst_61 = arith.constant 1.000000e+00 : f32
    %149 = vector.broadcast %cst_60 : f32 to vector<8x128xf32>
    %150 = vector.broadcast %cst_61 : f32 to vector<8x128xf32>
    %151 = arith.select %148, %149, %150 : vector<8x128xi1>, vector<8x128xf32>
    %cst_62 = arith.constant 1.000000e+00 : f32
    %152 = vector.broadcast %cst_62 : f32 to vector<8x128xf32>
    %153 = arith.addf %144, %152 : vector<8x128xf32>
    %cst_63 = arith.constant 9.000000e+00 : f32
    %154 = vector.broadcast %cst_63 : f32 to vector<8x128xf32>
    %155 = arith.minimumf %154, %153 : vector<8x128xf32>
    %cst_64 = arith.constant 7.000000e+00 : f32
    %156 = vector.broadcast %cst_64 : f32 to vector<8x128xf32>
    %157 = arith.addf %156, %151 : vector<8x128xf32>
    %158 = arith.minimumf %155, %157 : vector<8x128xf32>
    %159 = vector.extract_strided_slice %46 {offsets = [0, 1], sizes = [8, 1], strides = [1, 1]} : vector<8x8xi32> to vector<8x1xi32>
    %160 = vector.extract_strided_slice %47 {offsets = [0, 0], sizes = [1, 128], strides = [1, 1]} : vector<8x128xi32> to vector<1x128xi32>
    %161 = vector.broadcast %159 : vector<8x1xi32> to vector<8x128xi32>
    %162 = vector.broadcast %160 : vector<1x128xi32> to vector<8x128xi32>
    %163 = arith.cmpi eq, %161, %162 : vector<8x128xi32>
    %cst_65 = arith.constant 0.000000e+00 : f32
    %cst_66 = arith.constant 1.000000e+00 : f32
    %164 = vector.broadcast %cst_65 : f32 to vector<8x128xf32>
    %165 = vector.broadcast %cst_66 : f32 to vector<8x128xf32>
    %166 = arith.select %163, %164, %165 : vector<8x128xi1>, vector<8x128xf32>
    %cst_67 = arith.constant 1.000000e+00 : f32
    %167 = vector.broadcast %cst_67 : f32 to vector<8x128xf32>
    %168 = arith.addf %60, %167 : vector<8x128xf32>
    %cst_68 = arith.constant 3.000000e+00 : f32
    %169 = vector.broadcast %cst_68 : f32 to vector<8x128xf32>
    %170 = arith.minimumf %168, %169 : vector<8x128xf32>
    %cst_69 = arith.constant 1.000000e+00 : f32
    %171 = vector.broadcast %cst_69 : f32 to vector<8x128xf32>
    %172 = arith.addf %171, %166 : vector<8x128xf32>
    %173 = arith.minimumf %170, %172 : vector<8x128xf32>
    %174 = vector.extract_strided_slice %47 {offsets = [1, 0], sizes = [1, 128], strides = [1, 1]} : vector<8x128xi32> to vector<1x128xi32>
    %175 = vector.broadcast %159 : vector<8x1xi32> to vector<8x128xi32>
    %176 = vector.broadcast %174 : vector<1x128xi32> to vector<8x128xi32>
    %177 = arith.cmpi eq, %175, %176 : vector<8x128xi32>
    %cst_70 = arith.constant 0.000000e+00 : f32
    %cst_71 = arith.constant 1.000000e+00 : f32
    %178 = vector.broadcast %cst_70 : f32 to vector<8x128xf32>
    %179 = vector.broadcast %cst_71 : f32 to vector<8x128xf32>
    %180 = arith.select %177, %178, %179 : vector<8x128xi1>, vector<8x128xf32>
    %cst_72 = arith.constant 1.000000e+00 : f32
    %181 = vector.broadcast %cst_72 : f32 to vector<8x128xf32>
    %182 = arith.addf %74, %181 : vector<8x128xf32>
    %cst_73 = arith.constant 1.000000e+00 : f32
    %183 = vector.broadcast %cst_73 : f32 to vector<8x128xf32>
    %184 = arith.addf %173, %183 : vector<8x128xf32>
    %185 = arith.minimumf %182, %184 : vector<8x128xf32>
    %186 = arith.addf %60, %180 : vector<8x128xf32>
    %187 = arith.minimumf %185, %186 : vector<8x128xf32>
    %188 = vector.extract_strided_slice %47 {offsets = [0, 0], sizes = [1, 128], strides = [1, 1]} : vector<8x128xi32> to vector<1x128xi32>
    %189 = vector.broadcast %159 : vector<8x1xi32> to vector<8x128xi32>
    %190 = vector.broadcast %188 : vector<1x128xi32> to vector<8x128xi32>
    %191 = arith.cmpi eq, %189, %190 : vector<8x128xi32>
    %192 = vector.extract_strided_slice %46 {offsets = [0, 0], sizes = [8, 1], strides = [1, 1]} : vector<8x8xi32> to vector<8x1xi32>
    %193 = vector.broadcast %192 : vector<8x1xi32> to vector<8x128xi32>
    %194 = vector.broadcast %174 : vector<1x128xi32> to vector<8x128xi32>
    %195 = arith.cmpi eq, %193, %194 : vector<8x128xi32>
    %196 = arith.andi %191, %195 : vector<8x128xi1>
    %cst_74 = arith.constant 1.000000e+00 : f32
    %197 = vector.broadcast %cst_74 : f32 to vector<8x128xf32>
    %198 = arith.minimumf %187, %197 : vector<8x128xf32>
    %199 = arith.select %196, %198, %187 : vector<8x128xi1>, vector<8x128xf32>
    %200 = vector.extract_strided_slice %47 {offsets = [2, 0], sizes = [1, 128], strides = [1, 1]} : vector<8x128xi32> to vector<1x128xi32>
    %201 = vector.broadcast %159 : vector<8x1xi32> to vector<8x128xi32>
    %202 = vector.broadcast %200 : vector<1x128xi32> to vector<8x128xi32>
    %203 = arith.cmpi eq, %201, %202 : vector<8x128xi32>
    %cst_75 = arith.constant 0.000000e+00 : f32
    %cst_76 = arith.constant 1.000000e+00 : f32
    %204 = vector.broadcast %cst_75 : f32 to vector<8x128xf32>
    %205 = vector.broadcast %cst_76 : f32 to vector<8x128xf32>
    %206 = arith.select %203, %204, %205 : vector<8x128xi1>, vector<8x128xf32>
    %cst_77 = arith.constant 1.000000e+00 : f32
    %207 = vector.broadcast %cst_77 : f32 to vector<8x128xf32>
    %208 = arith.addf %88, %207 : vector<8x128xf32>
    %cst_78 = arith.constant 1.000000e+00 : f32
    %209 = vector.broadcast %cst_78 : f32 to vector<8x128xf32>
    %210 = arith.addf %199, %209 : vector<8x128xf32>
    %211 = arith.minimumf %208, %210 : vector<8x128xf32>
    %212 = arith.addf %74, %206 : vector<8x128xf32>
    %213 = arith.minimumf %211, %212 : vector<8x128xf32>
    %214 = vector.extract_strided_slice %47 {offsets = [1, 0], sizes = [1, 128], strides = [1, 1]} : vector<8x128xi32> to vector<1x128xi32>
    %215 = vector.broadcast %159 : vector<8x1xi32> to vector<8x128xi32>
    %216 = vector.broadcast %214 : vector<1x128xi32> to vector<8x128xi32>
    %217 = arith.cmpi eq, %215, %216 : vector<8x128xi32>
    %218 = vector.extract_strided_slice %46 {offsets = [0, 0], sizes = [8, 1], strides = [1, 1]} : vector<8x8xi32> to vector<8x1xi32>
    %219 = vector.broadcast %218 : vector<8x1xi32> to vector<8x128xi32>
    %220 = vector.broadcast %200 : vector<1x128xi32> to vector<8x128xi32>
    %221 = arith.cmpi eq, %219, %220 : vector<8x128xi32>
    %222 = arith.andi %217, %221 : vector<8x128xi1>
    %cst_79 = arith.constant 2.000000e+00 : f32
    %223 = vector.broadcast %cst_79 : f32 to vector<8x128xf32>
    %224 = arith.minimumf %213, %223 : vector<8x128xf32>
    %225 = arith.select %222, %224, %213 : vector<8x128xi1>, vector<8x128xf32>
    %226 = vector.extract_strided_slice %47 {offsets = [3, 0], sizes = [1, 128], strides = [1, 1]} : vector<8x128xi32> to vector<1x128xi32>
    %227 = vector.broadcast %159 : vector<8x1xi32> to vector<8x128xi32>
    %228 = vector.broadcast %226 : vector<1x128xi32> to vector<8x128xi32>
    %229 = arith.cmpi eq, %227, %228 : vector<8x128xi32>
    %cst_80 = arith.constant 0.000000e+00 : f32
    %cst_81 = arith.constant 1.000000e+00 : f32
    %230 = vector.broadcast %cst_80 : f32 to vector<8x128xf32>
    %231 = vector.broadcast %cst_81 : f32 to vector<8x128xf32>
    %232 = arith.select %229, %230, %231 : vector<8x128xi1>, vector<8x128xf32>
    %cst_82 = arith.constant 1.000000e+00 : f32
    %233 = vector.broadcast %cst_82 : f32 to vector<8x128xf32>
    %234 = arith.addf %102, %233 : vector<8x128xf32>
    %cst_83 = arith.constant 1.000000e+00 : f32
    %235 = vector.broadcast %cst_83 : f32 to vector<8x128xf32>
    %236 = arith.addf %225, %235 : vector<8x128xf32>
    %237 = arith.minimumf %234, %236 : vector<8x128xf32>
    %238 = arith.addf %88, %232 : vector<8x128xf32>
    %239 = arith.minimumf %237, %238 : vector<8x128xf32>
    %240 = vector.extract_strided_slice %47 {offsets = [2, 0], sizes = [1, 128], strides = [1, 1]} : vector<8x128xi32> to vector<1x128xi32>
    %241 = vector.broadcast %159 : vector<8x1xi32> to vector<8x128xi32>
    %242 = vector.broadcast %240 : vector<1x128xi32> to vector<8x128xi32>
    %243 = arith.cmpi eq, %241, %242 : vector<8x128xi32>
    %244 = vector.extract_strided_slice %46 {offsets = [0, 0], sizes = [8, 1], strides = [1, 1]} : vector<8x8xi32> to vector<8x1xi32>
    %245 = vector.broadcast %244 : vector<8x1xi32> to vector<8x128xi32>
    %246 = vector.broadcast %226 : vector<1x128xi32> to vector<8x128xi32>
    %247 = arith.cmpi eq, %245, %246 : vector<8x128xi32>
    %248 = arith.andi %243, %247 : vector<8x128xi1>
    %cst_84 = arith.constant 3.000000e+00 : f32
    %249 = vector.broadcast %cst_84 : f32 to vector<8x128xf32>
    %250 = arith.minimumf %239, %249 : vector<8x128xf32>
    %251 = arith.select %248, %250, %239 : vector<8x128xi1>, vector<8x128xf32>
    %252 = vector.extract_strided_slice %47 {offsets = [4, 0], sizes = [1, 128], strides = [1, 1]} : vector<8x128xi32> to vector<1x128xi32>
    %253 = vector.broadcast %159 : vector<8x1xi32> to vector<8x128xi32>
    %254 = vector.broadcast %252 : vector<1x128xi32> to vector<8x128xi32>
    %255 = arith.cmpi eq, %253, %254 : vector<8x128xi32>
    %cst_85 = arith.constant 0.000000e+00 : f32
    %cst_86 = arith.constant 1.000000e+00 : f32
    %256 = vector.broadcast %cst_85 : f32 to vector<8x128xf32>
    %257 = vector.broadcast %cst_86 : f32 to vector<8x128xf32>
    %258 = arith.select %255, %256, %257 : vector<8x128xi1>, vector<8x128xf32>
    %cst_87 = arith.constant 1.000000e+00 : f32
    %259 = vector.broadcast %cst_87 : f32 to vector<8x128xf32>
    %260 = arith.addf %116, %259 : vector<8x128xf32>
    %cst_88 = arith.constant 1.000000e+00 : f32
    %261 = vector.broadcast %cst_88 : f32 to vector<8x128xf32>
    %262 = arith.addf %251, %261 : vector<8x128xf32>
    %263 = arith.minimumf %260, %262 : vector<8x128xf32>
    %264 = arith.addf %102, %258 : vector<8x128xf32>
    %265 = arith.minimumf %263, %264 : vector<8x128xf32>
    %266 = vector.extract_strided_slice %47 {offsets = [3, 0], sizes = [1, 128], strides = [1, 1]} : vector<8x128xi32> to vector<1x128xi32>
    %267 = vector.broadcast %159 : vector<8x1xi32> to vector<8x128xi32>
    %268 = vector.broadcast %266 : vector<1x128xi32> to vector<8x128xi32>
    %269 = arith.cmpi eq, %267, %268 : vector<8x128xi32>
    %270 = vector.extract_strided_slice %46 {offsets = [0, 0], sizes = [8, 1], strides = [1, 1]} : vector<8x8xi32> to vector<8x1xi32>
    %271 = vector.broadcast %270 : vector<8x1xi32> to vector<8x128xi32>
    %272 = vector.broadcast %252 : vector<1x128xi32> to vector<8x128xi32>
    %273 = arith.cmpi eq, %271, %272 : vector<8x128xi32>
    %274 = arith.andi %269, %273 : vector<8x128xi1>
    %cst_89 = arith.constant 4.000000e+00 : f32
    %275 = vector.broadcast %cst_89 : f32 to vector<8x128xf32>
    %276 = arith.minimumf %265, %275 : vector<8x128xf32>
    %277 = arith.select %274, %276, %265 : vector<8x128xi1>, vector<8x128xf32>
    %278 = vector.extract_strided_slice %47 {offsets = [5, 0], sizes = [1, 128], strides = [1, 1]} : vector<8x128xi32> to vector<1x128xi32>
    %279 = vector.broadcast %159 : vector<8x1xi32> to vector<8x128xi32>
    %280 = vector.broadcast %278 : vector<1x128xi32> to vector<8x128xi32>
    %281 = arith.cmpi eq, %279, %280 : vector<8x128xi32>
    %cst_90 = arith.constant 0.000000e+00 : f32
    %cst_91 = arith.constant 1.000000e+00 : f32
    %282 = vector.broadcast %cst_90 : f32 to vector<8x128xf32>
    %283 = vector.broadcast %cst_91 : f32 to vector<8x128xf32>
    %284 = arith.select %281, %282, %283 : vector<8x128xi1>, vector<8x128xf32>
    %cst_92 = arith.constant 1.000000e+00 : f32
    %285 = vector.broadcast %cst_92 : f32 to vector<8x128xf32>
    %286 = arith.addf %130, %285 : vector<8x128xf32>
    %cst_93 = arith.constant 1.000000e+00 : f32
    %287 = vector.broadcast %cst_93 : f32 to vector<8x128xf32>
    %288 = arith.addf %277, %287 : vector<8x128xf32>
    %289 = arith.minimumf %286, %288 : vector<8x128xf32>
    %290 = arith.addf %116, %284 : vector<8x128xf32>
    %291 = arith.minimumf %289, %290 : vector<8x128xf32>
    %292 = vector.extract_strided_slice %47 {offsets = [4, 0], sizes = [1, 128], strides = [1, 1]} : vector<8x128xi32> to vector<1x128xi32>
    %293 = vector.broadcast %159 : vector<8x1xi32> to vector<8x128xi32>
    %294 = vector.broadcast %292 : vector<1x128xi32> to vector<8x128xi32>
    %295 = arith.cmpi eq, %293, %294 : vector<8x128xi32>
    %296 = vector.extract_strided_slice %46 {offsets = [0, 0], sizes = [8, 1], strides = [1, 1]} : vector<8x8xi32> to vector<8x1xi32>
    %297 = vector.broadcast %296 : vector<8x1xi32> to vector<8x128xi32>
    %298 = vector.broadcast %278 : vector<1x128xi32> to vector<8x128xi32>
    %299 = arith.cmpi eq, %297, %298 : vector<8x128xi32>
    %300 = arith.andi %295, %299 : vector<8x128xi1>
    %cst_94 = arith.constant 5.000000e+00 : f32
    %301 = vector.broadcast %cst_94 : f32 to vector<8x128xf32>
    %302 = arith.minimumf %291, %301 : vector<8x128xf32>
    %303 = arith.select %300, %302, %291 : vector<8x128xi1>, vector<8x128xf32>
    %304 = vector.extract_strided_slice %47 {offsets = [6, 0], sizes = [1, 128], strides = [1, 1]} : vector<8x128xi32> to vector<1x128xi32>
    %305 = vector.broadcast %159 : vector<8x1xi32> to vector<8x128xi32>
    %306 = vector.broadcast %304 : vector<1x128xi32> to vector<8x128xi32>
    %307 = arith.cmpi eq, %305, %306 : vector<8x128xi32>
    %cst_95 = arith.constant 0.000000e+00 : f32
    %cst_96 = arith.constant 1.000000e+00 : f32
    %308 = vector.broadcast %cst_95 : f32 to vector<8x128xf32>
    %309 = vector.broadcast %cst_96 : f32 to vector<8x128xf32>
    %310 = arith.select %307, %308, %309 : vector<8x128xi1>, vector<8x128xf32>
    %cst_97 = arith.constant 1.000000e+00 : f32
    %311 = vector.broadcast %cst_97 : f32 to vector<8x128xf32>
    %312 = arith.addf %144, %311 : vector<8x128xf32>
    %cst_98 = arith.constant 1.000000e+00 : f32
    %313 = vector.broadcast %cst_98 : f32 to vector<8x128xf32>
    %314 = arith.addf %303, %313 : vector<8x128xf32>
    %315 = arith.minimumf %312, %314 : vector<8x128xf32>
    %316 = arith.addf %130, %310 : vector<8x128xf32>
    %317 = arith.minimumf %315, %316 : vector<8x128xf32>
    %318 = vector.extract_strided_slice %47 {offsets = [5, 0], sizes = [1, 128], strides = [1, 1]} : vector<8x128xi32> to vector<1x128xi32>
    %319 = vector.broadcast %159 : vector<8x1xi32> to vector<8x128xi32>
    %320 = vector.broadcast %318 : vector<1x128xi32> to vector<8x128xi32>
    %321 = arith.cmpi eq, %319, %320 : vector<8x128xi32>
    %322 = vector.extract_strided_slice %46 {offsets = [0, 0], sizes = [8, 1], strides = [1, 1]} : vector<8x8xi32> to vector<8x1xi32>
    %323 = vector.broadcast %322 : vector<8x1xi32> to vector<8x128xi32>
    %324 = vector.broadcast %304 : vector<1x128xi32> to vector<8x128xi32>
    %325 = arith.cmpi eq, %323, %324 : vector<8x128xi32>
    %326 = arith.andi %321, %325 : vector<8x128xi1>
    %cst_99 = arith.constant 6.000000e+00 : f32
    %327 = vector.broadcast %cst_99 : f32 to vector<8x128xf32>
    %328 = arith.minimumf %317, %327 : vector<8x128xf32>
    %329 = arith.select %326, %328, %317 : vector<8x128xi1>, vector<8x128xf32>
    %330 = vector.extract_strided_slice %47 {offsets = [7, 0], sizes = [1, 128], strides = [1, 1]} : vector<8x128xi32> to vector<1x128xi32>
    %331 = vector.broadcast %159 : vector<8x1xi32> to vector<8x128xi32>
    %332 = vector.broadcast %330 : vector<1x128xi32> to vector<8x128xi32>
    %333 = arith.cmpi eq, %331, %332 : vector<8x128xi32>
    %cst_100 = arith.constant 0.000000e+00 : f32
    %cst_101 = arith.constant 1.000000e+00 : f32
    %334 = vector.broadcast %cst_100 : f32 to vector<8x128xf32>
    %335 = vector.broadcast %cst_101 : f32 to vector<8x128xf32>
    %336 = arith.select %333, %334, %335 : vector<8x128xi1>, vector<8x128xf32>
    %cst_102 = arith.constant 1.000000e+00 : f32
    %337 = vector.broadcast %cst_102 : f32 to vector<8x128xf32>
    %338 = arith.addf %158, %337 : vector<8x128xf32>
    %cst_103 = arith.constant 1.000000e+00 : f32
    %339 = vector.broadcast %cst_103 : f32 to vector<8x128xf32>
    %340 = arith.addf %329, %339 : vector<8x128xf32>
    %341 = arith.minimumf %338, %340 : vector<8x128xf32>
    %342 = arith.addf %144, %336 : vector<8x128xf32>
    %343 = arith.minimumf %341, %342 : vector<8x128xf32>
    %344 = vector.extract_strided_slice %47 {offsets = [6, 0], sizes = [1, 128], strides = [1, 1]} : vector<8x128xi32> to vector<1x128xi32>
    %345 = vector.broadcast %159 : vector<8x1xi32> to vector<8x128xi32>
    %346 = vector.broadcast %344 : vector<1x128xi32> to vector<8x128xi32>
    %347 = arith.cmpi eq, %345, %346 : vector<8x128xi32>
    %348 = vector.extract_strided_slice %46 {offsets = [0, 0], sizes = [8, 1], strides = [1, 1]} : vector<8x8xi32> to vector<8x1xi32>
    %349 = vector.broadcast %348 : vector<8x1xi32> to vector<8x128xi32>
    %350 = vector.broadcast %330 : vector<1x128xi32> to vector<8x128xi32>
    %351 = arith.cmpi eq, %349, %350 : vector<8x128xi32>
    %352 = arith.andi %347, %351 : vector<8x128xi1>
    %cst_104 = arith.constant 7.000000e+00 : f32
    %353 = vector.broadcast %cst_104 : f32 to vector<8x128xf32>
    %354 = arith.minimumf %343, %353 : vector<8x128xf32>
    %355 = arith.select %352, %354, %343 : vector<8x128xi1>, vector<8x128xf32>
    %356 = vector.extract_strided_slice %46 {offsets = [0, 2], sizes = [8, 1], strides = [1, 1]} : vector<8x8xi32> to vector<8x1xi32>
    %357 = vector.extract_strided_slice %47 {offsets = [0, 0], sizes = [1, 128], strides = [1, 1]} : vector<8x128xi32> to vector<1x128xi32>
    %358 = vector.broadcast %356 : vector<8x1xi32> to vector<8x128xi32>
    %359 = vector.broadcast %357 : vector<1x128xi32> to vector<8x128xi32>
    %360 = arith.cmpi eq, %358, %359 : vector<8x128xi32>
    %cst_105 = arith.constant 0.000000e+00 : f32
    %cst_106 = arith.constant 1.000000e+00 : f32
    %361 = vector.broadcast %cst_105 : f32 to vector<8x128xf32>
    %362 = vector.broadcast %cst_106 : f32 to vector<8x128xf32>
    %363 = arith.select %360, %361, %362 : vector<8x128xi1>, vector<8x128xf32>
    %cst_107 = arith.constant 1.000000e+00 : f32
    %364 = vector.broadcast %cst_107 : f32 to vector<8x128xf32>
    %365 = arith.addf %173, %364 : vector<8x128xf32>
    %cst_108 = arith.constant 4.000000e+00 : f32
    %366 = vector.broadcast %cst_108 : f32 to vector<8x128xf32>
    %367 = arith.minimumf %365, %366 : vector<8x128xf32>
    %cst_109 = arith.constant 2.000000e+00 : f32
    %368 = vector.broadcast %cst_109 : f32 to vector<8x128xf32>
    %369 = arith.addf %368, %363 : vector<8x128xf32>
    %370 = arith.minimumf %367, %369 : vector<8x128xf32>
    %371 = vector.extract_strided_slice %47 {offsets = [1, 0], sizes = [1, 128], strides = [1, 1]} : vector<8x128xi32> to vector<1x128xi32>
    %372 = vector.broadcast %356 : vector<8x1xi32> to vector<8x128xi32>
    %373 = vector.broadcast %371 : vector<1x128xi32> to vector<8x128xi32>
    %374 = arith.cmpi eq, %372, %373 : vector<8x128xi32>
    %cst_110 = arith.constant 0.000000e+00 : f32
    %cst_111 = arith.constant 1.000000e+00 : f32
    %375 = vector.broadcast %cst_110 : f32 to vector<8x128xf32>
    %376 = vector.broadcast %cst_111 : f32 to vector<8x128xf32>
    %377 = arith.select %374, %375, %376 : vector<8x128xi1>, vector<8x128xf32>
    %cst_112 = arith.constant 1.000000e+00 : f32
    %378 = vector.broadcast %cst_112 : f32 to vector<8x128xf32>
    %379 = arith.addf %199, %378 : vector<8x128xf32>
    %cst_113 = arith.constant 1.000000e+00 : f32
    %380 = vector.broadcast %cst_113 : f32 to vector<8x128xf32>
    %381 = arith.addf %370, %380 : vector<8x128xf32>
    %382 = arith.minimumf %379, %381 : vector<8x128xf32>
    %383 = arith.addf %173, %377 : vector<8x128xf32>
    %384 = arith.minimumf %382, %383 : vector<8x128xf32>
    %385 = vector.extract_strided_slice %47 {offsets = [0, 0], sizes = [1, 128], strides = [1, 1]} : vector<8x128xi32> to vector<1x128xi32>
    %386 = vector.broadcast %356 : vector<8x1xi32> to vector<8x128xi32>
    %387 = vector.broadcast %385 : vector<1x128xi32> to vector<8x128xi32>
    %388 = arith.cmpi eq, %386, %387 : vector<8x128xi32>
    %389 = vector.extract_strided_slice %46 {offsets = [0, 1], sizes = [8, 1], strides = [1, 1]} : vector<8x8xi32> to vector<8x1xi32>
    %390 = vector.broadcast %389 : vector<8x1xi32> to vector<8x128xi32>
    %391 = vector.broadcast %371 : vector<1x128xi32> to vector<8x128xi32>
    %392 = arith.cmpi eq, %390, %391 : vector<8x128xi32>
    %393 = arith.andi %388, %392 : vector<8x128xi1>
    %cst_114 = arith.constant 2.000000e+00 : f32
    %394 = vector.broadcast %cst_114 : f32 to vector<8x128xf32>
    %395 = arith.minimumf %384, %394 : vector<8x128xf32>
    %396 = arith.select %393, %395, %384 : vector<8x128xi1>, vector<8x128xf32>
    %397 = vector.extract_strided_slice %47 {offsets = [2, 0], sizes = [1, 128], strides = [1, 1]} : vector<8x128xi32> to vector<1x128xi32>
    %398 = vector.broadcast %356 : vector<8x1xi32> to vector<8x128xi32>
    %399 = vector.broadcast %397 : vector<1x128xi32> to vector<8x128xi32>
    %400 = arith.cmpi eq, %398, %399 : vector<8x128xi32>
    %cst_115 = arith.constant 0.000000e+00 : f32
    %cst_116 = arith.constant 1.000000e+00 : f32
    %401 = vector.broadcast %cst_115 : f32 to vector<8x128xf32>
    %402 = vector.broadcast %cst_116 : f32 to vector<8x128xf32>
    %403 = arith.select %400, %401, %402 : vector<8x128xi1>, vector<8x128xf32>
    %cst_117 = arith.constant 1.000000e+00 : f32
    %404 = vector.broadcast %cst_117 : f32 to vector<8x128xf32>
    %405 = arith.addf %225, %404 : vector<8x128xf32>
    %cst_118 = arith.constant 1.000000e+00 : f32
    %406 = vector.broadcast %cst_118 : f32 to vector<8x128xf32>
    %407 = arith.addf %396, %406 : vector<8x128xf32>
    %408 = arith.minimumf %405, %407 : vector<8x128xf32>
    %409 = arith.addf %199, %403 : vector<8x128xf32>
    %410 = arith.minimumf %408, %409 : vector<8x128xf32>
    %411 = vector.extract_strided_slice %47 {offsets = [1, 0], sizes = [1, 128], strides = [1, 1]} : vector<8x128xi32> to vector<1x128xi32>
    %412 = vector.broadcast %356 : vector<8x1xi32> to vector<8x128xi32>
    %413 = vector.broadcast %411 : vector<1x128xi32> to vector<8x128xi32>
    %414 = arith.cmpi eq, %412, %413 : vector<8x128xi32>
    %415 = vector.extract_strided_slice %46 {offsets = [0, 1], sizes = [8, 1], strides = [1, 1]} : vector<8x8xi32> to vector<8x1xi32>
    %416 = vector.broadcast %415 : vector<8x1xi32> to vector<8x128xi32>
    %417 = vector.broadcast %397 : vector<1x128xi32> to vector<8x128xi32>
    %418 = arith.cmpi eq, %416, %417 : vector<8x128xi32>
    %419 = arith.andi %414, %418 : vector<8x128xi1>
    %cst_119 = arith.constant 1.000000e+00 : f32
    %420 = vector.broadcast %cst_119 : f32 to vector<8x128xf32>
    %421 = arith.addf %60, %420 : vector<8x128xf32>
    %422 = arith.minimumf %410, %421 : vector<8x128xf32>
    %423 = arith.select %419, %422, %410 : vector<8x128xi1>, vector<8x128xf32>
    %424 = vector.extract_strided_slice %47 {offsets = [3, 0], sizes = [1, 128], strides = [1, 1]} : vector<8x128xi32> to vector<1x128xi32>
    %425 = vector.broadcast %356 : vector<8x1xi32> to vector<8x128xi32>
    %426 = vector.broadcast %424 : vector<1x128xi32> to vector<8x128xi32>
    %427 = arith.cmpi eq, %425, %426 : vector<8x128xi32>
    %cst_120 = arith.constant 0.000000e+00 : f32
    %cst_121 = arith.constant 1.000000e+00 : f32
    %428 = vector.broadcast %cst_120 : f32 to vector<8x128xf32>
    %429 = vector.broadcast %cst_121 : f32 to vector<8x128xf32>
    %430 = arith.select %427, %428, %429 : vector<8x128xi1>, vector<8x128xf32>
    %cst_122 = arith.constant 1.000000e+00 : f32
    %431 = vector.broadcast %cst_122 : f32 to vector<8x128xf32>
    %432 = arith.addf %251, %431 : vector<8x128xf32>
    %cst_123 = arith.constant 1.000000e+00 : f32
    %433 = vector.broadcast %cst_123 : f32 to vector<8x128xf32>
    %434 = arith.addf %423, %433 : vector<8x128xf32>
    %435 = arith.minimumf %432, %434 : vector<8x128xf32>
    %436 = arith.addf %225, %430 : vector<8x128xf32>
    %437 = arith.minimumf %435, %436 : vector<8x128xf32>
    %438 = vector.extract_strided_slice %47 {offsets = [2, 0], sizes = [1, 128], strides = [1, 1]} : vector<8x128xi32> to vector<1x128xi32>
    %439 = vector.broadcast %356 : vector<8x1xi32> to vector<8x128xi32>
    %440 = vector.broadcast %438 : vector<1x128xi32> to vector<8x128xi32>
    %441 = arith.cmpi eq, %439, %440 : vector<8x128xi32>
    %442 = vector.extract_strided_slice %46 {offsets = [0, 1], sizes = [8, 1], strides = [1, 1]} : vector<8x8xi32> to vector<8x1xi32>
    %443 = vector.broadcast %442 : vector<8x1xi32> to vector<8x128xi32>
    %444 = vector.broadcast %424 : vector<1x128xi32> to vector<8x128xi32>
    %445 = arith.cmpi eq, %443, %444 : vector<8x128xi32>
    %446 = arith.andi %441, %445 : vector<8x128xi1>
    %cst_124 = arith.constant 1.000000e+00 : f32
    %447 = vector.broadcast %cst_124 : f32 to vector<8x128xf32>
    %448 = arith.addf %74, %447 : vector<8x128xf32>
    %449 = arith.minimumf %437, %448 : vector<8x128xf32>
    %450 = arith.select %446, %449, %437 : vector<8x128xi1>, vector<8x128xf32>
    %451 = vector.extract_strided_slice %47 {offsets = [4, 0], sizes = [1, 128], strides = [1, 1]} : vector<8x128xi32> to vector<1x128xi32>
    %452 = vector.broadcast %356 : vector<8x1xi32> to vector<8x128xi32>
    %453 = vector.broadcast %451 : vector<1x128xi32> to vector<8x128xi32>
    %454 = arith.cmpi eq, %452, %453 : vector<8x128xi32>
    %cst_125 = arith.constant 0.000000e+00 : f32
    %cst_126 = arith.constant 1.000000e+00 : f32
    %455 = vector.broadcast %cst_125 : f32 to vector<8x128xf32>
    %456 = vector.broadcast %cst_126 : f32 to vector<8x128xf32>
    %457 = arith.select %454, %455, %456 : vector<8x128xi1>, vector<8x128xf32>
    %cst_127 = arith.constant 1.000000e+00 : f32
    %458 = vector.broadcast %cst_127 : f32 to vector<8x128xf32>
    %459 = arith.addf %277, %458 : vector<8x128xf32>
    %cst_128 = arith.constant 1.000000e+00 : f32
    %460 = vector.broadcast %cst_128 : f32 to vector<8x128xf32>
    %461 = arith.addf %450, %460 : vector<8x128xf32>
    %462 = arith.minimumf %459, %461 : vector<8x128xf32>
    %463 = arith.addf %251, %457 : vector<8x128xf32>
    %464 = arith.minimumf %462, %463 : vector<8x128xf32>
    %465 = vector.extract_strided_slice %47 {offsets = [3, 0], sizes = [1, 128], strides = [1, 1]} : vector<8x128xi32> to vector<1x128xi32>
    %466 = vector.broadcast %356 : vector<8x1xi32> to vector<8x128xi32>
    %467 = vector.broadcast %465 : vector<1x128xi32> to vector<8x128xi32>
    %468 = arith.cmpi eq, %466, %467 : vector<8x128xi32>
    %469 = vector.extract_strided_slice %46 {offsets = [0, 1], sizes = [8, 1], strides = [1, 1]} : vector<8x8xi32> to vector<8x1xi32>
    %470 = vector.broadcast %469 : vector<8x1xi32> to vector<8x128xi32>
    %471 = vector.broadcast %451 : vector<1x128xi32> to vector<8x128xi32>
    %472 = arith.cmpi eq, %470, %471 : vector<8x128xi32>
    %473 = arith.andi %468, %472 : vector<8x128xi1>
    %cst_129 = arith.constant 1.000000e+00 : f32
    %474 = vector.broadcast %cst_129 : f32 to vector<8x128xf32>
    %475 = arith.addf %88, %474 : vector<8x128xf32>
    %476 = arith.minimumf %464, %475 : vector<8x128xf32>
    %477 = arith.select %473, %476, %464 : vector<8x128xi1>, vector<8x128xf32>
    %478 = vector.extract_strided_slice %47 {offsets = [5, 0], sizes = [1, 128], strides = [1, 1]} : vector<8x128xi32> to vector<1x128xi32>
    %479 = vector.broadcast %356 : vector<8x1xi32> to vector<8x128xi32>
    %480 = vector.broadcast %478 : vector<1x128xi32> to vector<8x128xi32>
    %481 = arith.cmpi eq, %479, %480 : vector<8x128xi32>
    %cst_130 = arith.constant 0.000000e+00 : f32
    %cst_131 = arith.constant 1.000000e+00 : f32
    %482 = vector.broadcast %cst_130 : f32 to vector<8x128xf32>
    %483 = vector.broadcast %cst_131 : f32 to vector<8x128xf32>
    %484 = arith.select %481, %482, %483 : vector<8x128xi1>, vector<8x128xf32>
    %cst_132 = arith.constant 1.000000e+00 : f32
    %485 = vector.broadcast %cst_132 : f32 to vector<8x128xf32>
    %486 = arith.addf %303, %485 : vector<8x128xf32>
    %cst_133 = arith.constant 1.000000e+00 : f32
    %487 = vector.broadcast %cst_133 : f32 to vector<8x128xf32>
    %488 = arith.addf %477, %487 : vector<8x128xf32>
    %489 = arith.minimumf %486, %488 : vector<8x128xf32>
    %490 = arith.addf %277, %484 : vector<8x128xf32>
    %491 = arith.minimumf %489, %490 : vector<8x128xf32>
    %492 = vector.extract_strided_slice %47 {offsets = [4, 0], sizes = [1, 128], strides = [1, 1]} : vector<8x128xi32> to vector<1x128xi32>
    %493 = vector.broadcast %356 : vector<8x1xi32> to vector<8x128xi32>
    %494 = vector.broadcast %492 : vector<1x128xi32> to vector<8x128xi32>
    %495 = arith.cmpi eq, %493, %494 : vector<8x128xi32>
    %496 = vector.extract_strided_slice %46 {offsets = [0, 1], sizes = [8, 1], strides = [1, 1]} : vector<8x8xi32> to vector<8x1xi32>
    %497 = vector.broadcast %496 : vector<8x1xi32> to vector<8x128xi32>
    %498 = vector.broadcast %478 : vector<1x128xi32> to vector<8x128xi32>
    %499 = arith.cmpi eq, %497, %498 : vector<8x128xi32>
    %500 = arith.andi %495, %499 : vector<8x128xi1>
    %cst_134 = arith.constant 1.000000e+00 : f32
    %501 = vector.broadcast %cst_134 : f32 to vector<8x128xf32>
    %502 = arith.addf %102, %501 : vector<8x128xf32>
    %503 = arith.minimumf %491, %502 : vector<8x128xf32>
    %504 = arith.select %500, %503, %491 : vector<8x128xi1>, vector<8x128xf32>
    %505 = vector.extract_strided_slice %47 {offsets = [6, 0], sizes = [1, 128], strides = [1, 1]} : vector<8x128xi32> to vector<1x128xi32>
    %506 = vector.broadcast %356 : vector<8x1xi32> to vector<8x128xi32>
    %507 = vector.broadcast %505 : vector<1x128xi32> to vector<8x128xi32>
    %508 = arith.cmpi eq, %506, %507 : vector<8x128xi32>
    %cst_135 = arith.constant 0.000000e+00 : f32
    %cst_136 = arith.constant 1.000000e+00 : f32
    %509 = vector.broadcast %cst_135 : f32 to vector<8x128xf32>
    %510 = vector.broadcast %cst_136 : f32 to vector<8x128xf32>
    %511 = arith.select %508, %509, %510 : vector<8x128xi1>, vector<8x128xf32>
    %cst_137 = arith.constant 1.000000e+00 : f32
    %512 = vector.broadcast %cst_137 : f32 to vector<8x128xf32>
    %513 = arith.addf %329, %512 : vector<8x128xf32>
    %cst_138 = arith.constant 1.000000e+00 : f32
    %514 = vector.broadcast %cst_138 : f32 to vector<8x128xf32>
    %515 = arith.addf %504, %514 : vector<8x128xf32>
    %516 = arith.minimumf %513, %515 : vector<8x128xf32>
    %517 = arith.addf %303, %511 : vector<8x128xf32>
    %518 = arith.minimumf %516, %517 : vector<8x128xf32>
    %519 = vector.extract_strided_slice %47 {offsets = [5, 0], sizes = [1, 128], strides = [1, 1]} : vector<8x128xi32> to vector<1x128xi32>
    %520 = vector.broadcast %356 : vector<8x1xi32> to vector<8x128xi32>
    %521 = vector.broadcast %519 : vector<1x128xi32> to vector<8x128xi32>
    %522 = arith.cmpi eq, %520, %521 : vector<8x128xi32>
    %523 = vector.extract_strided_slice %46 {offsets = [0, 1], sizes = [8, 1], strides = [1, 1]} : vector<8x8xi32> to vector<8x1xi32>
    %524 = vector.broadcast %523 : vector<8x1xi32> to vector<8x128xi32>
    %525 = vector.broadcast %505 : vector<1x128xi32> to vector<8x128xi32>
    %526 = arith.cmpi eq, %524, %525 : vector<8x128xi32>
    %527 = arith.andi %522, %526 : vector<8x128xi1>
    %cst_139 = arith.constant 1.000000e+00 : f32
    %528 = vector.broadcast %cst_139 : f32 to vector<8x128xf32>
    %529 = arith.addf %116, %528 : vector<8x128xf32>
    %530 = arith.minimumf %518, %529 : vector<8x128xf32>
    %531 = arith.select %527, %530, %518 : vector<8x128xi1>, vector<8x128xf32>
    %532 = vector.extract_strided_slice %47 {offsets = [7, 0], sizes = [1, 128], strides = [1, 1]} : vector<8x128xi32> to vector<1x128xi32>
    %533 = vector.broadcast %356 : vector<8x1xi32> to vector<8x128xi32>
    %534 = vector.broadcast %532 : vector<1x128xi32> to vector<8x128xi32>
    %535 = arith.cmpi eq, %533, %534 : vector<8x128xi32>
    %cst_140 = arith.constant 0.000000e+00 : f32
    %cst_141 = arith.constant 1.000000e+00 : f32
    %536 = vector.broadcast %cst_140 : f32 to vector<8x128xf32>
    %537 = vector.broadcast %cst_141 : f32 to vector<8x128xf32>
    %538 = arith.select %535, %536, %537 : vector<8x128xi1>, vector<8x128xf32>
    %cst_142 = arith.constant 1.000000e+00 : f32
    %539 = vector.broadcast %cst_142 : f32 to vector<8x128xf32>
    %540 = arith.addf %355, %539 : vector<8x128xf32>
    %cst_143 = arith.constant 1.000000e+00 : f32
    %541 = vector.broadcast %cst_143 : f32 to vector<8x128xf32>
    %542 = arith.addf %531, %541 : vector<8x128xf32>
    %543 = arith.minimumf %540, %542 : vector<8x128xf32>
    %544 = arith.addf %329, %538 : vector<8x128xf32>
    %545 = arith.minimumf %543, %544 : vector<8x128xf32>
    %546 = vector.extract_strided_slice %47 {offsets = [6, 0], sizes = [1, 128], strides = [1, 1]} : vector<8x128xi32> to vector<1x128xi32>
    %547 = vector.broadcast %356 : vector<8x1xi32> to vector<8x128xi32>
    %548 = vector.broadcast %546 : vector<1x128xi32> to vector<8x128xi32>
    %549 = arith.cmpi eq, %547, %548 : vector<8x128xi32>
    %550 = vector.extract_strided_slice %46 {offsets = [0, 1], sizes = [8, 1], strides = [1, 1]} : vector<8x8xi32> to vector<8x1xi32>
    %551 = vector.broadcast %550 : vector<8x1xi32> to vector<8x128xi32>
    %552 = vector.broadcast %532 : vector<1x128xi32> to vector<8x128xi32>
    %553 = arith.cmpi eq, %551, %552 : vector<8x128xi32>
    %554 = arith.andi %549, %553 : vector<8x128xi1>
    %cst_144 = arith.constant 1.000000e+00 : f32
    %555 = vector.broadcast %cst_144 : f32 to vector<8x128xf32>
    %556 = arith.addf %130, %555 : vector<8x128xf32>
    %557 = arith.minimumf %545, %556 : vector<8x128xf32>
    %558 = arith.select %554, %557, %545 : vector<8x128xi1>, vector<8x128xf32>
    %559 = vector.extract_strided_slice %46 {offsets = [0, 3], sizes = [8, 1], strides = [1, 1]} : vector<8x8xi32> to vector<8x1xi32>
    %560 = vector.extract_strided_slice %47 {offsets = [0, 0], sizes = [1, 128], strides = [1, 1]} : vector<8x128xi32> to vector<1x128xi32>
    %561 = vector.broadcast %559 : vector<8x1xi32> to vector<8x128xi32>
    %562 = vector.broadcast %560 : vector<1x128xi32> to vector<8x128xi32>
    %563 = arith.cmpi eq, %561, %562 : vector<8x128xi32>
    %cst_145 = arith.constant 0.000000e+00 : f32
    %cst_146 = arith.constant 1.000000e+00 : f32
    %564 = vector.broadcast %cst_145 : f32 to vector<8x128xf32>
    %565 = vector.broadcast %cst_146 : f32 to vector<8x128xf32>
    %566 = arith.select %563, %564, %565 : vector<8x128xi1>, vector<8x128xf32>
    %cst_147 = arith.constant 1.000000e+00 : f32
    %567 = vector.broadcast %cst_147 : f32 to vector<8x128xf32>
    %568 = arith.addf %370, %567 : vector<8x128xf32>
    %cst_148 = arith.constant 5.000000e+00 : f32
    %569 = vector.broadcast %cst_148 : f32 to vector<8x128xf32>
    %570 = arith.minimumf %568, %569 : vector<8x128xf32>
    %cst_149 = arith.constant 3.000000e+00 : f32
    %571 = vector.broadcast %cst_149 : f32 to vector<8x128xf32>
    %572 = arith.addf %571, %566 : vector<8x128xf32>
    %573 = arith.minimumf %570, %572 : vector<8x128xf32>
    %574 = vector.extract_strided_slice %47 {offsets = [1, 0], sizes = [1, 128], strides = [1, 1]} : vector<8x128xi32> to vector<1x128xi32>
    %575 = vector.broadcast %559 : vector<8x1xi32> to vector<8x128xi32>
    %576 = vector.broadcast %574 : vector<1x128xi32> to vector<8x128xi32>
    %577 = arith.cmpi eq, %575, %576 : vector<8x128xi32>
    %cst_150 = arith.constant 0.000000e+00 : f32
    %cst_151 = arith.constant 1.000000e+00 : f32
    %578 = vector.broadcast %cst_150 : f32 to vector<8x128xf32>
    %579 = vector.broadcast %cst_151 : f32 to vector<8x128xf32>
    %580 = arith.select %577, %578, %579 : vector<8x128xi1>, vector<8x128xf32>
    %cst_152 = arith.constant 1.000000e+00 : f32
    %581 = vector.broadcast %cst_152 : f32 to vector<8x128xf32>
    %582 = arith.addf %396, %581 : vector<8x128xf32>
    %cst_153 = arith.constant 1.000000e+00 : f32
    %583 = vector.broadcast %cst_153 : f32 to vector<8x128xf32>
    %584 = arith.addf %573, %583 : vector<8x128xf32>
    %585 = arith.minimumf %582, %584 : vector<8x128xf32>
    %586 = arith.addf %370, %580 : vector<8x128xf32>
    %587 = arith.minimumf %585, %586 : vector<8x128xf32>
    %588 = vector.extract_strided_slice %47 {offsets = [0, 0], sizes = [1, 128], strides = [1, 1]} : vector<8x128xi32> to vector<1x128xi32>
    %589 = vector.broadcast %559 : vector<8x1xi32> to vector<8x128xi32>
    %590 = vector.broadcast %588 : vector<1x128xi32> to vector<8x128xi32>
    %591 = arith.cmpi eq, %589, %590 : vector<8x128xi32>
    %592 = vector.extract_strided_slice %46 {offsets = [0, 2], sizes = [8, 1], strides = [1, 1]} : vector<8x8xi32> to vector<8x1xi32>
    %593 = vector.broadcast %592 : vector<8x1xi32> to vector<8x128xi32>
    %594 = vector.broadcast %574 : vector<1x128xi32> to vector<8x128xi32>
    %595 = arith.cmpi eq, %593, %594 : vector<8x128xi32>
    %596 = arith.andi %591, %595 : vector<8x128xi1>
    %cst_154 = arith.constant 3.000000e+00 : f32
    %597 = vector.broadcast %cst_154 : f32 to vector<8x128xf32>
    %598 = arith.minimumf %587, %597 : vector<8x128xf32>
    %599 = arith.select %596, %598, %587 : vector<8x128xi1>, vector<8x128xf32>
    %600 = vector.extract_strided_slice %47 {offsets = [2, 0], sizes = [1, 128], strides = [1, 1]} : vector<8x128xi32> to vector<1x128xi32>
    %601 = vector.broadcast %559 : vector<8x1xi32> to vector<8x128xi32>
    %602 = vector.broadcast %600 : vector<1x128xi32> to vector<8x128xi32>
    %603 = arith.cmpi eq, %601, %602 : vector<8x128xi32>
    %cst_155 = arith.constant 0.000000e+00 : f32
    %cst_156 = arith.constant 1.000000e+00 : f32
    %604 = vector.broadcast %cst_155 : f32 to vector<8x128xf32>
    %605 = vector.broadcast %cst_156 : f32 to vector<8x128xf32>
    %606 = arith.select %603, %604, %605 : vector<8x128xi1>, vector<8x128xf32>
    %cst_157 = arith.constant 1.000000e+00 : f32
    %607 = vector.broadcast %cst_157 : f32 to vector<8x128xf32>
    %608 = arith.addf %423, %607 : vector<8x128xf32>
    %cst_158 = arith.constant 1.000000e+00 : f32
    %609 = vector.broadcast %cst_158 : f32 to vector<8x128xf32>
    %610 = arith.addf %599, %609 : vector<8x128xf32>
    %611 = arith.minimumf %608, %610 : vector<8x128xf32>
    %612 = arith.addf %396, %606 : vector<8x128xf32>
    %613 = arith.minimumf %611, %612 : vector<8x128xf32>
    %614 = vector.extract_strided_slice %47 {offsets = [1, 0], sizes = [1, 128], strides = [1, 1]} : vector<8x128xi32> to vector<1x128xi32>
    %615 = vector.broadcast %559 : vector<8x1xi32> to vector<8x128xi32>
    %616 = vector.broadcast %614 : vector<1x128xi32> to vector<8x128xi32>
    %617 = arith.cmpi eq, %615, %616 : vector<8x128xi32>
    %618 = vector.extract_strided_slice %46 {offsets = [0, 2], sizes = [8, 1], strides = [1, 1]} : vector<8x8xi32> to vector<8x1xi32>
    %619 = vector.broadcast %618 : vector<8x1xi32> to vector<8x128xi32>
    %620 = vector.broadcast %600 : vector<1x128xi32> to vector<8x128xi32>
    %621 = arith.cmpi eq, %619, %620 : vector<8x128xi32>
    %622 = arith.andi %617, %621 : vector<8x128xi1>
    %cst_159 = arith.constant 1.000000e+00 : f32
    %623 = vector.broadcast %cst_159 : f32 to vector<8x128xf32>
    %624 = arith.addf %173, %623 : vector<8x128xf32>
    %625 = arith.minimumf %613, %624 : vector<8x128xf32>
    %626 = arith.select %622, %625, %613 : vector<8x128xi1>, vector<8x128xf32>
    %627 = vector.extract_strided_slice %47 {offsets = [3, 0], sizes = [1, 128], strides = [1, 1]} : vector<8x128xi32> to vector<1x128xi32>
    %628 = vector.broadcast %559 : vector<8x1xi32> to vector<8x128xi32>
    %629 = vector.broadcast %627 : vector<1x128xi32> to vector<8x128xi32>
    %630 = arith.cmpi eq, %628, %629 : vector<8x128xi32>
    %cst_160 = arith.constant 0.000000e+00 : f32
    %cst_161 = arith.constant 1.000000e+00 : f32
    %631 = vector.broadcast %cst_160 : f32 to vector<8x128xf32>
    %632 = vector.broadcast %cst_161 : f32 to vector<8x128xf32>
    %633 = arith.select %630, %631, %632 : vector<8x128xi1>, vector<8x128xf32>
    %cst_162 = arith.constant 1.000000e+00 : f32
    %634 = vector.broadcast %cst_162 : f32 to vector<8x128xf32>
    %635 = arith.addf %450, %634 : vector<8x128xf32>
    %cst_163 = arith.constant 1.000000e+00 : f32
    %636 = vector.broadcast %cst_163 : f32 to vector<8x128xf32>
    %637 = arith.addf %626, %636 : vector<8x128xf32>
    %638 = arith.minimumf %635, %637 : vector<8x128xf32>
    %639 = arith.addf %423, %633 : vector<8x128xf32>
    %640 = arith.minimumf %638, %639 : vector<8x128xf32>
    %641 = vector.extract_strided_slice %47 {offsets = [2, 0], sizes = [1, 128], strides = [1, 1]} : vector<8x128xi32> to vector<1x128xi32>
    %642 = vector.broadcast %559 : vector<8x1xi32> to vector<8x128xi32>
    %643 = vector.broadcast %641 : vector<1x128xi32> to vector<8x128xi32>
    %644 = arith.cmpi eq, %642, %643 : vector<8x128xi32>
    %645 = vector.extract_strided_slice %46 {offsets = [0, 2], sizes = [8, 1], strides = [1, 1]} : vector<8x8xi32> to vector<8x1xi32>
    %646 = vector.broadcast %645 : vector<8x1xi32> to vector<8x128xi32>
    %647 = vector.broadcast %627 : vector<1x128xi32> to vector<8x128xi32>
    %648 = arith.cmpi eq, %646, %647 : vector<8x128xi32>
    %649 = arith.andi %644, %648 : vector<8x128xi1>
    %cst_164 = arith.constant 1.000000e+00 : f32
    %650 = vector.broadcast %cst_164 : f32 to vector<8x128xf32>
    %651 = arith.addf %199, %650 : vector<8x128xf32>
    %652 = arith.minimumf %640, %651 : vector<8x128xf32>
    %653 = arith.select %649, %652, %640 : vector<8x128xi1>, vector<8x128xf32>
    %654 = vector.extract_strided_slice %47 {offsets = [4, 0], sizes = [1, 128], strides = [1, 1]} : vector<8x128xi32> to vector<1x128xi32>
    %655 = vector.broadcast %559 : vector<8x1xi32> to vector<8x128xi32>
    %656 = vector.broadcast %654 : vector<1x128xi32> to vector<8x128xi32>
    %657 = arith.cmpi eq, %655, %656 : vector<8x128xi32>
    %cst_165 = arith.constant 0.000000e+00 : f32
    %cst_166 = arith.constant 1.000000e+00 : f32
    %658 = vector.broadcast %cst_165 : f32 to vector<8x128xf32>
    %659 = vector.broadcast %cst_166 : f32 to vector<8x128xf32>
    %660 = arith.select %657, %658, %659 : vector<8x128xi1>, vector<8x128xf32>
    %cst_167 = arith.constant 1.000000e+00 : f32
    %661 = vector.broadcast %cst_167 : f32 to vector<8x128xf32>
    %662 = arith.addf %477, %661 : vector<8x128xf32>
    %cst_168 = arith.constant 1.000000e+00 : f32
    %663 = vector.broadcast %cst_168 : f32 to vector<8x128xf32>
    %664 = arith.addf %653, %663 : vector<8x128xf32>
    %665 = arith.minimumf %662, %664 : vector<8x128xf32>
    %666 = arith.addf %450, %660 : vector<8x128xf32>
    %667 = arith.minimumf %665, %666 : vector<8x128xf32>
    %668 = vector.extract_strided_slice %47 {offsets = [3, 0], sizes = [1, 128], strides = [1, 1]} : vector<8x128xi32> to vector<1x128xi32>
    %669 = vector.broadcast %559 : vector<8x1xi32> to vector<8x128xi32>
    %670 = vector.broadcast %668 : vector<1x128xi32> to vector<8x128xi32>
    %671 = arith.cmpi eq, %669, %670 : vector<8x128xi32>
    %672 = vector.extract_strided_slice %46 {offsets = [0, 2], sizes = [8, 1], strides = [1, 1]} : vector<8x8xi32> to vector<8x1xi32>
    %673 = vector.broadcast %672 : vector<8x1xi32> to vector<8x128xi32>
    %674 = vector.broadcast %654 : vector<1x128xi32> to vector<8x128xi32>
    %675 = arith.cmpi eq, %673, %674 : vector<8x128xi32>
    %676 = arith.andi %671, %675 : vector<8x128xi1>
    %cst_169 = arith.constant 1.000000e+00 : f32
    %677 = vector.broadcast %cst_169 : f32 to vector<8x128xf32>
    %678 = arith.addf %225, %677 : vector<8x128xf32>
    %679 = arith.minimumf %667, %678 : vector<8x128xf32>
    %680 = arith.select %676, %679, %667 : vector<8x128xi1>, vector<8x128xf32>
    %681 = vector.extract_strided_slice %47 {offsets = [5, 0], sizes = [1, 128], strides = [1, 1]} : vector<8x128xi32> to vector<1x128xi32>
    %682 = vector.broadcast %559 : vector<8x1xi32> to vector<8x128xi32>
    %683 = vector.broadcast %681 : vector<1x128xi32> to vector<8x128xi32>
    %684 = arith.cmpi eq, %682, %683 : vector<8x128xi32>
    %cst_170 = arith.constant 0.000000e+00 : f32
    %cst_171 = arith.constant 1.000000e+00 : f32
    %685 = vector.broadcast %cst_170 : f32 to vector<8x128xf32>
    %686 = vector.broadcast %cst_171 : f32 to vector<8x128xf32>
    %687 = arith.select %684, %685, %686 : vector<8x128xi1>, vector<8x128xf32>
    %cst_172 = arith.constant 1.000000e+00 : f32
    %688 = vector.broadcast %cst_172 : f32 to vector<8x128xf32>
    %689 = arith.addf %504, %688 : vector<8x128xf32>
    %cst_173 = arith.constant 1.000000e+00 : f32
    %690 = vector.broadcast %cst_173 : f32 to vector<8x128xf32>
    %691 = arith.addf %680, %690 : vector<8x128xf32>
    %692 = arith.minimumf %689, %691 : vector<8x128xf32>
    %693 = arith.addf %477, %687 : vector<8x128xf32>
    %694 = arith.minimumf %692, %693 : vector<8x128xf32>
    %695 = vector.extract_strided_slice %47 {offsets = [4, 0], sizes = [1, 128], strides = [1, 1]} : vector<8x128xi32> to vector<1x128xi32>
    %696 = vector.broadcast %559 : vector<8x1xi32> to vector<8x128xi32>
    %697 = vector.broadcast %695 : vector<1x128xi32> to vector<8x128xi32>
    %698 = arith.cmpi eq, %696, %697 : vector<8x128xi32>
    %699 = vector.extract_strided_slice %46 {offsets = [0, 2], sizes = [8, 1], strides = [1, 1]} : vector<8x8xi32> to vector<8x1xi32>
    %700 = vector.broadcast %699 : vector<8x1xi32> to vector<8x128xi32>
    %701 = vector.broadcast %681 : vector<1x128xi32> to vector<8x128xi32>
    %702 = arith.cmpi eq, %700, %701 : vector<8x128xi32>
    %703 = arith.andi %698, %702 : vector<8x128xi1>
    %cst_174 = arith.constant 1.000000e+00 : f32
    %704 = vector.broadcast %cst_174 : f32 to vector<8x128xf32>
    %705 = arith.addf %251, %704 : vector<8x128xf32>
    %706 = arith.minimumf %694, %705 : vector<8x128xf32>
    %707 = arith.select %703, %706, %694 : vector<8x128xi1>, vector<8x128xf32>
    %708 = vector.extract_strided_slice %47 {offsets = [6, 0], sizes = [1, 128], strides = [1, 1]} : vector<8x128xi32> to vector<1x128xi32>
    %709 = vector.broadcast %559 : vector<8x1xi32> to vector<8x128xi32>
    %710 = vector.broadcast %708 : vector<1x128xi32> to vector<8x128xi32>
    %711 = arith.cmpi eq, %709, %710 : vector<8x128xi32>
    %cst_175 = arith.constant 0.000000e+00 : f32
    %cst_176 = arith.constant 1.000000e+00 : f32
    %712 = vector.broadcast %cst_175 : f32 to vector<8x128xf32>
    %713 = vector.broadcast %cst_176 : f32 to vector<8x128xf32>
    %714 = arith.select %711, %712, %713 : vector<8x128xi1>, vector<8x128xf32>
    %cst_177 = arith.constant 1.000000e+00 : f32
    %715 = vector.broadcast %cst_177 : f32 to vector<8x128xf32>
    %716 = arith.addf %531, %715 : vector<8x128xf32>
    %cst_178 = arith.constant 1.000000e+00 : f32
    %717 = vector.broadcast %cst_178 : f32 to vector<8x128xf32>
    %718 = arith.addf %707, %717 : vector<8x128xf32>
    %719 = arith.minimumf %716, %718 : vector<8x128xf32>
    %720 = arith.addf %504, %714 : vector<8x128xf32>
    %721 = arith.minimumf %719, %720 : vector<8x128xf32>
    %722 = vector.extract_strided_slice %47 {offsets = [5, 0], sizes = [1, 128], strides = [1, 1]} : vector<8x128xi32> to vector<1x128xi32>
    %723 = vector.broadcast %559 : vector<8x1xi32> to vector<8x128xi32>
    %724 = vector.broadcast %722 : vector<1x128xi32> to vector<8x128xi32>
    %725 = arith.cmpi eq, %723, %724 : vector<8x128xi32>
    %726 = vector.extract_strided_slice %46 {offsets = [0, 2], sizes = [8, 1], strides = [1, 1]} : vector<8x8xi32> to vector<8x1xi32>
    %727 = vector.broadcast %726 : vector<8x1xi32> to vector<8x128xi32>
    %728 = vector.broadcast %708 : vector<1x128xi32> to vector<8x128xi32>
    %729 = arith.cmpi eq, %727, %728 : vector<8x128xi32>
    %730 = arith.andi %725, %729 : vector<8x128xi1>
    %cst_179 = arith.constant 1.000000e+00 : f32
    %731 = vector.broadcast %cst_179 : f32 to vector<8x128xf32>
    %732 = arith.addf %277, %731 : vector<8x128xf32>
    %733 = arith.minimumf %721, %732 : vector<8x128xf32>
    %734 = arith.select %730, %733, %721 : vector<8x128xi1>, vector<8x128xf32>
    %735 = vector.extract_strided_slice %47 {offsets = [7, 0], sizes = [1, 128], strides = [1, 1]} : vector<8x128xi32> to vector<1x128xi32>
    %736 = vector.broadcast %559 : vector<8x1xi32> to vector<8x128xi32>
    %737 = vector.broadcast %735 : vector<1x128xi32> to vector<8x128xi32>
    %738 = arith.cmpi eq, %736, %737 : vector<8x128xi32>
    %cst_180 = arith.constant 0.000000e+00 : f32
    %cst_181 = arith.constant 1.000000e+00 : f32
    %739 = vector.broadcast %cst_180 : f32 to vector<8x128xf32>
    %740 = vector.broadcast %cst_181 : f32 to vector<8x128xf32>
    %741 = arith.select %738, %739, %740 : vector<8x128xi1>, vector<8x128xf32>
    %cst_182 = arith.constant 1.000000e+00 : f32
    %742 = vector.broadcast %cst_182 : f32 to vector<8x128xf32>
    %743 = arith.addf %558, %742 : vector<8x128xf32>
    %cst_183 = arith.constant 1.000000e+00 : f32
    %744 = vector.broadcast %cst_183 : f32 to vector<8x128xf32>
    %745 = arith.addf %734, %744 : vector<8x128xf32>
    %746 = arith.minimumf %743, %745 : vector<8x128xf32>
    %747 = arith.addf %531, %741 : vector<8x128xf32>
    %748 = arith.minimumf %746, %747 : vector<8x128xf32>
    %749 = vector.extract_strided_slice %47 {offsets = [6, 0], sizes = [1, 128], strides = [1, 1]} : vector<8x128xi32> to vector<1x128xi32>
    %750 = vector.broadcast %559 : vector<8x1xi32> to vector<8x128xi32>
    %751 = vector.broadcast %749 : vector<1x128xi32> to vector<8x128xi32>
    %752 = arith.cmpi eq, %750, %751 : vector<8x128xi32>
    %753 = vector.extract_strided_slice %46 {offsets = [0, 2], sizes = [8, 1], strides = [1, 1]} : vector<8x8xi32> to vector<8x1xi32>
    %754 = vector.broadcast %753 : vector<8x1xi32> to vector<8x128xi32>
    %755 = vector.broadcast %735 : vector<1x128xi32> to vector<8x128xi32>
    %756 = arith.cmpi eq, %754, %755 : vector<8x128xi32>
    %757 = arith.andi %752, %756 : vector<8x128xi1>
    %cst_184 = arith.constant 1.000000e+00 : f32
    %758 = vector.broadcast %cst_184 : f32 to vector<8x128xf32>
    %759 = arith.addf %303, %758 : vector<8x128xf32>
    %760 = arith.minimumf %748, %759 : vector<8x128xf32>
    %761 = arith.select %757, %760, %748 : vector<8x128xi1>, vector<8x128xf32>
    %762 = vector.extract_strided_slice %46 {offsets = [0, 4], sizes = [8, 1], strides = [1, 1]} : vector<8x8xi32> to vector<8x1xi32>
    %763 = vector.extract_strided_slice %47 {offsets = [0, 0], sizes = [1, 128], strides = [1, 1]} : vector<8x128xi32> to vector<1x128xi32>
    %764 = vector.broadcast %762 : vector<8x1xi32> to vector<8x128xi32>
    %765 = vector.broadcast %763 : vector<1x128xi32> to vector<8x128xi32>
    %766 = arith.cmpi eq, %764, %765 : vector<8x128xi32>
    %cst_185 = arith.constant 0.000000e+00 : f32
    %cst_186 = arith.constant 1.000000e+00 : f32
    %767 = vector.broadcast %cst_185 : f32 to vector<8x128xf32>
    %768 = vector.broadcast %cst_186 : f32 to vector<8x128xf32>
    %769 = arith.select %766, %767, %768 : vector<8x128xi1>, vector<8x128xf32>
    %cst_187 = arith.constant 1.000000e+00 : f32
    %770 = vector.broadcast %cst_187 : f32 to vector<8x128xf32>
    %771 = arith.addf %573, %770 : vector<8x128xf32>
    %cst_188 = arith.constant 6.000000e+00 : f32
    %772 = vector.broadcast %cst_188 : f32 to vector<8x128xf32>
    %773 = arith.minimumf %771, %772 : vector<8x128xf32>
    %cst_189 = arith.constant 4.000000e+00 : f32
    %774 = vector.broadcast %cst_189 : f32 to vector<8x128xf32>
    %775 = arith.addf %774, %769 : vector<8x128xf32>
    %776 = arith.minimumf %773, %775 : vector<8x128xf32>
    %777 = vector.extract_strided_slice %47 {offsets = [1, 0], sizes = [1, 128], strides = [1, 1]} : vector<8x128xi32> to vector<1x128xi32>
    %778 = vector.broadcast %762 : vector<8x1xi32> to vector<8x128xi32>
    %779 = vector.broadcast %777 : vector<1x128xi32> to vector<8x128xi32>
    %780 = arith.cmpi eq, %778, %779 : vector<8x128xi32>
    %cst_190 = arith.constant 0.000000e+00 : f32
    %cst_191 = arith.constant 1.000000e+00 : f32
    %781 = vector.broadcast %cst_190 : f32 to vector<8x128xf32>
    %782 = vector.broadcast %cst_191 : f32 to vector<8x128xf32>
    %783 = arith.select %780, %781, %782 : vector<8x128xi1>, vector<8x128xf32>
    %cst_192 = arith.constant 1.000000e+00 : f32
    %784 = vector.broadcast %cst_192 : f32 to vector<8x128xf32>
    %785 = arith.addf %599, %784 : vector<8x128xf32>
    %cst_193 = arith.constant 1.000000e+00 : f32
    %786 = vector.broadcast %cst_193 : f32 to vector<8x128xf32>
    %787 = arith.addf %776, %786 : vector<8x128xf32>
    %788 = arith.minimumf %785, %787 : vector<8x128xf32>
    %789 = arith.addf %573, %783 : vector<8x128xf32>
    %790 = arith.minimumf %788, %789 : vector<8x128xf32>
    %791 = vector.extract_strided_slice %47 {offsets = [0, 0], sizes = [1, 128], strides = [1, 1]} : vector<8x128xi32> to vector<1x128xi32>
    %792 = vector.broadcast %762 : vector<8x1xi32> to vector<8x128xi32>
    %793 = vector.broadcast %791 : vector<1x128xi32> to vector<8x128xi32>
    %794 = arith.cmpi eq, %792, %793 : vector<8x128xi32>
    %795 = vector.extract_strided_slice %46 {offsets = [0, 3], sizes = [8, 1], strides = [1, 1]} : vector<8x8xi32> to vector<8x1xi32>
    %796 = vector.broadcast %795 : vector<8x1xi32> to vector<8x128xi32>
    %797 = vector.broadcast %777 : vector<1x128xi32> to vector<8x128xi32>
    %798 = arith.cmpi eq, %796, %797 : vector<8x128xi32>
    %799 = arith.andi %794, %798 : vector<8x128xi1>
    %cst_194 = arith.constant 4.000000e+00 : f32
    %800 = vector.broadcast %cst_194 : f32 to vector<8x128xf32>
    %801 = arith.minimumf %790, %800 : vector<8x128xf32>
    %802 = arith.select %799, %801, %790 : vector<8x128xi1>, vector<8x128xf32>
    %803 = vector.extract_strided_slice %47 {offsets = [2, 0], sizes = [1, 128], strides = [1, 1]} : vector<8x128xi32> to vector<1x128xi32>
    %804 = vector.broadcast %762 : vector<8x1xi32> to vector<8x128xi32>
    %805 = vector.broadcast %803 : vector<1x128xi32> to vector<8x128xi32>
    %806 = arith.cmpi eq, %804, %805 : vector<8x128xi32>
    %cst_195 = arith.constant 0.000000e+00 : f32
    %cst_196 = arith.constant 1.000000e+00 : f32
    %807 = vector.broadcast %cst_195 : f32 to vector<8x128xf32>
    %808 = vector.broadcast %cst_196 : f32 to vector<8x128xf32>
    %809 = arith.select %806, %807, %808 : vector<8x128xi1>, vector<8x128xf32>
    %cst_197 = arith.constant 1.000000e+00 : f32
    %810 = vector.broadcast %cst_197 : f32 to vector<8x128xf32>
    %811 = arith.addf %626, %810 : vector<8x128xf32>
    %cst_198 = arith.constant 1.000000e+00 : f32
    %812 = vector.broadcast %cst_198 : f32 to vector<8x128xf32>
    %813 = arith.addf %802, %812 : vector<8x128xf32>
    %814 = arith.minimumf %811, %813 : vector<8x128xf32>
    %815 = arith.addf %599, %809 : vector<8x128xf32>
    %816 = arith.minimumf %814, %815 : vector<8x128xf32>
    %817 = vector.extract_strided_slice %47 {offsets = [1, 0], sizes = [1, 128], strides = [1, 1]} : vector<8x128xi32> to vector<1x128xi32>
    %818 = vector.broadcast %762 : vector<8x1xi32> to vector<8x128xi32>
    %819 = vector.broadcast %817 : vector<1x128xi32> to vector<8x128xi32>
    %820 = arith.cmpi eq, %818, %819 : vector<8x128xi32>
    %821 = vector.extract_strided_slice %46 {offsets = [0, 3], sizes = [8, 1], strides = [1, 1]} : vector<8x8xi32> to vector<8x1xi32>
    %822 = vector.broadcast %821 : vector<8x1xi32> to vector<8x128xi32>
    %823 = vector.broadcast %803 : vector<1x128xi32> to vector<8x128xi32>
    %824 = arith.cmpi eq, %822, %823 : vector<8x128xi32>
    %825 = arith.andi %820, %824 : vector<8x128xi1>
    %cst_199 = arith.constant 1.000000e+00 : f32
    %826 = vector.broadcast %cst_199 : f32 to vector<8x128xf32>
    %827 = arith.addf %370, %826 : vector<8x128xf32>
    %828 = arith.minimumf %816, %827 : vector<8x128xf32>
    %829 = arith.select %825, %828, %816 : vector<8x128xi1>, vector<8x128xf32>
    %830 = vector.extract_strided_slice %47 {offsets = [3, 0], sizes = [1, 128], strides = [1, 1]} : vector<8x128xi32> to vector<1x128xi32>
    %831 = vector.broadcast %762 : vector<8x1xi32> to vector<8x128xi32>
    %832 = vector.broadcast %830 : vector<1x128xi32> to vector<8x128xi32>
    %833 = arith.cmpi eq, %831, %832 : vector<8x128xi32>
    %cst_200 = arith.constant 0.000000e+00 : f32
    %cst_201 = arith.constant 1.000000e+00 : f32
    %834 = vector.broadcast %cst_200 : f32 to vector<8x128xf32>
    %835 = vector.broadcast %cst_201 : f32 to vector<8x128xf32>
    %836 = arith.select %833, %834, %835 : vector<8x128xi1>, vector<8x128xf32>
    %cst_202 = arith.constant 1.000000e+00 : f32
    %837 = vector.broadcast %cst_202 : f32 to vector<8x128xf32>
    %838 = arith.addf %653, %837 : vector<8x128xf32>
    %cst_203 = arith.constant 1.000000e+00 : f32
    %839 = vector.broadcast %cst_203 : f32 to vector<8x128xf32>
    %840 = arith.addf %829, %839 : vector<8x128xf32>
    %841 = arith.minimumf %838, %840 : vector<8x128xf32>
    %842 = arith.addf %626, %836 : vector<8x128xf32>
    %843 = arith.minimumf %841, %842 : vector<8x128xf32>
    %844 = vector.extract_strided_slice %47 {offsets = [2, 0], sizes = [1, 128], strides = [1, 1]} : vector<8x128xi32> to vector<1x128xi32>
    %845 = vector.broadcast %762 : vector<8x1xi32> to vector<8x128xi32>
    %846 = vector.broadcast %844 : vector<1x128xi32> to vector<8x128xi32>
    %847 = arith.cmpi eq, %845, %846 : vector<8x128xi32>
    %848 = vector.extract_strided_slice %46 {offsets = [0, 3], sizes = [8, 1], strides = [1, 1]} : vector<8x8xi32> to vector<8x1xi32>
    %849 = vector.broadcast %848 : vector<8x1xi32> to vector<8x128xi32>
    %850 = vector.broadcast %830 : vector<1x128xi32> to vector<8x128xi32>
    %851 = arith.cmpi eq, %849, %850 : vector<8x128xi32>
    %852 = arith.andi %847, %851 : vector<8x128xi1>
    %cst_204 = arith.constant 1.000000e+00 : f32
    %853 = vector.broadcast %cst_204 : f32 to vector<8x128xf32>
    %854 = arith.addf %396, %853 : vector<8x128xf32>
    %855 = arith.minimumf %843, %854 : vector<8x128xf32>
    %856 = arith.select %852, %855, %843 : vector<8x128xi1>, vector<8x128xf32>
    %857 = vector.extract_strided_slice %47 {offsets = [4, 0], sizes = [1, 128], strides = [1, 1]} : vector<8x128xi32> to vector<1x128xi32>
    %858 = vector.broadcast %762 : vector<8x1xi32> to vector<8x128xi32>
    %859 = vector.broadcast %857 : vector<1x128xi32> to vector<8x128xi32>
    %860 = arith.cmpi eq, %858, %859 : vector<8x128xi32>
    %cst_205 = arith.constant 0.000000e+00 : f32
    %cst_206 = arith.constant 1.000000e+00 : f32
    %861 = vector.broadcast %cst_205 : f32 to vector<8x128xf32>
    %862 = vector.broadcast %cst_206 : f32 to vector<8x128xf32>
    %863 = arith.select %860, %861, %862 : vector<8x128xi1>, vector<8x128xf32>
    %cst_207 = arith.constant 1.000000e+00 : f32
    %864 = vector.broadcast %cst_207 : f32 to vector<8x128xf32>
    %865 = arith.addf %680, %864 : vector<8x128xf32>
    %cst_208 = arith.constant 1.000000e+00 : f32
    %866 = vector.broadcast %cst_208 : f32 to vector<8x128xf32>
    %867 = arith.addf %856, %866 : vector<8x128xf32>
    %868 = arith.minimumf %865, %867 : vector<8x128xf32>
    %869 = arith.addf %653, %863 : vector<8x128xf32>
    %870 = arith.minimumf %868, %869 : vector<8x128xf32>
    %871 = vector.extract_strided_slice %47 {offsets = [3, 0], sizes = [1, 128], strides = [1, 1]} : vector<8x128xi32> to vector<1x128xi32>
    %872 = vector.broadcast %762 : vector<8x1xi32> to vector<8x128xi32>
    %873 = vector.broadcast %871 : vector<1x128xi32> to vector<8x128xi32>
    %874 = arith.cmpi eq, %872, %873 : vector<8x128xi32>
    %875 = vector.extract_strided_slice %46 {offsets = [0, 3], sizes = [8, 1], strides = [1, 1]} : vector<8x8xi32> to vector<8x1xi32>
    %876 = vector.broadcast %875 : vector<8x1xi32> to vector<8x128xi32>
    %877 = vector.broadcast %857 : vector<1x128xi32> to vector<8x128xi32>
    %878 = arith.cmpi eq, %876, %877 : vector<8x128xi32>
    %879 = arith.andi %874, %878 : vector<8x128xi1>
    %cst_209 = arith.constant 1.000000e+00 : f32
    %880 = vector.broadcast %cst_209 : f32 to vector<8x128xf32>
    %881 = arith.addf %423, %880 : vector<8x128xf32>
    %882 = arith.minimumf %870, %881 : vector<8x128xf32>
    %883 = arith.select %879, %882, %870 : vector<8x128xi1>, vector<8x128xf32>
    %884 = vector.extract_strided_slice %47 {offsets = [5, 0], sizes = [1, 128], strides = [1, 1]} : vector<8x128xi32> to vector<1x128xi32>
    %885 = vector.broadcast %762 : vector<8x1xi32> to vector<8x128xi32>
    %886 = vector.broadcast %884 : vector<1x128xi32> to vector<8x128xi32>
    %887 = arith.cmpi eq, %885, %886 : vector<8x128xi32>
    %cst_210 = arith.constant 0.000000e+00 : f32
    %cst_211 = arith.constant 1.000000e+00 : f32
    %888 = vector.broadcast %cst_210 : f32 to vector<8x128xf32>
    %889 = vector.broadcast %cst_211 : f32 to vector<8x128xf32>
    %890 = arith.select %887, %888, %889 : vector<8x128xi1>, vector<8x128xf32>
    %cst_212 = arith.constant 1.000000e+00 : f32
    %891 = vector.broadcast %cst_212 : f32 to vector<8x128xf32>
    %892 = arith.addf %707, %891 : vector<8x128xf32>
    %cst_213 = arith.constant 1.000000e+00 : f32
    %893 = vector.broadcast %cst_213 : f32 to vector<8x128xf32>
    %894 = arith.addf %883, %893 : vector<8x128xf32>
    %895 = arith.minimumf %892, %894 : vector<8x128xf32>
    %896 = arith.addf %680, %890 : vector<8x128xf32>
    %897 = arith.minimumf %895, %896 : vector<8x128xf32>
    %898 = vector.extract_strided_slice %47 {offsets = [4, 0], sizes = [1, 128], strides = [1, 1]} : vector<8x128xi32> to vector<1x128xi32>
    %899 = vector.broadcast %762 : vector<8x1xi32> to vector<8x128xi32>
    %900 = vector.broadcast %898 : vector<1x128xi32> to vector<8x128xi32>
    %901 = arith.cmpi eq, %899, %900 : vector<8x128xi32>
    %902 = vector.extract_strided_slice %46 {offsets = [0, 3], sizes = [8, 1], strides = [1, 1]} : vector<8x8xi32> to vector<8x1xi32>
    %903 = vector.broadcast %902 : vector<8x1xi32> to vector<8x128xi32>
    %904 = vector.broadcast %884 : vector<1x128xi32> to vector<8x128xi32>
    %905 = arith.cmpi eq, %903, %904 : vector<8x128xi32>
    %906 = arith.andi %901, %905 : vector<8x128xi1>
    %cst_214 = arith.constant 1.000000e+00 : f32
    %907 = vector.broadcast %cst_214 : f32 to vector<8x128xf32>
    %908 = arith.addf %450, %907 : vector<8x128xf32>
    %909 = arith.minimumf %897, %908 : vector<8x128xf32>
    %910 = arith.select %906, %909, %897 : vector<8x128xi1>, vector<8x128xf32>
    %911 = vector.extract_strided_slice %47 {offsets = [6, 0], sizes = [1, 128], strides = [1, 1]} : vector<8x128xi32> to vector<1x128xi32>
    %912 = vector.broadcast %762 : vector<8x1xi32> to vector<8x128xi32>
    %913 = vector.broadcast %911 : vector<1x128xi32> to vector<8x128xi32>
    %914 = arith.cmpi eq, %912, %913 : vector<8x128xi32>
    %cst_215 = arith.constant 0.000000e+00 : f32
    %cst_216 = arith.constant 1.000000e+00 : f32
    %915 = vector.broadcast %cst_215 : f32 to vector<8x128xf32>
    %916 = vector.broadcast %cst_216 : f32 to vector<8x128xf32>
    %917 = arith.select %914, %915, %916 : vector<8x128xi1>, vector<8x128xf32>
    %cst_217 = arith.constant 1.000000e+00 : f32
    %918 = vector.broadcast %cst_217 : f32 to vector<8x128xf32>
    %919 = arith.addf %734, %918 : vector<8x128xf32>
    %cst_218 = arith.constant 1.000000e+00 : f32
    %920 = vector.broadcast %cst_218 : f32 to vector<8x128xf32>
    %921 = arith.addf %910, %920 : vector<8x128xf32>
    %922 = arith.minimumf %919, %921 : vector<8x128xf32>
    %923 = arith.addf %707, %917 : vector<8x128xf32>
    %924 = arith.minimumf %922, %923 : vector<8x128xf32>
    %925 = vector.extract_strided_slice %47 {offsets = [5, 0], sizes = [1, 128], strides = [1, 1]} : vector<8x128xi32> to vector<1x128xi32>
    %926 = vector.broadcast %762 : vector<8x1xi32> to vector<8x128xi32>
    %927 = vector.broadcast %925 : vector<1x128xi32> to vector<8x128xi32>
    %928 = arith.cmpi eq, %926, %927 : vector<8x128xi32>
    %929 = vector.extract_strided_slice %46 {offsets = [0, 3], sizes = [8, 1], strides = [1, 1]} : vector<8x8xi32> to vector<8x1xi32>
    %930 = vector.broadcast %929 : vector<8x1xi32> to vector<8x128xi32>
    %931 = vector.broadcast %911 : vector<1x128xi32> to vector<8x128xi32>
    %932 = arith.cmpi eq, %930, %931 : vector<8x128xi32>
    %933 = arith.andi %928, %932 : vector<8x128xi1>
    %cst_219 = arith.constant 1.000000e+00 : f32
    %934 = vector.broadcast %cst_219 : f32 to vector<8x128xf32>
    %935 = arith.addf %477, %934 : vector<8x128xf32>
    %936 = arith.minimumf %924, %935 : vector<8x128xf32>
    %937 = arith.select %933, %936, %924 : vector<8x128xi1>, vector<8x128xf32>
    %938 = vector.extract_strided_slice %47 {offsets = [7, 0], sizes = [1, 128], strides = [1, 1]} : vector<8x128xi32> to vector<1x128xi32>
    %939 = vector.broadcast %762 : vector<8x1xi32> to vector<8x128xi32>
    %940 = vector.broadcast %938 : vector<1x128xi32> to vector<8x128xi32>
    %941 = arith.cmpi eq, %939, %940 : vector<8x128xi32>
    %cst_220 = arith.constant 0.000000e+00 : f32
    %cst_221 = arith.constant 1.000000e+00 : f32
    %942 = vector.broadcast %cst_220 : f32 to vector<8x128xf32>
    %943 = vector.broadcast %cst_221 : f32 to vector<8x128xf32>
    %944 = arith.select %941, %942, %943 : vector<8x128xi1>, vector<8x128xf32>
    %cst_222 = arith.constant 1.000000e+00 : f32
    %945 = vector.broadcast %cst_222 : f32 to vector<8x128xf32>
    %946 = arith.addf %761, %945 : vector<8x128xf32>
    %cst_223 = arith.constant 1.000000e+00 : f32
    %947 = vector.broadcast %cst_223 : f32 to vector<8x128xf32>
    %948 = arith.addf %937, %947 : vector<8x128xf32>
    %949 = arith.minimumf %946, %948 : vector<8x128xf32>
    %950 = arith.addf %734, %944 : vector<8x128xf32>
    %951 = arith.minimumf %949, %950 : vector<8x128xf32>
    %952 = vector.extract_strided_slice %47 {offsets = [6, 0], sizes = [1, 128], strides = [1, 1]} : vector<8x128xi32> to vector<1x128xi32>
    %953 = vector.broadcast %762 : vector<8x1xi32> to vector<8x128xi32>
    %954 = vector.broadcast %952 : vector<1x128xi32> to vector<8x128xi32>
    %955 = arith.cmpi eq, %953, %954 : vector<8x128xi32>
    %956 = vector.extract_strided_slice %46 {offsets = [0, 3], sizes = [8, 1], strides = [1, 1]} : vector<8x8xi32> to vector<8x1xi32>
    %957 = vector.broadcast %956 : vector<8x1xi32> to vector<8x128xi32>
    %958 = vector.broadcast %938 : vector<1x128xi32> to vector<8x128xi32>
    %959 = arith.cmpi eq, %957, %958 : vector<8x128xi32>
    %960 = arith.andi %955, %959 : vector<8x128xi1>
    %cst_224 = arith.constant 1.000000e+00 : f32
    %961 = vector.broadcast %cst_224 : f32 to vector<8x128xf32>
    %962 = arith.addf %504, %961 : vector<8x128xf32>
    %963 = arith.minimumf %951, %962 : vector<8x128xf32>
    %964 = arith.select %960, %963, %951 : vector<8x128xi1>, vector<8x128xf32>
    %965 = vector.extract_strided_slice %46 {offsets = [0, 5], sizes = [8, 1], strides = [1, 1]} : vector<8x8xi32> to vector<8x1xi32>
    %966 = vector.extract_strided_slice %47 {offsets = [0, 0], sizes = [1, 128], strides = [1, 1]} : vector<8x128xi32> to vector<1x128xi32>
    %967 = vector.broadcast %965 : vector<8x1xi32> to vector<8x128xi32>
    %968 = vector.broadcast %966 : vector<1x128xi32> to vector<8x128xi32>
    %969 = arith.cmpi eq, %967, %968 : vector<8x128xi32>
    %cst_225 = arith.constant 0.000000e+00 : f32
    %cst_226 = arith.constant 1.000000e+00 : f32
    %970 = vector.broadcast %cst_225 : f32 to vector<8x128xf32>
    %971 = vector.broadcast %cst_226 : f32 to vector<8x128xf32>
    %972 = arith.select %969, %970, %971 : vector<8x128xi1>, vector<8x128xf32>
    %cst_227 = arith.constant 1.000000e+00 : f32
    %973 = vector.broadcast %cst_227 : f32 to vector<8x128xf32>
    %974 = arith.addf %776, %973 : vector<8x128xf32>
    %cst_228 = arith.constant 7.000000e+00 : f32
    %975 = vector.broadcast %cst_228 : f32 to vector<8x128xf32>
    %976 = arith.minimumf %974, %975 : vector<8x128xf32>
    %cst_229 = arith.constant 5.000000e+00 : f32
    %977 = vector.broadcast %cst_229 : f32 to vector<8x128xf32>
    %978 = arith.addf %977, %972 : vector<8x128xf32>
    %979 = arith.minimumf %976, %978 : vector<8x128xf32>
    %980 = vector.extract_strided_slice %47 {offsets = [1, 0], sizes = [1, 128], strides = [1, 1]} : vector<8x128xi32> to vector<1x128xi32>
    %981 = vector.broadcast %965 : vector<8x1xi32> to vector<8x128xi32>
    %982 = vector.broadcast %980 : vector<1x128xi32> to vector<8x128xi32>
    %983 = arith.cmpi eq, %981, %982 : vector<8x128xi32>
    %cst_230 = arith.constant 0.000000e+00 : f32
    %cst_231 = arith.constant 1.000000e+00 : f32
    %984 = vector.broadcast %cst_230 : f32 to vector<8x128xf32>
    %985 = vector.broadcast %cst_231 : f32 to vector<8x128xf32>
    %986 = arith.select %983, %984, %985 : vector<8x128xi1>, vector<8x128xf32>
    %cst_232 = arith.constant 1.000000e+00 : f32
    %987 = vector.broadcast %cst_232 : f32 to vector<8x128xf32>
    %988 = arith.addf %802, %987 : vector<8x128xf32>
    %cst_233 = arith.constant 1.000000e+00 : f32
    %989 = vector.broadcast %cst_233 : f32 to vector<8x128xf32>
    %990 = arith.addf %979, %989 : vector<8x128xf32>
    %991 = arith.minimumf %988, %990 : vector<8x128xf32>
    %992 = arith.addf %776, %986 : vector<8x128xf32>
    %993 = arith.minimumf %991, %992 : vector<8x128xf32>
    %994 = vector.extract_strided_slice %47 {offsets = [0, 0], sizes = [1, 128], strides = [1, 1]} : vector<8x128xi32> to vector<1x128xi32>
    %995 = vector.broadcast %965 : vector<8x1xi32> to vector<8x128xi32>
    %996 = vector.broadcast %994 : vector<1x128xi32> to vector<8x128xi32>
    %997 = arith.cmpi eq, %995, %996 : vector<8x128xi32>
    %998 = vector.extract_strided_slice %46 {offsets = [0, 4], sizes = [8, 1], strides = [1, 1]} : vector<8x8xi32> to vector<8x1xi32>
    %999 = vector.broadcast %998 : vector<8x1xi32> to vector<8x128xi32>
    %1000 = vector.broadcast %980 : vector<1x128xi32> to vector<8x128xi32>
    %1001 = arith.cmpi eq, %999, %1000 : vector<8x128xi32>
    %1002 = arith.andi %997, %1001 : vector<8x128xi1>
    %cst_234 = arith.constant 5.000000e+00 : f32
    %1003 = vector.broadcast %cst_234 : f32 to vector<8x128xf32>
    %1004 = arith.minimumf %993, %1003 : vector<8x128xf32>
    %1005 = arith.select %1002, %1004, %993 : vector<8x128xi1>, vector<8x128xf32>
    %1006 = vector.extract_strided_slice %47 {offsets = [2, 0], sizes = [1, 128], strides = [1, 1]} : vector<8x128xi32> to vector<1x128xi32>
    %1007 = vector.broadcast %965 : vector<8x1xi32> to vector<8x128xi32>
    %1008 = vector.broadcast %1006 : vector<1x128xi32> to vector<8x128xi32>
    %1009 = arith.cmpi eq, %1007, %1008 : vector<8x128xi32>
    %cst_235 = arith.constant 0.000000e+00 : f32
    %cst_236 = arith.constant 1.000000e+00 : f32
    %1010 = vector.broadcast %cst_235 : f32 to vector<8x128xf32>
    %1011 = vector.broadcast %cst_236 : f32 to vector<8x128xf32>
    %1012 = arith.select %1009, %1010, %1011 : vector<8x128xi1>, vector<8x128xf32>
    %cst_237 = arith.constant 1.000000e+00 : f32
    %1013 = vector.broadcast %cst_237 : f32 to vector<8x128xf32>
    %1014 = arith.addf %829, %1013 : vector<8x128xf32>
    %cst_238 = arith.constant 1.000000e+00 : f32
    %1015 = vector.broadcast %cst_238 : f32 to vector<8x128xf32>
    %1016 = arith.addf %1005, %1015 : vector<8x128xf32>
    %1017 = arith.minimumf %1014, %1016 : vector<8x128xf32>
    %1018 = arith.addf %802, %1012 : vector<8x128xf32>
    %1019 = arith.minimumf %1017, %1018 : vector<8x128xf32>
    %1020 = vector.extract_strided_slice %47 {offsets = [1, 0], sizes = [1, 128], strides = [1, 1]} : vector<8x128xi32> to vector<1x128xi32>
    %1021 = vector.broadcast %965 : vector<8x1xi32> to vector<8x128xi32>
    %1022 = vector.broadcast %1020 : vector<1x128xi32> to vector<8x128xi32>
    %1023 = arith.cmpi eq, %1021, %1022 : vector<8x128xi32>
    %1024 = vector.extract_strided_slice %46 {offsets = [0, 4], sizes = [8, 1], strides = [1, 1]} : vector<8x8xi32> to vector<8x1xi32>
    %1025 = vector.broadcast %1024 : vector<8x1xi32> to vector<8x128xi32>
    %1026 = vector.broadcast %1006 : vector<1x128xi32> to vector<8x128xi32>
    %1027 = arith.cmpi eq, %1025, %1026 : vector<8x128xi32>
    %1028 = arith.andi %1023, %1027 : vector<8x128xi1>
    %cst_239 = arith.constant 1.000000e+00 : f32
    %1029 = vector.broadcast %cst_239 : f32 to vector<8x128xf32>
    %1030 = arith.addf %573, %1029 : vector<8x128xf32>
    %1031 = arith.minimumf %1019, %1030 : vector<8x128xf32>
    %1032 = arith.select %1028, %1031, %1019 : vector<8x128xi1>, vector<8x128xf32>
    %1033 = vector.extract_strided_slice %47 {offsets = [3, 0], sizes = [1, 128], strides = [1, 1]} : vector<8x128xi32> to vector<1x128xi32>
    %1034 = vector.broadcast %965 : vector<8x1xi32> to vector<8x128xi32>
    %1035 = vector.broadcast %1033 : vector<1x128xi32> to vector<8x128xi32>
    %1036 = arith.cmpi eq, %1034, %1035 : vector<8x128xi32>
    %cst_240 = arith.constant 0.000000e+00 : f32
    %cst_241 = arith.constant 1.000000e+00 : f32
    %1037 = vector.broadcast %cst_240 : f32 to vector<8x128xf32>
    %1038 = vector.broadcast %cst_241 : f32 to vector<8x128xf32>
    %1039 = arith.select %1036, %1037, %1038 : vector<8x128xi1>, vector<8x128xf32>
    %cst_242 = arith.constant 1.000000e+00 : f32
    %1040 = vector.broadcast %cst_242 : f32 to vector<8x128xf32>
    %1041 = arith.addf %856, %1040 : vector<8x128xf32>
    %cst_243 = arith.constant 1.000000e+00 : f32
    %1042 = vector.broadcast %cst_243 : f32 to vector<8x128xf32>
    %1043 = arith.addf %1032, %1042 : vector<8x128xf32>
    %1044 = arith.minimumf %1041, %1043 : vector<8x128xf32>
    %1045 = arith.addf %829, %1039 : vector<8x128xf32>
    %1046 = arith.minimumf %1044, %1045 : vector<8x128xf32>
    %1047 = vector.extract_strided_slice %47 {offsets = [2, 0], sizes = [1, 128], strides = [1, 1]} : vector<8x128xi32> to vector<1x128xi32>
    %1048 = vector.broadcast %965 : vector<8x1xi32> to vector<8x128xi32>
    %1049 = vector.broadcast %1047 : vector<1x128xi32> to vector<8x128xi32>
    %1050 = arith.cmpi eq, %1048, %1049 : vector<8x128xi32>
    %1051 = vector.extract_strided_slice %46 {offsets = [0, 4], sizes = [8, 1], strides = [1, 1]} : vector<8x8xi32> to vector<8x1xi32>
    %1052 = vector.broadcast %1051 : vector<8x1xi32> to vector<8x128xi32>
    %1053 = vector.broadcast %1033 : vector<1x128xi32> to vector<8x128xi32>
    %1054 = arith.cmpi eq, %1052, %1053 : vector<8x128xi32>
    %1055 = arith.andi %1050, %1054 : vector<8x128xi1>
    %cst_244 = arith.constant 1.000000e+00 : f32
    %1056 = vector.broadcast %cst_244 : f32 to vector<8x128xf32>
    %1057 = arith.addf %599, %1056 : vector<8x128xf32>
    %1058 = arith.minimumf %1046, %1057 : vector<8x128xf32>
    %1059 = arith.select %1055, %1058, %1046 : vector<8x128xi1>, vector<8x128xf32>
    %1060 = vector.extract_strided_slice %47 {offsets = [4, 0], sizes = [1, 128], strides = [1, 1]} : vector<8x128xi32> to vector<1x128xi32>
    %1061 = vector.broadcast %965 : vector<8x1xi32> to vector<8x128xi32>
    %1062 = vector.broadcast %1060 : vector<1x128xi32> to vector<8x128xi32>
    %1063 = arith.cmpi eq, %1061, %1062 : vector<8x128xi32>
    %cst_245 = arith.constant 0.000000e+00 : f32
    %cst_246 = arith.constant 1.000000e+00 : f32
    %1064 = vector.broadcast %cst_245 : f32 to vector<8x128xf32>
    %1065 = vector.broadcast %cst_246 : f32 to vector<8x128xf32>
    %1066 = arith.select %1063, %1064, %1065 : vector<8x128xi1>, vector<8x128xf32>
    %cst_247 = arith.constant 1.000000e+00 : f32
    %1067 = vector.broadcast %cst_247 : f32 to vector<8x128xf32>
    %1068 = arith.addf %883, %1067 : vector<8x128xf32>
    %cst_248 = arith.constant 1.000000e+00 : f32
    %1069 = vector.broadcast %cst_248 : f32 to vector<8x128xf32>
    %1070 = arith.addf %1059, %1069 : vector<8x128xf32>
    %1071 = arith.minimumf %1068, %1070 : vector<8x128xf32>
    %1072 = arith.addf %856, %1066 : vector<8x128xf32>
    %1073 = arith.minimumf %1071, %1072 : vector<8x128xf32>
    %1074 = vector.extract_strided_slice %47 {offsets = [3, 0], sizes = [1, 128], strides = [1, 1]} : vector<8x128xi32> to vector<1x128xi32>
    %1075 = vector.broadcast %965 : vector<8x1xi32> to vector<8x128xi32>
    %1076 = vector.broadcast %1074 : vector<1x128xi32> to vector<8x128xi32>
    %1077 = arith.cmpi eq, %1075, %1076 : vector<8x128xi32>
    %1078 = vector.extract_strided_slice %46 {offsets = [0, 4], sizes = [8, 1], strides = [1, 1]} : vector<8x8xi32> to vector<8x1xi32>
    %1079 = vector.broadcast %1078 : vector<8x1xi32> to vector<8x128xi32>
    %1080 = vector.broadcast %1060 : vector<1x128xi32> to vector<8x128xi32>
    %1081 = arith.cmpi eq, %1079, %1080 : vector<8x128xi32>
    %1082 = arith.andi %1077, %1081 : vector<8x128xi1>
    %cst_249 = arith.constant 1.000000e+00 : f32
    %1083 = vector.broadcast %cst_249 : f32 to vector<8x128xf32>
    %1084 = arith.addf %626, %1083 : vector<8x128xf32>
    %1085 = arith.minimumf %1073, %1084 : vector<8x128xf32>
    %1086 = arith.select %1082, %1085, %1073 : vector<8x128xi1>, vector<8x128xf32>
    %1087 = vector.extract_strided_slice %47 {offsets = [5, 0], sizes = [1, 128], strides = [1, 1]} : vector<8x128xi32> to vector<1x128xi32>
    %1088 = vector.broadcast %965 : vector<8x1xi32> to vector<8x128xi32>
    %1089 = vector.broadcast %1087 : vector<1x128xi32> to vector<8x128xi32>
    %1090 = arith.cmpi eq, %1088, %1089 : vector<8x128xi32>
    %cst_250 = arith.constant 0.000000e+00 : f32
    %cst_251 = arith.constant 1.000000e+00 : f32
    %1091 = vector.broadcast %cst_250 : f32 to vector<8x128xf32>
    %1092 = vector.broadcast %cst_251 : f32 to vector<8x128xf32>
    %1093 = arith.select %1090, %1091, %1092 : vector<8x128xi1>, vector<8x128xf32>
    %cst_252 = arith.constant 1.000000e+00 : f32
    %1094 = vector.broadcast %cst_252 : f32 to vector<8x128xf32>
    %1095 = arith.addf %910, %1094 : vector<8x128xf32>
    %cst_253 = arith.constant 1.000000e+00 : f32
    %1096 = vector.broadcast %cst_253 : f32 to vector<8x128xf32>
    %1097 = arith.addf %1086, %1096 : vector<8x128xf32>
    %1098 = arith.minimumf %1095, %1097 : vector<8x128xf32>
    %1099 = arith.addf %883, %1093 : vector<8x128xf32>
    %1100 = arith.minimumf %1098, %1099 : vector<8x128xf32>
    %1101 = vector.extract_strided_slice %47 {offsets = [4, 0], sizes = [1, 128], strides = [1, 1]} : vector<8x128xi32> to vector<1x128xi32>
    %1102 = vector.broadcast %965 : vector<8x1xi32> to vector<8x128xi32>
    %1103 = vector.broadcast %1101 : vector<1x128xi32> to vector<8x128xi32>
    %1104 = arith.cmpi eq, %1102, %1103 : vector<8x128xi32>
    %1105 = vector.extract_strided_slice %46 {offsets = [0, 4], sizes = [8, 1], strides = [1, 1]} : vector<8x8xi32> to vector<8x1xi32>
    %1106 = vector.broadcast %1105 : vector<8x1xi32> to vector<8x128xi32>
    %1107 = vector.broadcast %1087 : vector<1x128xi32> to vector<8x128xi32>
    %1108 = arith.cmpi eq, %1106, %1107 : vector<8x128xi32>
    %1109 = arith.andi %1104, %1108 : vector<8x128xi1>
    %cst_254 = arith.constant 1.000000e+00 : f32
    %1110 = vector.broadcast %cst_254 : f32 to vector<8x128xf32>
    %1111 = arith.addf %653, %1110 : vector<8x128xf32>
    %1112 = arith.minimumf %1100, %1111 : vector<8x128xf32>
    %1113 = arith.select %1109, %1112, %1100 : vector<8x128xi1>, vector<8x128xf32>
    %1114 = vector.extract_strided_slice %47 {offsets = [6, 0], sizes = [1, 128], strides = [1, 1]} : vector<8x128xi32> to vector<1x128xi32>
    %1115 = vector.broadcast %965 : vector<8x1xi32> to vector<8x128xi32>
    %1116 = vector.broadcast %1114 : vector<1x128xi32> to vector<8x128xi32>
    %1117 = arith.cmpi eq, %1115, %1116 : vector<8x128xi32>
    %cst_255 = arith.constant 0.000000e+00 : f32
    %cst_256 = arith.constant 1.000000e+00 : f32
    %1118 = vector.broadcast %cst_255 : f32 to vector<8x128xf32>
    %1119 = vector.broadcast %cst_256 : f32 to vector<8x128xf32>
    %1120 = arith.select %1117, %1118, %1119 : vector<8x128xi1>, vector<8x128xf32>
    %cst_257 = arith.constant 1.000000e+00 : f32
    %1121 = vector.broadcast %cst_257 : f32 to vector<8x128xf32>
    %1122 = arith.addf %937, %1121 : vector<8x128xf32>
    %cst_258 = arith.constant 1.000000e+00 : f32
    %1123 = vector.broadcast %cst_258 : f32 to vector<8x128xf32>
    %1124 = arith.addf %1113, %1123 : vector<8x128xf32>
    %1125 = arith.minimumf %1122, %1124 : vector<8x128xf32>
    %1126 = arith.addf %910, %1120 : vector<8x128xf32>
    %1127 = arith.minimumf %1125, %1126 : vector<8x128xf32>
    %1128 = vector.extract_strided_slice %47 {offsets = [5, 0], sizes = [1, 128], strides = [1, 1]} : vector<8x128xi32> to vector<1x128xi32>
    %1129 = vector.broadcast %965 : vector<8x1xi32> to vector<8x128xi32>
    %1130 = vector.broadcast %1128 : vector<1x128xi32> to vector<8x128xi32>
    %1131 = arith.cmpi eq, %1129, %1130 : vector<8x128xi32>
    %1132 = vector.extract_strided_slice %46 {offsets = [0, 4], sizes = [8, 1], strides = [1, 1]} : vector<8x8xi32> to vector<8x1xi32>
    %1133 = vector.broadcast %1132 : vector<8x1xi32> to vector<8x128xi32>
    %1134 = vector.broadcast %1114 : vector<1x128xi32> to vector<8x128xi32>
    %1135 = arith.cmpi eq, %1133, %1134 : vector<8x128xi32>
    %1136 = arith.andi %1131, %1135 : vector<8x128xi1>
    %cst_259 = arith.constant 1.000000e+00 : f32
    %1137 = vector.broadcast %cst_259 : f32 to vector<8x128xf32>
    %1138 = arith.addf %680, %1137 : vector<8x128xf32>
    %1139 = arith.minimumf %1127, %1138 : vector<8x128xf32>
    %1140 = arith.select %1136, %1139, %1127 : vector<8x128xi1>, vector<8x128xf32>
    %1141 = vector.extract_strided_slice %47 {offsets = [7, 0], sizes = [1, 128], strides = [1, 1]} : vector<8x128xi32> to vector<1x128xi32>
    %1142 = vector.broadcast %965 : vector<8x1xi32> to vector<8x128xi32>
    %1143 = vector.broadcast %1141 : vector<1x128xi32> to vector<8x128xi32>
    %1144 = arith.cmpi eq, %1142, %1143 : vector<8x128xi32>
    %cst_260 = arith.constant 0.000000e+00 : f32
    %cst_261 = arith.constant 1.000000e+00 : f32
    %1145 = vector.broadcast %cst_260 : f32 to vector<8x128xf32>
    %1146 = vector.broadcast %cst_261 : f32 to vector<8x128xf32>
    %1147 = arith.select %1144, %1145, %1146 : vector<8x128xi1>, vector<8x128xf32>
    %cst_262 = arith.constant 1.000000e+00 : f32
    %1148 = vector.broadcast %cst_262 : f32 to vector<8x128xf32>
    %1149 = arith.addf %964, %1148 : vector<8x128xf32>
    %cst_263 = arith.constant 1.000000e+00 : f32
    %1150 = vector.broadcast %cst_263 : f32 to vector<8x128xf32>
    %1151 = arith.addf %1140, %1150 : vector<8x128xf32>
    %1152 = arith.minimumf %1149, %1151 : vector<8x128xf32>
    %1153 = arith.addf %937, %1147 : vector<8x128xf32>
    %1154 = arith.minimumf %1152, %1153 : vector<8x128xf32>
    %1155 = vector.extract_strided_slice %47 {offsets = [6, 0], sizes = [1, 128], strides = [1, 1]} : vector<8x128xi32> to vector<1x128xi32>
    %1156 = vector.broadcast %965 : vector<8x1xi32> to vector<8x128xi32>
    %1157 = vector.broadcast %1155 : vector<1x128xi32> to vector<8x128xi32>
    %1158 = arith.cmpi eq, %1156, %1157 : vector<8x128xi32>
    %1159 = vector.extract_strided_slice %46 {offsets = [0, 4], sizes = [8, 1], strides = [1, 1]} : vector<8x8xi32> to vector<8x1xi32>
    %1160 = vector.broadcast %1159 : vector<8x1xi32> to vector<8x128xi32>
    %1161 = vector.broadcast %1141 : vector<1x128xi32> to vector<8x128xi32>
    %1162 = arith.cmpi eq, %1160, %1161 : vector<8x128xi32>
    %1163 = arith.andi %1158, %1162 : vector<8x128xi1>
    %cst_264 = arith.constant 1.000000e+00 : f32
    %1164 = vector.broadcast %cst_264 : f32 to vector<8x128xf32>
    %1165 = arith.addf %707, %1164 : vector<8x128xf32>
    %1166 = arith.minimumf %1154, %1165 : vector<8x128xf32>
    %1167 = arith.select %1163, %1166, %1154 : vector<8x128xi1>, vector<8x128xf32>
    %1168 = vector.extract_strided_slice %46 {offsets = [0, 6], sizes = [8, 1], strides = [1, 1]} : vector<8x8xi32> to vector<8x1xi32>
    %1169 = vector.extract_strided_slice %47 {offsets = [0, 0], sizes = [1, 128], strides = [1, 1]} : vector<8x128xi32> to vector<1x128xi32>
    %1170 = vector.broadcast %1168 : vector<8x1xi32> to vector<8x128xi32>
    %1171 = vector.broadcast %1169 : vector<1x128xi32> to vector<8x128xi32>
    %1172 = arith.cmpi eq, %1170, %1171 : vector<8x128xi32>
    %cst_265 = arith.constant 0.000000e+00 : f32
    %cst_266 = arith.constant 1.000000e+00 : f32
    %1173 = vector.broadcast %cst_265 : f32 to vector<8x128xf32>
    %1174 = vector.broadcast %cst_266 : f32 to vector<8x128xf32>
    %1175 = arith.select %1172, %1173, %1174 : vector<8x128xi1>, vector<8x128xf32>
    %cst_267 = arith.constant 1.000000e+00 : f32
    %1176 = vector.broadcast %cst_267 : f32 to vector<8x128xf32>
    %1177 = arith.addf %979, %1176 : vector<8x128xf32>
    %cst_268 = arith.constant 8.000000e+00 : f32
    %1178 = vector.broadcast %cst_268 : f32 to vector<8x128xf32>
    %1179 = arith.minimumf %1177, %1178 : vector<8x128xf32>
    %cst_269 = arith.constant 6.000000e+00 : f32
    %1180 = vector.broadcast %cst_269 : f32 to vector<8x128xf32>
    %1181 = arith.addf %1180, %1175 : vector<8x128xf32>
    %1182 = arith.minimumf %1179, %1181 : vector<8x128xf32>
    %1183 = vector.extract_strided_slice %47 {offsets = [1, 0], sizes = [1, 128], strides = [1, 1]} : vector<8x128xi32> to vector<1x128xi32>
    %1184 = vector.broadcast %1168 : vector<8x1xi32> to vector<8x128xi32>
    %1185 = vector.broadcast %1183 : vector<1x128xi32> to vector<8x128xi32>
    %1186 = arith.cmpi eq, %1184, %1185 : vector<8x128xi32>
    %cst_270 = arith.constant 0.000000e+00 : f32
    %cst_271 = arith.constant 1.000000e+00 : f32
    %1187 = vector.broadcast %cst_270 : f32 to vector<8x128xf32>
    %1188 = vector.broadcast %cst_271 : f32 to vector<8x128xf32>
    %1189 = arith.select %1186, %1187, %1188 : vector<8x128xi1>, vector<8x128xf32>
    %cst_272 = arith.constant 1.000000e+00 : f32
    %1190 = vector.broadcast %cst_272 : f32 to vector<8x128xf32>
    %1191 = arith.addf %1005, %1190 : vector<8x128xf32>
    %cst_273 = arith.constant 1.000000e+00 : f32
    %1192 = vector.broadcast %cst_273 : f32 to vector<8x128xf32>
    %1193 = arith.addf %1182, %1192 : vector<8x128xf32>
    %1194 = arith.minimumf %1191, %1193 : vector<8x128xf32>
    %1195 = arith.addf %979, %1189 : vector<8x128xf32>
    %1196 = arith.minimumf %1194, %1195 : vector<8x128xf32>
    %1197 = vector.extract_strided_slice %47 {offsets = [0, 0], sizes = [1, 128], strides = [1, 1]} : vector<8x128xi32> to vector<1x128xi32>
    %1198 = vector.broadcast %1168 : vector<8x1xi32> to vector<8x128xi32>
    %1199 = vector.broadcast %1197 : vector<1x128xi32> to vector<8x128xi32>
    %1200 = arith.cmpi eq, %1198, %1199 : vector<8x128xi32>
    %1201 = vector.extract_strided_slice %46 {offsets = [0, 5], sizes = [8, 1], strides = [1, 1]} : vector<8x8xi32> to vector<8x1xi32>
    %1202 = vector.broadcast %1201 : vector<8x1xi32> to vector<8x128xi32>
    %1203 = vector.broadcast %1183 : vector<1x128xi32> to vector<8x128xi32>
    %1204 = arith.cmpi eq, %1202, %1203 : vector<8x128xi32>
    %1205 = arith.andi %1200, %1204 : vector<8x128xi1>
    %cst_274 = arith.constant 6.000000e+00 : f32
    %1206 = vector.broadcast %cst_274 : f32 to vector<8x128xf32>
    %1207 = arith.minimumf %1196, %1206 : vector<8x128xf32>
    %1208 = arith.select %1205, %1207, %1196 : vector<8x128xi1>, vector<8x128xf32>
    %1209 = vector.extract_strided_slice %47 {offsets = [2, 0], sizes = [1, 128], strides = [1, 1]} : vector<8x128xi32> to vector<1x128xi32>
    %1210 = vector.broadcast %1168 : vector<8x1xi32> to vector<8x128xi32>
    %1211 = vector.broadcast %1209 : vector<1x128xi32> to vector<8x128xi32>
    %1212 = arith.cmpi eq, %1210, %1211 : vector<8x128xi32>
    %cst_275 = arith.constant 0.000000e+00 : f32
    %cst_276 = arith.constant 1.000000e+00 : f32
    %1213 = vector.broadcast %cst_275 : f32 to vector<8x128xf32>
    %1214 = vector.broadcast %cst_276 : f32 to vector<8x128xf32>
    %1215 = arith.select %1212, %1213, %1214 : vector<8x128xi1>, vector<8x128xf32>
    %cst_277 = arith.constant 1.000000e+00 : f32
    %1216 = vector.broadcast %cst_277 : f32 to vector<8x128xf32>
    %1217 = arith.addf %1032, %1216 : vector<8x128xf32>
    %cst_278 = arith.constant 1.000000e+00 : f32
    %1218 = vector.broadcast %cst_278 : f32 to vector<8x128xf32>
    %1219 = arith.addf %1208, %1218 : vector<8x128xf32>
    %1220 = arith.minimumf %1217, %1219 : vector<8x128xf32>
    %1221 = arith.addf %1005, %1215 : vector<8x128xf32>
    %1222 = arith.minimumf %1220, %1221 : vector<8x128xf32>
    %1223 = vector.extract_strided_slice %47 {offsets = [1, 0], sizes = [1, 128], strides = [1, 1]} : vector<8x128xi32> to vector<1x128xi32>
    %1224 = vector.broadcast %1168 : vector<8x1xi32> to vector<8x128xi32>
    %1225 = vector.broadcast %1223 : vector<1x128xi32> to vector<8x128xi32>
    %1226 = arith.cmpi eq, %1224, %1225 : vector<8x128xi32>
    %1227 = vector.extract_strided_slice %46 {offsets = [0, 5], sizes = [8, 1], strides = [1, 1]} : vector<8x8xi32> to vector<8x1xi32>
    %1228 = vector.broadcast %1227 : vector<8x1xi32> to vector<8x128xi32>
    %1229 = vector.broadcast %1209 : vector<1x128xi32> to vector<8x128xi32>
    %1230 = arith.cmpi eq, %1228, %1229 : vector<8x128xi32>
    %1231 = arith.andi %1226, %1230 : vector<8x128xi1>
    %cst_279 = arith.constant 1.000000e+00 : f32
    %1232 = vector.broadcast %cst_279 : f32 to vector<8x128xf32>
    %1233 = arith.addf %776, %1232 : vector<8x128xf32>
    %1234 = arith.minimumf %1222, %1233 : vector<8x128xf32>
    %1235 = arith.select %1231, %1234, %1222 : vector<8x128xi1>, vector<8x128xf32>
    %1236 = vector.extract_strided_slice %47 {offsets = [3, 0], sizes = [1, 128], strides = [1, 1]} : vector<8x128xi32> to vector<1x128xi32>
    %1237 = vector.broadcast %1168 : vector<8x1xi32> to vector<8x128xi32>
    %1238 = vector.broadcast %1236 : vector<1x128xi32> to vector<8x128xi32>
    %1239 = arith.cmpi eq, %1237, %1238 : vector<8x128xi32>
    %cst_280 = arith.constant 0.000000e+00 : f32
    %cst_281 = arith.constant 1.000000e+00 : f32
    %1240 = vector.broadcast %cst_280 : f32 to vector<8x128xf32>
    %1241 = vector.broadcast %cst_281 : f32 to vector<8x128xf32>
    %1242 = arith.select %1239, %1240, %1241 : vector<8x128xi1>, vector<8x128xf32>
    %cst_282 = arith.constant 1.000000e+00 : f32
    %1243 = vector.broadcast %cst_282 : f32 to vector<8x128xf32>
    %1244 = arith.addf %1059, %1243 : vector<8x128xf32>
    %cst_283 = arith.constant 1.000000e+00 : f32
    %1245 = vector.broadcast %cst_283 : f32 to vector<8x128xf32>
    %1246 = arith.addf %1235, %1245 : vector<8x128xf32>
    %1247 = arith.minimumf %1244, %1246 : vector<8x128xf32>
    %1248 = arith.addf %1032, %1242 : vector<8x128xf32>
    %1249 = arith.minimumf %1247, %1248 : vector<8x128xf32>
    %1250 = vector.extract_strided_slice %47 {offsets = [2, 0], sizes = [1, 128], strides = [1, 1]} : vector<8x128xi32> to vector<1x128xi32>
    %1251 = vector.broadcast %1168 : vector<8x1xi32> to vector<8x128xi32>
    %1252 = vector.broadcast %1250 : vector<1x128xi32> to vector<8x128xi32>
    %1253 = arith.cmpi eq, %1251, %1252 : vector<8x128xi32>
    %1254 = vector.extract_strided_slice %46 {offsets = [0, 5], sizes = [8, 1], strides = [1, 1]} : vector<8x8xi32> to vector<8x1xi32>
    %1255 = vector.broadcast %1254 : vector<8x1xi32> to vector<8x128xi32>
    %1256 = vector.broadcast %1236 : vector<1x128xi32> to vector<8x128xi32>
    %1257 = arith.cmpi eq, %1255, %1256 : vector<8x128xi32>
    %1258 = arith.andi %1253, %1257 : vector<8x128xi1>
    %cst_284 = arith.constant 1.000000e+00 : f32
    %1259 = vector.broadcast %cst_284 : f32 to vector<8x128xf32>
    %1260 = arith.addf %802, %1259 : vector<8x128xf32>
    %1261 = arith.minimumf %1249, %1260 : vector<8x128xf32>
    %1262 = arith.select %1258, %1261, %1249 : vector<8x128xi1>, vector<8x128xf32>
    %1263 = vector.extract_strided_slice %47 {offsets = [4, 0], sizes = [1, 128], strides = [1, 1]} : vector<8x128xi32> to vector<1x128xi32>
    %1264 = vector.broadcast %1168 : vector<8x1xi32> to vector<8x128xi32>
    %1265 = vector.broadcast %1263 : vector<1x128xi32> to vector<8x128xi32>
    %1266 = arith.cmpi eq, %1264, %1265 : vector<8x128xi32>
    %cst_285 = arith.constant 0.000000e+00 : f32
    %cst_286 = arith.constant 1.000000e+00 : f32
    %1267 = vector.broadcast %cst_285 : f32 to vector<8x128xf32>
    %1268 = vector.broadcast %cst_286 : f32 to vector<8x128xf32>
    %1269 = arith.select %1266, %1267, %1268 : vector<8x128xi1>, vector<8x128xf32>
    %cst_287 = arith.constant 1.000000e+00 : f32
    %1270 = vector.broadcast %cst_287 : f32 to vector<8x128xf32>
    %1271 = arith.addf %1086, %1270 : vector<8x128xf32>
    %cst_288 = arith.constant 1.000000e+00 : f32
    %1272 = vector.broadcast %cst_288 : f32 to vector<8x128xf32>
    %1273 = arith.addf %1262, %1272 : vector<8x128xf32>
    %1274 = arith.minimumf %1271, %1273 : vector<8x128xf32>
    %1275 = arith.addf %1059, %1269 : vector<8x128xf32>
    %1276 = arith.minimumf %1274, %1275 : vector<8x128xf32>
    %1277 = vector.extract_strided_slice %47 {offsets = [3, 0], sizes = [1, 128], strides = [1, 1]} : vector<8x128xi32> to vector<1x128xi32>
    %1278 = vector.broadcast %1168 : vector<8x1xi32> to vector<8x128xi32>
    %1279 = vector.broadcast %1277 : vector<1x128xi32> to vector<8x128xi32>
    %1280 = arith.cmpi eq, %1278, %1279 : vector<8x128xi32>
    %1281 = vector.extract_strided_slice %46 {offsets = [0, 5], sizes = [8, 1], strides = [1, 1]} : vector<8x8xi32> to vector<8x1xi32>
    %1282 = vector.broadcast %1281 : vector<8x1xi32> to vector<8x128xi32>
    %1283 = vector.broadcast %1263 : vector<1x128xi32> to vector<8x128xi32>
    %1284 = arith.cmpi eq, %1282, %1283 : vector<8x128xi32>
    %1285 = arith.andi %1280, %1284 : vector<8x128xi1>
    %cst_289 = arith.constant 1.000000e+00 : f32
    %1286 = vector.broadcast %cst_289 : f32 to vector<8x128xf32>
    %1287 = arith.addf %829, %1286 : vector<8x128xf32>
    %1288 = arith.minimumf %1276, %1287 : vector<8x128xf32>
    %1289 = arith.select %1285, %1288, %1276 : vector<8x128xi1>, vector<8x128xf32>
    %1290 = vector.extract_strided_slice %47 {offsets = [5, 0], sizes = [1, 128], strides = [1, 1]} : vector<8x128xi32> to vector<1x128xi32>
    %1291 = vector.broadcast %1168 : vector<8x1xi32> to vector<8x128xi32>
    %1292 = vector.broadcast %1290 : vector<1x128xi32> to vector<8x128xi32>
    %1293 = arith.cmpi eq, %1291, %1292 : vector<8x128xi32>
    %cst_290 = arith.constant 0.000000e+00 : f32
    %cst_291 = arith.constant 1.000000e+00 : f32
    %1294 = vector.broadcast %cst_290 : f32 to vector<8x128xf32>
    %1295 = vector.broadcast %cst_291 : f32 to vector<8x128xf32>
    %1296 = arith.select %1293, %1294, %1295 : vector<8x128xi1>, vector<8x128xf32>
    %cst_292 = arith.constant 1.000000e+00 : f32
    %1297 = vector.broadcast %cst_292 : f32 to vector<8x128xf32>
    %1298 = arith.addf %1113, %1297 : vector<8x128xf32>
    %cst_293 = arith.constant 1.000000e+00 : f32
    %1299 = vector.broadcast %cst_293 : f32 to vector<8x128xf32>
    %1300 = arith.addf %1289, %1299 : vector<8x128xf32>
    %1301 = arith.minimumf %1298, %1300 : vector<8x128xf32>
    %1302 = arith.addf %1086, %1296 : vector<8x128xf32>
    %1303 = arith.minimumf %1301, %1302 : vector<8x128xf32>
    %1304 = vector.extract_strided_slice %47 {offsets = [4, 0], sizes = [1, 128], strides = [1, 1]} : vector<8x128xi32> to vector<1x128xi32>
    %1305 = vector.broadcast %1168 : vector<8x1xi32> to vector<8x128xi32>
    %1306 = vector.broadcast %1304 : vector<1x128xi32> to vector<8x128xi32>
    %1307 = arith.cmpi eq, %1305, %1306 : vector<8x128xi32>
    %1308 = vector.extract_strided_slice %46 {offsets = [0, 5], sizes = [8, 1], strides = [1, 1]} : vector<8x8xi32> to vector<8x1xi32>
    %1309 = vector.broadcast %1308 : vector<8x1xi32> to vector<8x128xi32>
    %1310 = vector.broadcast %1290 : vector<1x128xi32> to vector<8x128xi32>
    %1311 = arith.cmpi eq, %1309, %1310 : vector<8x128xi32>
    %1312 = arith.andi %1307, %1311 : vector<8x128xi1>
    %cst_294 = arith.constant 1.000000e+00 : f32
    %1313 = vector.broadcast %cst_294 : f32 to vector<8x128xf32>
    %1314 = arith.addf %856, %1313 : vector<8x128xf32>
    %1315 = arith.minimumf %1303, %1314 : vector<8x128xf32>
    %1316 = arith.select %1312, %1315, %1303 : vector<8x128xi1>, vector<8x128xf32>
    %1317 = vector.extract_strided_slice %47 {offsets = [6, 0], sizes = [1, 128], strides = [1, 1]} : vector<8x128xi32> to vector<1x128xi32>
    %1318 = vector.broadcast %1168 : vector<8x1xi32> to vector<8x128xi32>
    %1319 = vector.broadcast %1317 : vector<1x128xi32> to vector<8x128xi32>
    %1320 = arith.cmpi eq, %1318, %1319 : vector<8x128xi32>
    %cst_295 = arith.constant 0.000000e+00 : f32
    %cst_296 = arith.constant 1.000000e+00 : f32
    %1321 = vector.broadcast %cst_295 : f32 to vector<8x128xf32>
    %1322 = vector.broadcast %cst_296 : f32 to vector<8x128xf32>
    %1323 = arith.select %1320, %1321, %1322 : vector<8x128xi1>, vector<8x128xf32>
    %cst_297 = arith.constant 1.000000e+00 : f32
    %1324 = vector.broadcast %cst_297 : f32 to vector<8x128xf32>
    %1325 = arith.addf %1140, %1324 : vector<8x128xf32>
    %cst_298 = arith.constant 1.000000e+00 : f32
    %1326 = vector.broadcast %cst_298 : f32 to vector<8x128xf32>
    %1327 = arith.addf %1316, %1326 : vector<8x128xf32>
    %1328 = arith.minimumf %1325, %1327 : vector<8x128xf32>
    %1329 = arith.addf %1113, %1323 : vector<8x128xf32>
    %1330 = arith.minimumf %1328, %1329 : vector<8x128xf32>
    %1331 = vector.extract_strided_slice %47 {offsets = [5, 0], sizes = [1, 128], strides = [1, 1]} : vector<8x128xi32> to vector<1x128xi32>
    %1332 = vector.broadcast %1168 : vector<8x1xi32> to vector<8x128xi32>
    %1333 = vector.broadcast %1331 : vector<1x128xi32> to vector<8x128xi32>
    %1334 = arith.cmpi eq, %1332, %1333 : vector<8x128xi32>
    %1335 = vector.extract_strided_slice %46 {offsets = [0, 5], sizes = [8, 1], strides = [1, 1]} : vector<8x8xi32> to vector<8x1xi32>
    %1336 = vector.broadcast %1335 : vector<8x1xi32> to vector<8x128xi32>
    %1337 = vector.broadcast %1317 : vector<1x128xi32> to vector<8x128xi32>
    %1338 = arith.cmpi eq, %1336, %1337 : vector<8x128xi32>
    %1339 = arith.andi %1334, %1338 : vector<8x128xi1>
    %cst_299 = arith.constant 1.000000e+00 : f32
    %1340 = vector.broadcast %cst_299 : f32 to vector<8x128xf32>
    %1341 = arith.addf %883, %1340 : vector<8x128xf32>
    %1342 = arith.minimumf %1330, %1341 : vector<8x128xf32>
    %1343 = arith.select %1339, %1342, %1330 : vector<8x128xi1>, vector<8x128xf32>
    %1344 = vector.extract_strided_slice %47 {offsets = [7, 0], sizes = [1, 128], strides = [1, 1]} : vector<8x128xi32> to vector<1x128xi32>
    %1345 = vector.broadcast %1168 : vector<8x1xi32> to vector<8x128xi32>
    %1346 = vector.broadcast %1344 : vector<1x128xi32> to vector<8x128xi32>
    %1347 = arith.cmpi eq, %1345, %1346 : vector<8x128xi32>
    %cst_300 = arith.constant 0.000000e+00 : f32
    %cst_301 = arith.constant 1.000000e+00 : f32
    %1348 = vector.broadcast %cst_300 : f32 to vector<8x128xf32>
    %1349 = vector.broadcast %cst_301 : f32 to vector<8x128xf32>
    %1350 = arith.select %1347, %1348, %1349 : vector<8x128xi1>, vector<8x128xf32>
    %cst_302 = arith.constant 1.000000e+00 : f32
    %1351 = vector.broadcast %cst_302 : f32 to vector<8x128xf32>
    %1352 = arith.addf %1167, %1351 : vector<8x128xf32>
    %cst_303 = arith.constant 1.000000e+00 : f32
    %1353 = vector.broadcast %cst_303 : f32 to vector<8x128xf32>
    %1354 = arith.addf %1343, %1353 : vector<8x128xf32>
    %1355 = arith.minimumf %1352, %1354 : vector<8x128xf32>
    %1356 = arith.addf %1140, %1350 : vector<8x128xf32>
    %1357 = arith.minimumf %1355, %1356 : vector<8x128xf32>
    %1358 = vector.extract_strided_slice %47 {offsets = [6, 0], sizes = [1, 128], strides = [1, 1]} : vector<8x128xi32> to vector<1x128xi32>
    %1359 = vector.broadcast %1168 : vector<8x1xi32> to vector<8x128xi32>
    %1360 = vector.broadcast %1358 : vector<1x128xi32> to vector<8x128xi32>
    %1361 = arith.cmpi eq, %1359, %1360 : vector<8x128xi32>
    %1362 = vector.extract_strided_slice %46 {offsets = [0, 5], sizes = [8, 1], strides = [1, 1]} : vector<8x8xi32> to vector<8x1xi32>
    %1363 = vector.broadcast %1362 : vector<8x1xi32> to vector<8x128xi32>
    %1364 = vector.broadcast %1344 : vector<1x128xi32> to vector<8x128xi32>
    %1365 = arith.cmpi eq, %1363, %1364 : vector<8x128xi32>
    %1366 = arith.andi %1361, %1365 : vector<8x128xi1>
    %cst_304 = arith.constant 1.000000e+00 : f32
    %1367 = vector.broadcast %cst_304 : f32 to vector<8x128xf32>
    %1368 = arith.addf %910, %1367 : vector<8x128xf32>
    %1369 = arith.minimumf %1357, %1368 : vector<8x128xf32>
    %1370 = arith.select %1366, %1369, %1357 : vector<8x128xi1>, vector<8x128xf32>
    %1371 = vector.extract_strided_slice %46 {offsets = [0, 7], sizes = [8, 1], strides = [1, 1]} : vector<8x8xi32> to vector<8x1xi32>
    %1372 = vector.extract_strided_slice %47 {offsets = [0, 0], sizes = [1, 128], strides = [1, 1]} : vector<8x128xi32> to vector<1x128xi32>
    %1373 = vector.broadcast %1371 : vector<8x1xi32> to vector<8x128xi32>
    %1374 = vector.broadcast %1372 : vector<1x128xi32> to vector<8x128xi32>
    %1375 = arith.cmpi eq, %1373, %1374 : vector<8x128xi32>
    %cst_305 = arith.constant 0.000000e+00 : f32
    %cst_306 = arith.constant 1.000000e+00 : f32
    %1376 = vector.broadcast %cst_305 : f32 to vector<8x128xf32>
    %1377 = vector.broadcast %cst_306 : f32 to vector<8x128xf32>
    %1378 = arith.select %1375, %1376, %1377 : vector<8x128xi1>, vector<8x128xf32>
    %cst_307 = arith.constant 1.000000e+00 : f32
    %1379 = vector.broadcast %cst_307 : f32 to vector<8x128xf32>
    %1380 = arith.addf %1182, %1379 : vector<8x128xf32>
    %cst_308 = arith.constant 9.000000e+00 : f32
    %1381 = vector.broadcast %cst_308 : f32 to vector<8x128xf32>
    %1382 = arith.minimumf %1380, %1381 : vector<8x128xf32>
    %cst_309 = arith.constant 7.000000e+00 : f32
    %1383 = vector.broadcast %cst_309 : f32 to vector<8x128xf32>
    %1384 = arith.addf %1383, %1378 : vector<8x128xf32>
    %1385 = arith.minimumf %1382, %1384 : vector<8x128xf32>
    %1386 = vector.extract_strided_slice %47 {offsets = [1, 0], sizes = [1, 128], strides = [1, 1]} : vector<8x128xi32> to vector<1x128xi32>
    %1387 = vector.broadcast %1371 : vector<8x1xi32> to vector<8x128xi32>
    %1388 = vector.broadcast %1386 : vector<1x128xi32> to vector<8x128xi32>
    %1389 = arith.cmpi eq, %1387, %1388 : vector<8x128xi32>
    %cst_310 = arith.constant 0.000000e+00 : f32
    %cst_311 = arith.constant 1.000000e+00 : f32
    %1390 = vector.broadcast %cst_310 : f32 to vector<8x128xf32>
    %1391 = vector.broadcast %cst_311 : f32 to vector<8x128xf32>
    %1392 = arith.select %1389, %1390, %1391 : vector<8x128xi1>, vector<8x128xf32>
    %cst_312 = arith.constant 1.000000e+00 : f32
    %1393 = vector.broadcast %cst_312 : f32 to vector<8x128xf32>
    %1394 = arith.addf %1208, %1393 : vector<8x128xf32>
    %cst_313 = arith.constant 1.000000e+00 : f32
    %1395 = vector.broadcast %cst_313 : f32 to vector<8x128xf32>
    %1396 = arith.addf %1385, %1395 : vector<8x128xf32>
    %1397 = arith.minimumf %1394, %1396 : vector<8x128xf32>
    %1398 = arith.addf %1182, %1392 : vector<8x128xf32>
    %1399 = arith.minimumf %1397, %1398 : vector<8x128xf32>
    %1400 = vector.extract_strided_slice %47 {offsets = [0, 0], sizes = [1, 128], strides = [1, 1]} : vector<8x128xi32> to vector<1x128xi32>
    %1401 = vector.broadcast %1371 : vector<8x1xi32> to vector<8x128xi32>
    %1402 = vector.broadcast %1400 : vector<1x128xi32> to vector<8x128xi32>
    %1403 = arith.cmpi eq, %1401, %1402 : vector<8x128xi32>
    %1404 = vector.extract_strided_slice %46 {offsets = [0, 6], sizes = [8, 1], strides = [1, 1]} : vector<8x8xi32> to vector<8x1xi32>
    %1405 = vector.broadcast %1404 : vector<8x1xi32> to vector<8x128xi32>
    %1406 = vector.broadcast %1386 : vector<1x128xi32> to vector<8x128xi32>
    %1407 = arith.cmpi eq, %1405, %1406 : vector<8x128xi32>
    %1408 = arith.andi %1403, %1407 : vector<8x128xi1>
    %cst_314 = arith.constant 7.000000e+00 : f32
    %1409 = vector.broadcast %cst_314 : f32 to vector<8x128xf32>
    %1410 = arith.minimumf %1399, %1409 : vector<8x128xf32>
    %1411 = arith.select %1408, %1410, %1399 : vector<8x128xi1>, vector<8x128xf32>
    %1412 = vector.extract_strided_slice %47 {offsets = [2, 0], sizes = [1, 128], strides = [1, 1]} : vector<8x128xi32> to vector<1x128xi32>
    %1413 = vector.broadcast %1371 : vector<8x1xi32> to vector<8x128xi32>
    %1414 = vector.broadcast %1412 : vector<1x128xi32> to vector<8x128xi32>
    %1415 = arith.cmpi eq, %1413, %1414 : vector<8x128xi32>
    %cst_315 = arith.constant 0.000000e+00 : f32
    %cst_316 = arith.constant 1.000000e+00 : f32
    %1416 = vector.broadcast %cst_315 : f32 to vector<8x128xf32>
    %1417 = vector.broadcast %cst_316 : f32 to vector<8x128xf32>
    %1418 = arith.select %1415, %1416, %1417 : vector<8x128xi1>, vector<8x128xf32>
    %cst_317 = arith.constant 1.000000e+00 : f32
    %1419 = vector.broadcast %cst_317 : f32 to vector<8x128xf32>
    %1420 = arith.addf %1235, %1419 : vector<8x128xf32>
    %cst_318 = arith.constant 1.000000e+00 : f32
    %1421 = vector.broadcast %cst_318 : f32 to vector<8x128xf32>
    %1422 = arith.addf %1411, %1421 : vector<8x128xf32>
    %1423 = arith.minimumf %1420, %1422 : vector<8x128xf32>
    %1424 = arith.addf %1208, %1418 : vector<8x128xf32>
    %1425 = arith.minimumf %1423, %1424 : vector<8x128xf32>
    %1426 = vector.extract_strided_slice %47 {offsets = [1, 0], sizes = [1, 128], strides = [1, 1]} : vector<8x128xi32> to vector<1x128xi32>
    %1427 = vector.broadcast %1371 : vector<8x1xi32> to vector<8x128xi32>
    %1428 = vector.broadcast %1426 : vector<1x128xi32> to vector<8x128xi32>
    %1429 = arith.cmpi eq, %1427, %1428 : vector<8x128xi32>
    %1430 = vector.extract_strided_slice %46 {offsets = [0, 6], sizes = [8, 1], strides = [1, 1]} : vector<8x8xi32> to vector<8x1xi32>
    %1431 = vector.broadcast %1430 : vector<8x1xi32> to vector<8x128xi32>
    %1432 = vector.broadcast %1412 : vector<1x128xi32> to vector<8x128xi32>
    %1433 = arith.cmpi eq, %1431, %1432 : vector<8x128xi32>
    %1434 = arith.andi %1429, %1433 : vector<8x128xi1>
    %cst_319 = arith.constant 1.000000e+00 : f32
    %1435 = vector.broadcast %cst_319 : f32 to vector<8x128xf32>
    %1436 = arith.addf %979, %1435 : vector<8x128xf32>
    %1437 = arith.minimumf %1425, %1436 : vector<8x128xf32>
    %1438 = arith.select %1434, %1437, %1425 : vector<8x128xi1>, vector<8x128xf32>
    %1439 = vector.extract_strided_slice %47 {offsets = [3, 0], sizes = [1, 128], strides = [1, 1]} : vector<8x128xi32> to vector<1x128xi32>
    %1440 = vector.broadcast %1371 : vector<8x1xi32> to vector<8x128xi32>
    %1441 = vector.broadcast %1439 : vector<1x128xi32> to vector<8x128xi32>
    %1442 = arith.cmpi eq, %1440, %1441 : vector<8x128xi32>
    %cst_320 = arith.constant 0.000000e+00 : f32
    %cst_321 = arith.constant 1.000000e+00 : f32
    %1443 = vector.broadcast %cst_320 : f32 to vector<8x128xf32>
    %1444 = vector.broadcast %cst_321 : f32 to vector<8x128xf32>
    %1445 = arith.select %1442, %1443, %1444 : vector<8x128xi1>, vector<8x128xf32>
    %cst_322 = arith.constant 1.000000e+00 : f32
    %1446 = vector.broadcast %cst_322 : f32 to vector<8x128xf32>
    %1447 = arith.addf %1262, %1446 : vector<8x128xf32>
    %cst_323 = arith.constant 1.000000e+00 : f32
    %1448 = vector.broadcast %cst_323 : f32 to vector<8x128xf32>
    %1449 = arith.addf %1438, %1448 : vector<8x128xf32>
    %1450 = arith.minimumf %1447, %1449 : vector<8x128xf32>
    %1451 = arith.addf %1235, %1445 : vector<8x128xf32>
    %1452 = arith.minimumf %1450, %1451 : vector<8x128xf32>
    %1453 = vector.extract_strided_slice %47 {offsets = [2, 0], sizes = [1, 128], strides = [1, 1]} : vector<8x128xi32> to vector<1x128xi32>
    %1454 = vector.broadcast %1371 : vector<8x1xi32> to vector<8x128xi32>
    %1455 = vector.broadcast %1453 : vector<1x128xi32> to vector<8x128xi32>
    %1456 = arith.cmpi eq, %1454, %1455 : vector<8x128xi32>
    %1457 = vector.extract_strided_slice %46 {offsets = [0, 6], sizes = [8, 1], strides = [1, 1]} : vector<8x8xi32> to vector<8x1xi32>
    %1458 = vector.broadcast %1457 : vector<8x1xi32> to vector<8x128xi32>
    %1459 = vector.broadcast %1439 : vector<1x128xi32> to vector<8x128xi32>
    %1460 = arith.cmpi eq, %1458, %1459 : vector<8x128xi32>
    %1461 = arith.andi %1456, %1460 : vector<8x128xi1>
    %cst_324 = arith.constant 1.000000e+00 : f32
    %1462 = vector.broadcast %cst_324 : f32 to vector<8x128xf32>
    %1463 = arith.addf %1005, %1462 : vector<8x128xf32>
    %1464 = arith.minimumf %1452, %1463 : vector<8x128xf32>
    %1465 = arith.select %1461, %1464, %1452 : vector<8x128xi1>, vector<8x128xf32>
    %1466 = vector.extract_strided_slice %47 {offsets = [4, 0], sizes = [1, 128], strides = [1, 1]} : vector<8x128xi32> to vector<1x128xi32>
    %1467 = vector.broadcast %1371 : vector<8x1xi32> to vector<8x128xi32>
    %1468 = vector.broadcast %1466 : vector<1x128xi32> to vector<8x128xi32>
    %1469 = arith.cmpi eq, %1467, %1468 : vector<8x128xi32>
    %cst_325 = arith.constant 0.000000e+00 : f32
    %cst_326 = arith.constant 1.000000e+00 : f32
    %1470 = vector.broadcast %cst_325 : f32 to vector<8x128xf32>
    %1471 = vector.broadcast %cst_326 : f32 to vector<8x128xf32>
    %1472 = arith.select %1469, %1470, %1471 : vector<8x128xi1>, vector<8x128xf32>
    %cst_327 = arith.constant 1.000000e+00 : f32
    %1473 = vector.broadcast %cst_327 : f32 to vector<8x128xf32>
    %1474 = arith.addf %1289, %1473 : vector<8x128xf32>
    %cst_328 = arith.constant 1.000000e+00 : f32
    %1475 = vector.broadcast %cst_328 : f32 to vector<8x128xf32>
    %1476 = arith.addf %1465, %1475 : vector<8x128xf32>
    %1477 = arith.minimumf %1474, %1476 : vector<8x128xf32>
    %1478 = arith.addf %1262, %1472 : vector<8x128xf32>
    %1479 = arith.minimumf %1477, %1478 : vector<8x128xf32>
    %1480 = vector.extract_strided_slice %47 {offsets = [3, 0], sizes = [1, 128], strides = [1, 1]} : vector<8x128xi32> to vector<1x128xi32>
    %1481 = vector.broadcast %1371 : vector<8x1xi32> to vector<8x128xi32>
    %1482 = vector.broadcast %1480 : vector<1x128xi32> to vector<8x128xi32>
    %1483 = arith.cmpi eq, %1481, %1482 : vector<8x128xi32>
    %1484 = vector.extract_strided_slice %46 {offsets = [0, 6], sizes = [8, 1], strides = [1, 1]} : vector<8x8xi32> to vector<8x1xi32>
    %1485 = vector.broadcast %1484 : vector<8x1xi32> to vector<8x128xi32>
    %1486 = vector.broadcast %1466 : vector<1x128xi32> to vector<8x128xi32>
    %1487 = arith.cmpi eq, %1485, %1486 : vector<8x128xi32>
    %1488 = arith.andi %1483, %1487 : vector<8x128xi1>
    %cst_329 = arith.constant 1.000000e+00 : f32
    %1489 = vector.broadcast %cst_329 : f32 to vector<8x128xf32>
    %1490 = arith.addf %1032, %1489 : vector<8x128xf32>
    %1491 = arith.minimumf %1479, %1490 : vector<8x128xf32>
    %1492 = arith.select %1488, %1491, %1479 : vector<8x128xi1>, vector<8x128xf32>
    %1493 = vector.extract_strided_slice %47 {offsets = [5, 0], sizes = [1, 128], strides = [1, 1]} : vector<8x128xi32> to vector<1x128xi32>
    %1494 = vector.broadcast %1371 : vector<8x1xi32> to vector<8x128xi32>
    %1495 = vector.broadcast %1493 : vector<1x128xi32> to vector<8x128xi32>
    %1496 = arith.cmpi eq, %1494, %1495 : vector<8x128xi32>
    %cst_330 = arith.constant 0.000000e+00 : f32
    %cst_331 = arith.constant 1.000000e+00 : f32
    %1497 = vector.broadcast %cst_330 : f32 to vector<8x128xf32>
    %1498 = vector.broadcast %cst_331 : f32 to vector<8x128xf32>
    %1499 = arith.select %1496, %1497, %1498 : vector<8x128xi1>, vector<8x128xf32>
    %cst_332 = arith.constant 1.000000e+00 : f32
    %1500 = vector.broadcast %cst_332 : f32 to vector<8x128xf32>
    %1501 = arith.addf %1316, %1500 : vector<8x128xf32>
    %cst_333 = arith.constant 1.000000e+00 : f32
    %1502 = vector.broadcast %cst_333 : f32 to vector<8x128xf32>
    %1503 = arith.addf %1492, %1502 : vector<8x128xf32>
    %1504 = arith.minimumf %1501, %1503 : vector<8x128xf32>
    %1505 = arith.addf %1289, %1499 : vector<8x128xf32>
    %1506 = arith.minimumf %1504, %1505 : vector<8x128xf32>
    %1507 = vector.extract_strided_slice %47 {offsets = [4, 0], sizes = [1, 128], strides = [1, 1]} : vector<8x128xi32> to vector<1x128xi32>
    %1508 = vector.broadcast %1371 : vector<8x1xi32> to vector<8x128xi32>
    %1509 = vector.broadcast %1507 : vector<1x128xi32> to vector<8x128xi32>
    %1510 = arith.cmpi eq, %1508, %1509 : vector<8x128xi32>
    %1511 = vector.extract_strided_slice %46 {offsets = [0, 6], sizes = [8, 1], strides = [1, 1]} : vector<8x8xi32> to vector<8x1xi32>
    %1512 = vector.broadcast %1511 : vector<8x1xi32> to vector<8x128xi32>
    %1513 = vector.broadcast %1493 : vector<1x128xi32> to vector<8x128xi32>
    %1514 = arith.cmpi eq, %1512, %1513 : vector<8x128xi32>
    %1515 = arith.andi %1510, %1514 : vector<8x128xi1>
    %cst_334 = arith.constant 1.000000e+00 : f32
    %1516 = vector.broadcast %cst_334 : f32 to vector<8x128xf32>
    %1517 = arith.addf %1059, %1516 : vector<8x128xf32>
    %1518 = arith.minimumf %1506, %1517 : vector<8x128xf32>
    %1519 = arith.select %1515, %1518, %1506 : vector<8x128xi1>, vector<8x128xf32>
    %1520 = vector.extract_strided_slice %47 {offsets = [6, 0], sizes = [1, 128], strides = [1, 1]} : vector<8x128xi32> to vector<1x128xi32>
    %1521 = vector.broadcast %1371 : vector<8x1xi32> to vector<8x128xi32>
    %1522 = vector.broadcast %1520 : vector<1x128xi32> to vector<8x128xi32>
    %1523 = arith.cmpi eq, %1521, %1522 : vector<8x128xi32>
    %cst_335 = arith.constant 0.000000e+00 : f32
    %cst_336 = arith.constant 1.000000e+00 : f32
    %1524 = vector.broadcast %cst_335 : f32 to vector<8x128xf32>
    %1525 = vector.broadcast %cst_336 : f32 to vector<8x128xf32>
    %1526 = arith.select %1523, %1524, %1525 : vector<8x128xi1>, vector<8x128xf32>
    %cst_337 = arith.constant 1.000000e+00 : f32
    %1527 = vector.broadcast %cst_337 : f32 to vector<8x128xf32>
    %1528 = arith.addf %1343, %1527 : vector<8x128xf32>
    %cst_338 = arith.constant 1.000000e+00 : f32
    %1529 = vector.broadcast %cst_338 : f32 to vector<8x128xf32>
    %1530 = arith.addf %1519, %1529 : vector<8x128xf32>
    %1531 = arith.minimumf %1528, %1530 : vector<8x128xf32>
    %1532 = arith.addf %1316, %1526 : vector<8x128xf32>
    %1533 = arith.minimumf %1531, %1532 : vector<8x128xf32>
    %1534 = vector.extract_strided_slice %47 {offsets = [5, 0], sizes = [1, 128], strides = [1, 1]} : vector<8x128xi32> to vector<1x128xi32>
    %1535 = vector.broadcast %1371 : vector<8x1xi32> to vector<8x128xi32>
    %1536 = vector.broadcast %1534 : vector<1x128xi32> to vector<8x128xi32>
    %1537 = arith.cmpi eq, %1535, %1536 : vector<8x128xi32>
    %1538 = vector.extract_strided_slice %46 {offsets = [0, 6], sizes = [8, 1], strides = [1, 1]} : vector<8x8xi32> to vector<8x1xi32>
    %1539 = vector.broadcast %1538 : vector<8x1xi32> to vector<8x128xi32>
    %1540 = vector.broadcast %1520 : vector<1x128xi32> to vector<8x128xi32>
    %1541 = arith.cmpi eq, %1539, %1540 : vector<8x128xi32>
    %1542 = arith.andi %1537, %1541 : vector<8x128xi1>
    %cst_339 = arith.constant 1.000000e+00 : f32
    %1543 = vector.broadcast %cst_339 : f32 to vector<8x128xf32>
    %1544 = arith.addf %1086, %1543 : vector<8x128xf32>
    %1545 = arith.minimumf %1533, %1544 : vector<8x128xf32>
    %1546 = arith.select %1542, %1545, %1533 : vector<8x128xi1>, vector<8x128xf32>
    %1547 = vector.extract_strided_slice %47 {offsets = [7, 0], sizes = [1, 128], strides = [1, 1]} : vector<8x128xi32> to vector<1x128xi32>
    %1548 = vector.broadcast %1371 : vector<8x1xi32> to vector<8x128xi32>
    %1549 = vector.broadcast %1547 : vector<1x128xi32> to vector<8x128xi32>
    %1550 = arith.cmpi eq, %1548, %1549 : vector<8x128xi32>
    %cst_340 = arith.constant 0.000000e+00 : f32
    %cst_341 = arith.constant 1.000000e+00 : f32
    %1551 = vector.broadcast %cst_340 : f32 to vector<8x128xf32>
    %1552 = vector.broadcast %cst_341 : f32 to vector<8x128xf32>
    %1553 = arith.select %1550, %1551, %1552 : vector<8x128xi1>, vector<8x128xf32>
    %cst_342 = arith.constant 1.000000e+00 : f32
    %1554 = vector.broadcast %cst_342 : f32 to vector<8x128xf32>
    %1555 = arith.addf %1370, %1554 : vector<8x128xf32>
    %cst_343 = arith.constant 1.000000e+00 : f32
    %1556 = vector.broadcast %cst_343 : f32 to vector<8x128xf32>
    %1557 = arith.addf %1546, %1556 : vector<8x128xf32>
    %1558 = arith.minimumf %1555, %1557 : vector<8x128xf32>
    %1559 = arith.addf %1343, %1553 : vector<8x128xf32>
    %1560 = arith.minimumf %1558, %1559 : vector<8x128xf32>
    %1561 = vector.extract_strided_slice %47 {offsets = [6, 0], sizes = [1, 128], strides = [1, 1]} : vector<8x128xi32> to vector<1x128xi32>
    %1562 = vector.broadcast %1371 : vector<8x1xi32> to vector<8x128xi32>
    %1563 = vector.broadcast %1561 : vector<1x128xi32> to vector<8x128xi32>
    %1564 = arith.cmpi eq, %1562, %1563 : vector<8x128xi32>
    %1565 = vector.extract_strided_slice %46 {offsets = [0, 6], sizes = [8, 1], strides = [1, 1]} : vector<8x8xi32> to vector<8x1xi32>
    %1566 = vector.broadcast %1565 : vector<8x1xi32> to vector<8x128xi32>
    %1567 = vector.broadcast %1547 : vector<1x128xi32> to vector<8x128xi32>
    %1568 = arith.cmpi eq, %1566, %1567 : vector<8x128xi32>
    %1569 = arith.andi %1564, %1568 : vector<8x128xi1>
    %cst_344 = arith.constant 1.000000e+00 : f32
    %1570 = vector.broadcast %cst_344 : f32 to vector<8x128xf32>
    %1571 = arith.addf %1113, %1570 : vector<8x128xf32>
    %1572 = arith.minimumf %1560, %1571 : vector<8x128xf32>
    %1573 = arith.select %1569, %1572, %1560 : vector<8x128xi1>, vector<8x128xf32>
    %cst_345 = arith.constant 1.000000e+00 : f32
    %1574 = vector.broadcast %cst_345 : f32 to vector<8x128xf32>
    %1575 = arith.subf %1573, %1574 : vector<8x128xf32>
    %cst_346 = arith.constant 0.000000e+00 : f32
    %1576 = vector.broadcast %cst_346 : f32 to vector<8x128xf32>
    %1577 = arith.maximumf %1575, %1576 : vector<8x128xf32>
    %c0_347 = arith.constant 0 : index
    %c0_348 = arith.constant 0 : index
    %1578 = vector.load %arg11[%c0_347, %c0_348] : memref<1x1xf32, #tpu.memory_space<vmem>>, vector<1x1xf32>
    %1579 = arith.mulf %1577, %3 : vector<8x128xf32>
    %cst_349 = arith.constant 0.000000e+00 : f32
    %1580 = vector.broadcast %cst_349 : f32 to vector<8x128xf32>
    %1581 = arith.select %17, %1579, %1580 : vector<8x128xi1>, vector<8x128xf32>
    %1582 = vector.shape_cast %1581 : vector<8x128xf32> to vector<1x8x128xf32>
    %cst_350 = arith.constant dense<0.000000e+00> : vector<1xf32>
    %1583 = vector.multi_reduction <add>, %1582, %cst_350 [1, 2] : vector<1x8x128xf32> to vector<1xf32>
    %1584 = vector.shape_cast %1583 : vector<1xf32> to vector<1x1x1xf32>
    %1585 = vector.extract %1584[0, 0, 0] : f32 from vector<1x1x1xf32>
    %1586 = vector.broadcast %1585 : f32 to vector<1x1xf32>
    %1587 = arith.addf %1578, %1586 : vector<1x1xf32>
    %c0_351 = arith.constant 0 : index
    %c0_352 = arith.constant 0 : index
    %1588 = vector.load %arg11[%c0_351, %c0_352] : memref<1x1xf32, #tpu.memory_space<vmem>>, vector<1x1xf32>
    tpu.vector_store %arg11[%c0_351, %c0_352], %1587 {strides = array<i32>} : memref<1x1xf32, #tpu.memory_space<vmem>>, vector<1x1xf32>,
    %c0_i32_353 = arith.constant 0 : i32
    %1589 = arith.cmpi eq, %arg1, %c0_i32_353 : i32
    %1590 = arith.extui %1589 : i1 to i32
    %c0_i32_354 = arith.constant 0 : i32
    %1591 = arith.cmpi ne, %1590, %c0_i32_354 : i32
    scf.if %1591 {
      %c0_355 = arith.constant 0 : index
      %c0_356 = arith.constant 0 : index
      %1592 = vector.load %arg8[%c0_355, %c0_356] : memref<8x1xf32, #tpu.memory_space<vmem>>, vector<8x1xf32>
      %c0_357 = arith.constant 0 : index
      %c0_358 = arith.constant 0 : index
      %1593 = vector.load %arg9[%c0_357, %c0_358] : memref<8x1xf32, #tpu.memory_space<vmem>>, vector<8x1xf32>
      %1594 = math.log %1593 : vector<8x1xf32>
      %1595 = arith.addf %1592, %1594 : vector<8x1xf32>
      %c0_359 = arith.constant 0 : index
      %c0_360 = arith.constant 0 : index
      %1596 = vector.load %arg10[%c0_359, %c0_360] : memref<8x1xf32, #tpu.memory_space<vmem>>, vector<8x1xf32>
      %1597 = arith.subf %1595, %1596 : vector<8x1xf32>
      %cst_361 = arith.constant 0.000000e+00 : f32
      %1598 = vector.broadcast %cst_361 : f32 to vector<8x1xf32>
      %1599 = arith.select %13, %1597, %1598 : vector<8x1xi1>, vector<8x1xf32>
      %1600 = vector.shape_cast %1599 : vector<8x1xf32> to vector<1x8x1xf32>
      %cst_362 = arith.constant dense<0.000000e+00> : vector<1xf32>
      %1601 = vector.multi_reduction <add>, %1600, %cst_362 [1, 2] : vector<1x8x1xf32> to vector<1xf32>
      %1602 = vector.shape_cast %1601 : vector<1xf32> to vector<1x1x1xf32>
      %1603 = vector.extract %1602[0, 0, 0] : f32 from vector<1x1x1xf32>
      %1604 = vector.broadcast %1603 : f32 to vector<1x1xf32>
      %1605 = vector.shape_cast %1604 : vector<1x1xf32> to vector<1x1x1xf32>
      %1606 = vector.shape_cast %1605 : vector<1x1x1xf32> to vector<1x1x1xf32>
      %1607 = vector.broadcast %1606 : vector<1x1x1xf32> to vector<1x8x128xf32>
      %c0_363 = arith.constant 0 : index
      %c0_364 = arith.constant 0 : index
      %c0_365 = arith.constant 0 : index
      %1608 = vector.load %arg6[%c0_363, %c0_364, %c0_365] : memref<1x8x128xf32, #tpu.memory_space<vmem>>, vector<1x8x128xf32>
      tpu.vector_store %arg6[%c0_363, %c0_364, %c0_365], %1607 {strides = array<i32>} : memref<1x8x128xf32, #tpu.memory_space<vmem>>, vector<1x8x128xf32>,
      %c0_366 = arith.constant 0 : index
      %c0_367 = arith.constant 0 : index
      %1609 = vector.load %arg11[%c0_366, %c0_367] : memref<1x1xf32, #tpu.memory_space<vmem>>, vector<1x1xf32>
      %1610 = vector.shape_cast %1609 : vector<1x1xf32> to vector<1x1x1xf32>
      %1611 = vector.shape_cast %1610 : vector<1x1x1xf32> to vector<1x1x1xf32>
      %1612 = vector.broadcast %1611 : vector<1x1x1xf32> to vector<1x8x128xf32>
      %c0_368 = arith.constant 0 : index
      %c0_369 = arith.constant 0 : index
      %c0_370 = arith.constant 0 : index
      %1613 = vector.load %arg7[%c0_368, %c0_369, %c0_370] : memref<1x8x128xf32, #tpu.memory_space<vmem>>, vector<1x8x128xf32>
      tpu.vector_store %arg7[%c0_368, %c0_369, %c0_370], %1612 {strides = array<i32>} : memref<1x8x128xf32, #tpu.memory_space<vmem>>, vector<1x8x128xf32>,
    } else {
    }
    return
  }
  func.func @transform_0(%arg0: i32, %arg1: i32) -> (i32, i32) {
    %c0_i32 = arith.constant 0 : i32
    %c0_i32_0 = arith.constant 0 : i32
    return %arg0, %c0_i32 : i32, i32
  }
  func.func @transform_1(%arg0: i32, %arg1: i32) -> (i32, i32) {
    %c0_i32 = arith.constant 0 : i32
    %c0_i32_0 = arith.constant 0 : i32
    return %c0_i32, %arg1 : i32, i32
  }
  func.func @transform_2(%arg0: i32, %arg1: i32) -> (i32, i32) {
    %c0_i32 = arith.constant 0 : i32
    return %arg0, %arg1 : i32, i32
  }
  func.func @transform_3(%arg0: i32, %arg1: i32) -> (i32, i32) {
    %c0_i32 = arith.constant 0 : i32
    %c0_i32_0 = arith.constant 0 : i32
    return %arg0, %c0_i32 : i32, i32
  }
  func.func @transform_4(%arg0: i32, %arg1: i32) -> (i32, i32, i32) {
    %c0_i32 = arith.constant 0 : i32
    %c0_i32_0 = arith.constant 0 : i32
    %c0_i32_1 = arith.constant 0 : i32
    return %arg0, %c0_i32, %c0_i32_0 : i32, i32, i32
  }
  func.func @transform_5(%arg0: i32, %arg1: i32) -> (i32, i32, i32) {
    %c0_i32 = arith.constant 0 : i32
    %c0_i32_0 = arith.constant 0 : i32
    %c0_i32_1 = arith.constant 0 : i32
    return %arg0, %c0_i32, %c0_i32_0 : i32, i32, i32
  }
}

</mosaic_0001>

<bundles_post_ra>
// kernel: tpu_custom_call.1
= control target key start
LH: loop header
LB: loop body
LE: loop exit
PB: predicated region body
PF: predicated region fallthrough
CT: control target
= control target key end

     0   :  { %11 = vsyncpa [#allocation7], 0  ;;  %s2118_s0 = inlined_call_operand.vmem [shape: s32[8,8], index: 0, kind: input, shape index: {}]   ;;  %s2119_s1 = inlined_call_operand.hbm [shape: s32[8,128], index: 1, kind: input, shape index: {}]   ;;  %s2120_s2 = inlined_call_operand.hbm [shape: f32[8,128], index: 2, kind: input, shape index: {}]   ;;  %s2121_s3 = inlined_call_operand.vmem [shape: s32[8,1], index: 3, kind: input, shape index: {}]   ;;  %s2122_s4 = inlined_call_operand.hbm [shape: f32[1,8,128], index: 4, kind: output, shape index: {0}]   ;;  %s2123_s5 = inlined_call_operand.hbm [shape: f32[1,8,128], index: 5, kind: output, shape index: {1}]  }
   0x1   :  { %12 = vsyncpa [#allocation10], 0 }
   0x2   :  { %13 = vsyncpa [#allocation8], 0 }
   0x3   :  { %14 = vsyncpa [#allocation13], 0  ;;  %s22_s20 = sshll.u32 %s2119_s1, 4  ;;  %s898_s21 = smov [#allocation6]   ;;  %s23_s20 = int_to_ptr.hbm [resolvable:$true] %s22_s20 }
   0x4   :  { %s24_s22 = sshll.u32 %s898_s21, 4  ;;  %s33_s25 = sshll.u32 %s2120_s2, 4  ;;  %s25_s22 = int_to_ptr.vmem [resolvable:$true] %s24_s22  ;;  %s34_s25 = int_to_ptr.hbm [resolvable:$true] %s33_s25 }
   0x5   :  { %27 = dma.hbm_to_vmem [thread:$0]  %s23_s20, 128, %s25_s22, [#allocation7]  }
   0x6   :  { %s899_s26 = smov [#allocation9]  }
   0x7   :  { %s35_s27 = sshll.u32 %s899_s26, 4  ;;  %s36_s27 = int_to_ptr.vmem [resolvable:$true] %s35_s27 }
   0x8   :  { %38 = dma.hbm_to_vmem [thread:$0]  %s34_s25, 128, %s36_s27, [#allocation10]  }
   0x9   :  { %890 = dma.done.wait [#allocation7], 128  }
   0xa   :  { %891 = vsyncadd [#allocation7], 4294967168 }
   0xb   :  { %892 = dma.done.wait [#allocation10], 128  }
   0xc   :  { %893 = vsyncadd [#allocation10], 4294967168  ;;  %v900_v0 = vmov 0   ;;  %v901_v1 = vmov 2   ;;  %v902_v2 = vmov 4   ;;  %v110_v3 = vld [vmem:[%s2118_s0] sm:$0xff]  ;;  %v66_v9 = vlaneseq }
   0xd   :  { %775 = vset.pattern.permute.xlu0 %v900_v0  ;;  %777 = vset.pattern.permute.xlu1 %v901_v1  ;;  %v903_v4 = vmov 1   ;;  %v904_v5 = vmov 3   ;;  %v905_v6 = vmov 6   ;;  %v906_v7 = vmov 5   ;;  %v59_v11 = vld [vmem:[#allocation9] sm:$0xff]  ;;  %v111_v13 = vld [vmem:[#allocation6] sm:$0xff] }
   0xe   :  { %779 = vset.pattern.permute.xlu2 %v902_v2  ;;  %113 = vperm.xlu0 %775, %v110_v3   ;;  %v907_v8 = vmov 7   ;;  %v952_v10 = vand.u32 127, %v66_v9  ;;  %v960_v14 = vperm.slane %v111_v13, 0  ;;  %v962_v15 = vperm.slane %v111_v13, 1  ;;  %s911_s29 = smov [#allocation12]   ;;  %s739_s8 = sshll.u32 %s2123_s5, 4  ;;  %s740_s8 = int_to_ptr.hbm [resolvable:$true] %s739_s8 }
   0xf   :  { %241 = vperm.xlu1 %777, %v110_v3   ;;  %385 = vperm.xlu2 %779, %v110_v3   ;;  %v2139_v17 = vmov 1.0   ;;  %v971_v19 = vperm.slane %v111_v13, 2  ;;  %v973_v20 = vperm.slane %v111_v13, 3  ;;  %v975_v22 = vperm.slane %v111_v13, 4  ;;  %s737_s30 = sshll.u32 %s911_s29, 4  ;;  %s728_s11 = sshll.u32 %s2122_s4, 4  ;;  %s738_s30 = int_to_ptr.vmem [resolvable:$true] %s737_s30  ;;  %s729_s11 = int_to_ptr.hbm [resolvable:$true] %s728_s11 }
  0x10   :  { %2160 = vst [vmem:[#allocation18_spill] sm:$0xff] %v952_v10  ;;  %vm2124_vm0 = vcmp.lt.s32.totalorder %v952_v10, 16  ;;  %v981_v24 = vperm.slane %v111_v13, 5  ;;  %v985_v26 = vperm.slane %v111_v13, 6  ;;  %v987_v27 = vperm.slane %v111_v13, 7  ;;  %s912_s12 = smov [#allocation11]  }
  0x11   :  { %v957_v12 = vsel %vm2124_vm0, %v59_v11, -inf  ;;  %s726_s13 = sshll.u32 %s912_s12, 4  ;;  %s727_s13 = int_to_ptr.vmem [resolvable:$true] %s726_s13 }
  0x12   :  { %2161 = vst [vmem:[#allocation19_spill] sm:$0xff] %v957_v12 }
  0x16   :  { %776 = vset.pattern.permute.xlu0 %v903_v4 }
  0x17   :  { %778 = vset.pattern.permute.xlu1 %v904_v5  ;;  %170 = vperm.xlu0 %776, %v110_v3  }
  0x18   :  { %313 = vperm.xlu1 %778, %v110_v3   ;;  %780 = vset.pattern.permute.xlu2 %v906_v7 }
  0x19   :  { %457 = vperm.xlu2 %780, %v110_v3  }
  0x1f   :  { %785 = vset.pattern.permute.xlu0 %v900_v0 }
  0x20   :  { %781 = vset.pattern.permute.xlu1 %v905_v6 }
  0x21   :  { %529 = vperm.xlu1 %781, %v110_v3   ;;  %782 = vset.pattern.permute.xlu2 %v907_v8 }
  0x22   :  { %601 = vperm.xlu2 %782, %v110_v3  }
  0x29   :  { %783 = vset.pattern.permute.xlu1 %v900_v0 }
  0x2a   :  { %784 = vset.pattern.permute.xlu2 %v900_v0 }
  0x41   :  { %77 = vmax.xlane.f32.xlu0 %v957_v12 }
  0x69   :  { %v1114_v8 = vpop.permute.xlu2 %385 }
  0x80   :  { %v964_v16 = vpop.permute.xlu0 %113 }
  0x81   :  { %vm116_vm1 = vcmp.eq.s32.totalorder %v964_v16, %v960_v14  ;;  %vm121_vm2 = vcmp.eq.s32.totalorder %v964_v16, %v962_v15  ;;  %vm128_vm3 = vcmp.eq.s32.totalorder %v964_v16, %v971_v19  ;;  %vm135_vm4 = vcmp.eq.s32.totalorder %v964_v16, %v973_v20  ;;  %v998_v31 = vpop.permute.xlu1 %241 }
  0x82   :  { %v117_v18 = vsel %vm116_vm1, 0.0, %v2139_v17  ;;  %v122_v23 = vsel %vm121_vm2, 0.0, %v2139_v17  ;;  %vm142_vm5 = vcmp.eq.s32.totalorder %v964_v16, %v975_v22  ;;  %vm2128_vm6 = vcmp.eq.s32.totalorder %v964_v16, %v981_v24 }
  0x83   :  { %v119_v21 = vmin.f32 %v117_v18, 2.0  ;;  %v125_v29 = vadd.f32 1.0, %v122_v23  ;;  %v129_v33 = vsel %vm128_vm3, 0.0, %v2139_v17  ;;  %v136_v34 = vsel %vm135_vm4, 0.0, %v2139_v17 }
  0x84   :  { %vm2126_vm7 = vcmp.eq.s32.totalorder %v964_v16, %v985_v26  ;;  %v143_v36 = vsel %vm142_vm5, 0.0, %v2139_v17  ;;  %vm2125_vm9 = vcmp.eq.s32.totalorder %v964_v16, %v987_v27  ;;  %v150_v38 = vsel %vm2128_vm6, 0.0, %v2139_v17 }
  0x85   :  { %v983_v25 = vadd.f32 1.0, %v119_v21  ;;  %vm243_vm10 = vcmp.eq.s32.totalorder %v998_v31, %v960_v14  ;;  %v132_v41 = vadd.f32 2.0, %v129_v33  ;;  %v157_v42 = vsel %vm2126_vm7, 0.0, %v2139_v17 }
  0x86   :  { %v244_v43 = vsel %vm243_vm10, 0.0, %v2139_v17  ;;  %v139_v44 = vadd.f32 3.0, %v136_v34  ;;  %v164_v45 = vsel %vm2125_vm9, 0.0, %v2139_v17  ;;  %v146_v48 = vadd.f32 4.0, %v143_v36 }
  0x87   :  { %v124_v28 = vmin.f32 %v983_v25, 3.0  ;;  %v1049_v49 = vadd.f32 5.0, %v150_v38  ;;  %v1055_v51 = vadd.f32 6.0, %v157_v42  ;;  %v246_v52 = vadd.f32 2.0, %v244_v43 }
  0x88   :  { %vm248_vm12 = vcmp.eq.s32.totalorder %v998_v31, %v962_v15  ;;  %v1064_v55 = vadd.f32 7.0, %v164_v45  ;;  %vm2129_vm14 = vcmp.eq.s32.totalorder %v998_v31, %v971_v19  ;;  %vm2127_vm15 = vcmp.eq.s32.totalorder %v998_v31, %v973_v20 }
  0x89   :  { %v126_v30 = vmin.f32 %v124_v28, %v125_v29  ;;  %v1000_v32 = vpop.permute.xlu0 %170  ;;  %v249_v56 = vsel %vm248_vm12, 0.0, %v2139_v17  ;;  %v1084_v62 = vsel %vm2129_vm14, 0.0, %v2139_v17  ;;  %v1104_v4 = vsel %vm2127_vm15, 0.0, %v2139_v17 }
  0x8a   :  { %vm172_vm8 = vcmp.eq.s32.totalorder %v1000_v32, %v960_v14  ;;  %vm176_vm11 = vcmp.eq.s32.totalorder %v1000_v32, %v962_v15  ;;  %vm185_vm13 = vcmp.eq.s32.totalorder %v1000_v32, %v971_v19  ;;  %v1077_v60 = vpop.permute.xlu1 %313  ;;  %vm2131_vm0 = vcmp.eq.s32.totalorder %v998_v31, %v975_v22 }
  0x8b   :  { %v1014_v35 = vadd.f32 1.0, %v126_v30  ;;  %v173_v37 = vsel %vm172_vm8, 0.0, %v2139_v17  ;;  %v177_v50 = vsel %vm176_vm11, 0.0, %v2139_v17  ;;  %vm315_vm1 = vcmp.eq.s32.totalorder %v1077_v60, %v960_v14  ;;  %vm182_vm6 = vmand %vm172_vm8, %vm121_vm2 }
  0x8c   :  { %v174_v39 = vadd.f32 1.0, %v173_v37  ;;  %v180_v58 = vadd.f32 %v177_v50, %v119_v21  ;;  %v186_v0 = vsel %vm185_vm13, 0.0, %v2139_v17  ;;  %v316_v2 = vsel %vm315_vm1, 0.0, %v2139_v17 }
  0x8d   :  { %v131_v40 = vmin.f32 %v1014_v35, 4.0  ;;  %vm2132_vm9 = vcmp.eq.s32.totalorder %v1000_v32, %v973_v20  ;;  %vm2130_vm7 = vcmp.eq.s32.totalorder %v998_v31, %v981_v24  ;;  %v318_v7 = vadd.f32 3.0, %v316_v2 }
  0x8e   :  { %v175_v46 = vmin.f32 %v124_v28, %v174_v39  ;;  %vm2133_vm15 = vcmp.eq.s32.totalorder %v998_v31, %v985_v26  ;;  %v189_v11 = vadd.f32 %v186_v0, %v126_v30  ;;  %vm387_vm14 = vcmp.eq.s32.totalorder %v1114_v8, %v960_v14 }
  0x8f   :  { %v1047_v47 = vmin.f32 %v131_v40, %v132_v41  ;;  %v1133_v13 = vsel %vm2131_vm0, 0.0, %v2139_v17  ;;  %v195_v21 = vsel %vm2132_vm9, 0.0, %v2139_v17  ;;  %vm203_vm2 = vcmp.eq.s32.totalorder %v1000_v32, %v975_v22 }
  0x90   :  { %v1059_v53 = vadd.f32 1.0, %v175_v46  ;;  %vm212_vm8 = vcmp.eq.s32.totalorder %v1000_v32, %v981_v24  ;;  %v1151_v30 = vsel %vm2130_vm7, 0.0, %v2139_v17  ;;  %v388_v34 = vsel %vm387_vm14, 0.0, %v2139_v17 }
  0x91   :  { %v1062_v54 = vadd.f32 1.0, %v1047_v47  ;;  %v252_v39 = vadd.f32 %v249_v56, %v175_v46  ;;  %vm2136_vm7 = vcmp.eq.s32.totalorder %v1000_v32, %v985_v26  ;;  %vm2135_vm0 = vcmp.eq.s32.totalorder %v1000_v32, %v987_v27 }
  0x92   :  { %v179_v57 = vmin.f32 %v1014_v35, %v1059_v53  ;;  %v245_v59 = vmin.f32 %v1059_v53, 4.0  ;;  %vm320_vm9 = vcmp.eq.s32.totalorder %v1077_v60, %v962_v15  ;;  %v1177_v45 = vsel %vm2133_vm15, 0.0, %v2139_v17  ;;  %vm191_vm15 = vmand %vm176_vm11, %vm128_vm3 }
  0x93   :  { %v138_v61 = vmin.f32 %v1062_v54, 5.0  ;;  %v1216_v0 = vsel %vm2135_vm0, 0.0, %v2139_v17  ;;  %vm254_vm3 = vmand %vm243_vm10, %vm176_vm11  ;;  %vm392_vm0 = vcmp.eq.s32.totalorder %v1114_v8, %v962_v15  ;;  %vm2138_vm10 = vcmp.eq.s32.totalorder %v1077_v60, %v973_v20 }
  0x94   :  { %v181_v63 = vmin.f32 %v179_v57, %v180_v58  ;;  %v247_v1 = vmin.f32 %v245_v59, %v246_v52  ;;  %v321_v58 = vsel %vm320_vm9, 0.0, %v2139_v17  ;;  %v198_v59 = vadd.f32 %v195_v21, %v1047_v47 }
  0x95   :  { %v1098_v3 = vmin.f32 %v138_v61, %v139_v44  ;;  %v390_v44 = vadd.f32 4.0, %v388_v34  ;;  %v213_v61 = vsel %vm212_vm8, 0.0, %v2139_v17 }
  0x96   :  { %v183_v5 = vmin.f32 %v181_v63, 1.0  ;;  %v1112_v6 = vadd.f32 1.0, %v247_v1  ;;  %v324_v21 = vadd.f32 %v321_v58, %v247_v1 }
  0x97   :  { %v1117_v9 = vadd.f32 1.0, %v1098_v3 }
  0x98   :  { %v184_v18 = vsel %vm182_vm6, %v183_v5, %v181_v63  ;;  %v317_v23 = vmin.f32 %v1112_v6, 5.0  ;;  %vm2134_vm6 = vcmp.eq.s32.totalorder %v998_v31, %v987_v27  ;;  %v1210_v63 = vsel %vm2136_vm7, 0.0, %v2139_v17 }
  0x99   :  { %v145_v28 = vmin.f32 %v1117_v9, 6.0  ;;  %v1141_v29 = vadd.f32 1.0, %v184_v18  ;;  %v1183_v46 = vsel %vm2134_vm6, 0.0, %v2139_v17  ;;  %vm329_vm6 = vcmp.eq.s32.totalorder %v1077_v60, %v971_v19 }
  0x9a   :  { %v319_v33 = vmin.f32 %v317_v23, %v318_v7  ;;  %2163 = vst [vmem:[#allocation21_spill] sm:$0xff] %v1183_v46  ;;  %v1234_v23 = vpop.permute.xlu2 %457  ;;  %v261_v34 = vadd.f32 %v1084_v62, %v184_v18  ;;  %v330_v62 = vsel %vm329_vm6, 0.0, %v2139_v17  ;;  %v393_v18 = vsel %vm392_vm0, 0.0, %v2139_v17 }
  0x9b   :  { %v147_v36 = vmin.f32 %v145_v28, %v146_v48  ;;  %v188_v37 = vmin.f32 %v1062_v54, %v1141_v29  ;;  %v251_v38 = vmin.f32 %v1141_v29, %v1112_v6  ;;  %v204_v48 = vsel %vm203_vm2, 0.0, %v2139_v17 }
  0x9c   :  { %v1169_v40 = vadd.f32 1.0, %v319_v33  ;;  %vm459_vm11 = vcmp.eq.s32.totalorder %v1234_v23, %v960_v14  ;;  %vm464_vm7 = vcmp.eq.s32.totalorder %v1234_v23, %v962_v15 }
  0x9d   :  { %v1171_v41 = vadd.f32 1.0, %v147_v36  ;;  %v190_v42 = vmin.f32 %v188_v37, %v189_v11  ;;  %v253_v43 = vmin.f32 %v251_v38, %v252_v39 }
  0x9e   :  { %v389_v50 = vmin.f32 %v1169_v40, 6.0 }
  0x9f   :  { %2162 = vst [vmem:[#allocation20_spill] sm:$0xff] %v1171_v41  ;;  %v152_v52 = vmin.f32 %v1171_v41, 7.0  ;;  %v192_v56 = vmin.f32 %v190_v42, 2.0  ;;  %v255_v57 = vmin.f32 %v253_v43, 2.0 }
  0xa0   :  { %v1226_v5 = vmin.f32 %v389_v50, %v390_v44 }
  0xa1   :  { %v193_v47 = vsel %vm191_vm15, %v192_v56, %v190_v42  ;;  %v256_v2 = vsel %vm254_vm3, %v255_v57, %v253_v43  ;;  %v154_v28 = vmin.f32 %v152_v52, %v1049_v49  ;;  %vm2137_vm15 = vcmp.eq.s32.totalorder %v1114_v8, %v971_v19  ;;  %vm1274_vm3 = vmand %vm315_vm1, %vm248_vm12 }
  0xa2   :  { %v1228_v7 = vadd.f32 1.0, %v193_v47  ;;  %v1230_v11 = vadd.f32 1.0, %v256_v2  ;;  %v207_v49 = vadd.f32 %v204_v48, %v1098_v3  ;;  %v1260_v39 = vadd.f32 1.0, %v1226_v5  ;;  %vm200_vm1 = vmand %vm185_vm13, %vm135_vm4 }
  0xa3   :  { %v460_v3 = vsel %vm459_vm11, 0.0, %v2139_v17  ;;  %v1266_v48 = vadd.f32 1.0, %v154_v28  ;;  %v1282_v52 = vsel %vm2138_vm10, 0.0, %v2139_v17  ;;  %v1288_v56 = vsel %vm2137_vm15, 0.0, %v2139_v17  ;;  %vm263_vm15 = vmand %vm248_vm12, %vm185_vm13 }
  0xa4   :  { %2164 = vst [vmem:[#allocation22_spill] sm:$0xff] %v1230_v11  ;;  %v197_v37 = vmin.f32 %v1117_v9, %v1228_v7  ;;  %v260_v1 = vmin.f32 %v1228_v7, %v1230_v11  ;;  %v323_v38 = vmin.f32 %v1230_v11, %v1169_v40  ;;  %vm2146_vm10 = vcmp.eq.s32.totalorder %v1077_v60, %v975_v22 }
  0xa5   :  { %2165 = vst [vmem:[#allocation23_spill] sm:$0xff] %v1260_v39  ;;  %vm2145_vm4 = vcmp.eq.s32.totalorder %v1114_v8, %v973_v20  ;;  %vm473_vm12 = vcmp.eq.s32.totalorder %v1234_v23, %v971_v19  ;;  %v270_v50 = vadd.f32 %v1104_v4, %v193_v47  ;;  %v333_v10 = vadd.f32 %v330_v62, %v256_v2 }
  0xa6   :  { %v199_v42 = vmin.f32 %v197_v37, %v198_v59  ;;  %v262_v43 = vmin.f32 %v260_v1, %v261_v34  ;;  %v325_v44 = vmin.f32 %v323_v38, %v324_v21  ;;  %v396_v21 = vadd.f32 %v393_v18, %v319_v33 }
  0xa7   :  { %v1299_v34 = vadd.f32 %v213_v61, %v147_v36  ;;  %v461_v37 = vmin.f32 %v1260_v39, 7.0  ;;  %v462_v1 = vadd.f32 5.0, %v460_v3  ;;  %v2168_v33 = vmov 1.0   ;;  %v1323_v3 = vpop.permute.xlu1 %529 }
  0xa8   :  { %v201_v57 = vmin.f32 %v199_v42, 3.0  ;;  %v264_v58 = vmin.f32 %v262_v43, %v983_v25  ;;  %v327_v59 = vmin.f32 %v325_v44, 3.0  ;;  %v465_v36 = vsel %vm464_vm7, 0.0, %v2168_v33 }
  0xa9   :  { %v159_v61 = vmin.f32 %v1266_v48, 8.0  ;;  %vm2147_vm13 = vcmp.eq.s32.totalorder %v1323_v3, %v960_v14  ;;  %v1352_v11 = vsel %vm2145_vm4, 0.0, %v2168_v33  ;;  %vm2176_vm4 = vcmp.eq.s32.totalorder %v998_v31, %v971_v19 }
  0xaa   :  { %v202_v38 = vsel %vm200_vm1, %v201_v57, %v199_v42  ;;  %v265_v17 = vsel %vm263_vm15, %v264_v58, %v262_v43  ;;  %v328_v25 = vsel %vm1274_vm3, %v327_v59, %v325_v44  ;;  %v1331_v43 = vsel %vm2146_vm10, 0.0, %v2168_v33 }
  0xab   :  { %v1317_v18 = vadd.f32 1.0, %v202_v38  ;;  %v1319_v12 = vadd.f32 1.0, %v265_v17  ;;  %v1325_v42 = vadd.f32 1.0, %v328_v25  ;;  %v1342_v58 = vmin.f32 %v461_v37, %v462_v1 }
  0xac   :  { %v161_v4 = vmin.f32 %v159_v61, %v1055_v51  ;;  %vm2172_vm15 = vcmp.eq.s32.totalorder %v1000_v32, %v973_v20  ;;  %v532_v37 = vsel %vm2147_vm13, 0.0, %v2168_v33  ;;  %v1370_v1 = vadd.f32 %v1210_v63, %v154_v28 }
  0xad   :  { %2169 = vst [vmem:[#allocation24_spill] sm:$0xff] %v1317_v18  ;;  %v206_v44 = vmin.f32 %v1171_v41, %v1317_v18  ;;  %v269_v57 = vmin.f32 %v1317_v18, %v1319_v12  ;;  %v332_v59 = vmin.f32 %v1319_v12, %v1325_v42  ;;  %v395_v46 = vmin.f32 %v1325_v42, %v1260_v39  ;;  %vm1361_vm3 = vmand %vm2172_vm15, %vm142_vm5 }
  0xae   :  { %2170 = vst [vmem:[#allocation25_spill] sm:$0xff] %v1319_v12  ;;  %vm2175_vm1 = vmmov %vm2172_vm15  ;;  %vm536_vm5 = vcmp.eq.s32.totalorder %v1323_v3, %v962_v15  ;;  %v1396_v28 = vadd.f32 1.0, %v1342_v58 }
  0xaf   :  { %2171 = vst [vmem:[#allocation26_spill] sm:$0xff] %v1325_v42  ;;  %v208_v47 = vmin.f32 %v206_v44, %v207_v49  ;;  %v271_v62 = vmin.f32 %v269_v57, %v270_v50  ;;  %vm1378_vm10 = vmand %vm2176_vm4, %vm2175_vm1  ;;  %v334_v49 = vmin.f32 %v332_v59, %v333_v10  ;;  %v397_v61 = vmin.f32 %v395_v46, %v396_v21  ;;  %v1428_v42 = vpop.permute.xlu2 %601 }
  0xb0   :  { %vm2179_vm15 = vmmov %vm2176_vm4  ;;  %2182 = vst [vmem:[#allocation27_spill] sm:$0xff] %v1396_v28  ;;  %v468_v10 = vadd.f32 %v465_v36, %v1226_v5  ;;  %v1414_v57 = vsel %vm473_vm12, 0.0, %v2168_v33  ;;  %v534_v5 = vadd.f32 6.0, %v532_v37  ;;  %v1416_v36 = vadd.f32 1.0, %v161_v4  ;;  %v99_v37 = vld [vmem:[%s2121_s3] sm:$0xff] }
  0xb1   :  { %v210_v44 = vmin.f32 %v208_v47, 4.0  ;;  %v273_v50 = vmin.f32 %v271_v62, %v1014_v35  ;;  %vm1391_vm13 = vmand %vm320_vm9, %vm2179_vm15  ;;  %v336_v46 = vmin.f32 %v334_v49, %v1059_v53  ;;  %v399_v21 = vmin.f32 %v397_v61, 4.0  ;;  %102 = vperm.xlu2 %784, %v99_v37  }
  0xb2   :  { %vm1406_vm4 = vmand %vm387_vm14, %vm320_vm9  ;;  %v537_v39 = vsel %vm536_vm5, 0.0, %v2168_v33  ;;  %vm356_vm9 = vcmp.eq.s32.totalorder %v1077_v60, %v981_v24  ;;  %vm603_vm14 = vcmp.eq.s32.totalorder %v1428_v42, %v960_v14  ;;  %vm482_vm1 = vcmp.eq.s32.totalorder %v1234_v23, %v973_v20 }
  0xb3   :  { %v211_v53 = vsel %vm1361_vm3, %v210_v44, %v208_v47  ;;  %v1422_v59 = vsel %vm1378_vm10, %v273_v50, %v271_v62  ;;  %v279_v47 = vadd.f32 %v1133_v13, %v202_v38  ;;  %v1445_v62 = vsel %vm1391_vm13, %v336_v46, %v334_v49 }
  0xb4   :  { %v1433_v12 = vadd.f32 1.0, %v211_v53  ;;  %v1436_v2 = vadd.f32 1.0, %v1422_v59  ;;  %v400_v51 = vsel %vm1406_vm4, %v399_v21, %v397_v61  ;;  %v533_v44 = vmin.f32 %v1396_v28, 8.0 }
  0xb5   :  { %v1455_v41 = vadd.f32 1.0, %v1445_v62  ;;  %v1457_v37 = vadd.f32 1.0, %v400_v51  ;;  %v166_v13 = vmin.f32 %v1416_v36, 9.0  ;;  %v342_v38 = vadd.f32 %v1282_v52, %v265_v17 }
  0xb6   :  { %v215_v50 = vmin.f32 %v1266_v48, %v1433_v12  ;;  %v278_v18 = vmin.f32 %v1433_v12, %v1436_v2  ;;  %v405_v49 = vadd.f32 %v1288_v56, %v328_v25  ;;  %vm2155_vm10 = vcmp.eq.s32.totalorder %v1114_v8, %v975_v22 }
  0xb7   :  { %2185 = vst [vmem:[#allocation28_spill] sm:$0xff] %v1457_v37  ;;  %v341_v46 = vmin.f32 %v1436_v2, %v1455_v41  ;;  %v404_v35 = vmin.f32 %v1455_v41, %v1457_v37  ;;  %vm2186_vm13 = vcmp.eq.s32.totalorder %v964_v16, %v981_v24  ;;  %v1476_v17 = vadd.f32 %v1216_v0, %v161_v4 }
  0xb8   :  { %v217_v61 = vmin.f32 %v215_v50, %v1299_v34  ;;  %v280_v63 = vmin.f32 %v278_v18, %v279_v47  ;;  %vm218_vm3 = vmand %vm203_vm2, %vm2186_vm13  ;;  %v467_v52 = vmin.f32 %v1457_v37, %v1396_v28  ;;  %v1482_v56 = vmin.f32 %v533_v44, %v534_v5 }
  0xb9   :  { %vm2187_vm15 = vcmp.eq.s32.totalorder %v998_v31, %v973_v20  ;;  %v343_v0 = vmin.f32 %v341_v46, %v342_v38  ;;  %v406_v18 = vmin.f32 %v404_v35, %v405_v49  ;;  %v168_v4 = vmin.f32 %v166_v13, %v1064_v55  ;;  %vm407_vm13 = vmand %vm392_vm0, %vm329_vm6 }
  0xba   :  { %v219_v34 = vmin.f32 %v217_v61, 5.0  ;;  %vm281_vm4 = vmand %vm2187_vm15, %vm203_vm2  ;;  %v282_v25 = vmin.f32 %v280_v63, %v1062_v54  ;;  %v1496_v21 = vsel %vm356_vm9, 0.0, %v2168_v33  ;;  %v1508_v54 = vsel %vm2155_vm10, 0.0, %v2168_v33 }
  0xbb   :  { %v469_v55 = vmin.f32 %v467_v52, %v468_v10  ;;  %vm2188_vm2 = vmmov %vm2187_vm15  ;;  %v345_v44 = vmin.f32 %v343_v0, %v1141_v29  ;;  %v408_v50 = vmin.f32 %v406_v18, %v1112_v6  ;;  %v1535_v10 = vsel %vm482_vm1, 0.0, %v2168_v33 }
  0xbc   :  { %v220_v5 = vsel %vm218_vm3, %v219_v34, %v217_v61  ;;  %v1510_v47 = vsel %vm281_vm4, %v282_v25, %v280_v63  ;;  %vm344_vm15 = vmand %vm329_vm6, %vm2188_vm2  ;;  %v538_v6 = vadd.f32 1.0, %v1482_v56  ;;  %v288_v29 = vadd.f32 %v1151_v30, %v211_v53 }
  0xbd   :  { %v1520_v13 = vadd.f32 1.0, %v220_v5  ;;  %v1523_v38 = vadd.f32 1.0, %v1510_v47  ;;  %vm470_vm3 = vmand %vm459_vm11, %vm392_vm0  ;;  %v1539_v49 = vsel %vm407_vm13, %v408_v50, %v406_v18  ;;  %v471_v61 = vmin.f32 %v469_v55, 5.0 }
  0xbe   :  { %v604_v63 = vsel %vm603_vm14, 0.0, %v2168_v33  ;;  %v1549_v52 = vsel %vm344_vm15, %v345_v44, %v343_v0  ;;  %v1552_v34 = vadd.f32 1.0, %v1539_v49  ;;  %v232_v30 = vadd.f32 1.0, %v168_v4 }
  0xbf   :  { %v224_v46 = vmin.f32 %v1416_v36, %v1520_v13  ;;  %v287_v35 = vmin.f32 %v1520_v13, %v1523_v38  ;;  %v1554_v53 = vsel %vm470_vm3, %v471_v61, %v469_v55  ;;  %v477_v25 = vadd.f32 %v1414_v57, %v400_v51 }
  0xc0   :  { %v540_v18 = vadd.f32 %v537_v39, %v1342_v58  ;;  %v1560_v36 = vadd.f32 1.0, %v1554_v53  ;;  %v605_v37 = vmin.f32 %v538_v6, 9.0  ;;  %vm2159_vm0 = vcmp.eq.s32.totalorder %v1077_v60, %v985_v26 }
  0xc1   :  { %v226_v50 = vmin.f32 %v224_v46, %v1370_v1  ;;  %v289_v28 = vmin.f32 %v287_v35, %v288_v29  ;;  %v606_v0 = vadd.f32 7.0, %v604_v63  ;;  %vm2157_vm6 = vcmask 7168  }
  0xc2   :  { %2189 = vst [vmem:[#allocation29_spill] sm:$0xff] %v1560_v36  ;;  %v1565_v4 = vadd.f32 1.0, %v1549_v52  ;;  %vm2190_vm11 = vcmp.eq.s32.totalorder %v964_v16, %v985_v26  ;;  %v476_v1 = vmin.f32 %v1552_v34, %v1560_v36  ;;  %v539_v57 = vmin.f32 %v1560_v36, %v538_v6 }
  0xc3   :  { %vm227_vm4 = vmand %vm212_vm8, %vm2190_vm11  ;;  %v228_v39 = vmin.f32 %v226_v50, 6.0  ;;  %v291_v58 = vmin.f32 %v289_v28, %v1117_v9  ;;  %v909_v51 = vmov -inf   ;;  %vm2191_vm13 = vcmp.eq.s32.totalorder %v998_v31, %v975_v22 }
  0xc4   :  { %54 = vst.msk [vmem:[#allocation2] sm:$0xff] %vm2157_vm6, %v909_v51  ;;  %vm290_vm2 = vmand %vm2191_vm13, %vm212_vm8  ;;  %v351_v55 = vadd.f32 %v1331_v43, %v1422_v59  ;;  %vm608_vm15 = vcmp.eq.s32.totalorder %v1428_v42, %v962_v15  ;;  %v350_v9 = vmin.f32 %v1523_v38, %v1565_v4  ;;  %v413_v44 = vmin.f32 %v1565_v4, %v1552_v34 }
  0xc5   :  { %v229_v6 = vsel %vm227_vm4, %v228_v39, %v226_v50  ;;  %v1592_v29 = vsel %vm290_vm2, %v291_v58, %v289_v28  ;;  %v478_v61 = vmin.f32 %v476_v1, %v477_v25  ;;  %v541_v63 = vmin.f32 %v539_v57, %v540_v18  ;;  %vm2193_vm4 = vmmov %vm2191_vm13 }
  0xc6   :  { %v233_v46 = vadd.f32 1.0, %v229_v6  ;;  %v1595_v35 = vadd.f32 1.0, %v1592_v29  ;;  %vm2192_vm8 = vcmp.eq.s32.totalorder %v1323_v3, %v960_v14  ;;  %vm545_vm11 = vcmp.eq.s32.totalorder %v1323_v3, %v971_v19 }
  0xc7   :  { %vm542_vm3 = vmand %vm2192_vm8, %vm464_vm7  ;;  %v607_v43 = vmin.f32 %v605_v37, %v606_v0  ;;  %vm2194_vm13 = vcmp.eq.s32.totalorder %v1077_v60, %v973_v20  ;;  %v414_v59 = vadd.f32 %v1352_v11, %v1445_v62  ;;  %v480_v25 = vmin.f32 %v478_v61, %v1169_v40  ;;  %v78_v62 = vpop.xlane.xlu0 %77 }
  0xc8   :  { %vm1611_vm2 = vmand %vm2194_vm13, %vm2193_vm4  ;;  %v543_v18 = vmin.f32 %v541_v63, 6.0  ;;  %v352_v50 = vmin.f32 %v350_v9, %v351_v55  ;;  %v234_v39 = vmin.f32 %v232_v30, %v233_v46  ;;  %vm2197_vm8 = vcmp.eq.s32.totalorder %v1114_v8, %v971_v19 }
  0xc9   :  { %vm479_vm10 = vmand %vm464_vm7, %vm2197_vm8  ;;  %vm2158_vm4 = vcmp.eq.s32.totalorder %v1323_v3, %v973_v20  ;;  %v609_v11 = vsel %vm608_vm15, 0.0, %v2168_v33  ;;  %v296_v40 = vmin.f32 %v233_v46, %v1595_v35  ;;  %v297_v37 = vadd.f32 %v1177_v45, %v220_v5 }
  0xca   :  { %v1632_v30 = vsel %vm542_vm3, %v543_v18, %v541_v63  ;;  %v354_v0 = vmin.f32 %v352_v50, %v1228_v7  ;;  %v415_v58 = vmin.f32 %v413_v44, %v414_v59  ;;  %v236_v1 = vmin.f32 %v234_v39, %v1476_v17  ;;  %vm2198_vm7 = vmmov %vm2194_vm13 }
  0xcb   :  { %v360_v57 = vadd.f32 %v1496_v21, %v1510_v47  ;;  %v547_v51 = vadd.f32 1.0, %v1632_v30  ;;  %v610_v55 = vadd.f32 1.0, %v607_v43  ;;  %v1639_v9 = vld [vmem:[#allocation2] sm:$0xff]  ;;  %v1641_v36 = vsel %vm479_vm10, %v480_v25, %v478_v61  ;;  %vm2199_vm3 = vmmov %vm2197_vm8 }
  0xcc   :  { %v1644_v46 = vmax.f32 %v1639_v9, %v78_v62  ;;  %v298_v45 = vmin.f32 %v296_v40, %v297_v37  ;;  %v1648_v7 = vsel %vm1611_vm2, %v354_v0, %v352_v50  ;;  %v238_v5 = vmin.f32 %v236_v1, 7.0  ;;  %vm1656_vm13 = vmand %vm2199_vm3, %vm2198_vm7 }
  0xcd   :  { %v611_v21 = vmin.f32 %v547_v51, %v610_v55  ;;  %v612_v47 = vadd.f32 %v609_v11, %v1482_v56  ;;  %v1662_v44 = vadd.f32 1.0, %v1648_v7  ;;  %vm2202_vm10 = vcmp.eq.s32.totalorder %v964_v16, %v987_v27  ;;  %v2204_v56 = vld [vmem:[#allocation20_spill] sm:$0xff]  ;;  %v2205_v16 = vld [vmem:[#allocation22_spill] sm:$0xff] }
  0xce   :  { %vm2203_vm2 = vcmp.eq.s32.totalorder %v1000_v32, %v985_v26  ;;  %v366_v61 = vsel %vm2159_vm0, 0.0, %v2168_v33  ;;  %v80_v63 = vsub.f32 %v1639_v9, %v1644_v46  ;;  %98 = vst.msk [vmem:[#allocation2] sm:$0xff] %vm2157_vm6, %v1644_v46  ;;  %87 = vperm.xlu1 %783, %v1644_v46   ;;  %v300_v43 = vmin.f32 %v298_v45, %v2204_v56  ;;  %v2209_v56 = vld [vmem:[#allocation24_spill] sm:$0xff] }
  0xcf   :  { %vm237_vm8 = vmand %vm2203_vm2, %vm2202_vm10  ;;  %v417_v28 = vmin.f32 %v415_v58, %v2205_v16  ;;  %vm2207_vm3 = vcmp.eq.s32.totalorder %v998_v31, %v981_v24  ;;  %v1688_v25 = vadd.f32 1.0, %v1641_v36  ;;  %v613_v18 = vmin.f32 %v611_v21, %v612_v47 }
  0xd0   :  { %v239_v59 = vsel %vm237_vm8, %v238_v5, %v236_v1  ;;  %vm2206_vm7 = vmmov %vm2203_vm2  ;;  %v359_v50 = vmin.f32 %v1595_v35, %v1662_v44  ;;  %v546_v11 = vsel %vm545_vm11, 0.0, %v2168_v33  ;;  %v555_v37 = vsel %vm2158_vm4, 0.0, %v2168_v33 }
  0xd1   :  { %vm299_vm10 = vmand %vm2207_vm3, %vm2206_vm7  ;;  %v304_v39 = vadd.f32 1.0, %v239_v59  ;;  %v418_v40 = vsel %vm1656_vm13, %v417_v28, %v415_v58  ;;  %vm617_vm2 = vcmp.eq.s32.totalorder %v1428_v42, %v971_v19  ;;  %v423_v55 = vadd.f32 %v1508_v54, %v1549_v52  ;;  %v2208_v58 = vld [vmem:[#allocation21_spill] sm:$0xff] }
  0xd2   :  { %v1696_v62 = vsel %vm299_vm10, %v300_v43, %v298_v45  ;;  %v361_v1 = vmin.f32 %v359_v50, %v360_v57  ;;  %v486_v45 = vadd.f32 %v1535_v10, %v1539_v49  ;;  %v615_v5 = vmin.f32 %v613_v18, 7.0  ;;  %vm614_vm13 = vmand %vm603_vm14, %vm536_vm5 }
  0xd3   :  { %v305_v0 = vadd.f32 1.0, %v1696_v62  ;;  %v1711_v17 = vadd.f32 1.0, %v418_v40  ;;  %v307_v21 = vadd.f32 %v2208_v58, %v229_v6  ;;  %v548_v47 = vmin.f32 %v1688_v25, %v547_v51  ;;  %vm2210_vm8 = vmmov %vm2207_vm3 }
  0xd4   :  { %v363_v54 = vmin.f32 %v361_v1, %v2209_v56  ;;  %vm2211_vm7 = vcmp.eq.s32.totalorder %v1077_v60, %v975_v22  ;;  %v549_v10 = vadd.f32 %v546_v11, %v1554_v53  ;;  %vm374_vm10 = vcmp.eq.s32.totalorder %v1077_v60, %v987_v27 }
  0xd5   :  { %v306_v57 = vmin.f32 %v304_v39, %v305_v0  ;;  %vm362_vm3 = vmand %vm2211_vm7, %vm2210_vm8  ;;  %v422_v49 = vmin.f32 %v1662_v44, %v1711_v17  ;;  %v485_v14 = vmin.f32 %v1711_v17, %v1688_v25  ;;  %vm428_vm14 = vcmp.eq.s32.totalorder %v1114_v8, %v981_v24  ;;  %v693_v9 = vld [vmem:[#allocation2] sm:$0xff] }
  0xd6   :  { %v1735_v6 = vsel %vm362_vm3, %v363_v54, %v361_v1  ;;  %vm491_vm8 = vcmp.eq.s32.totalorder %v1234_v23, %v975_v22  ;;  %vm2212_vm6 = vcmp.eq.s32.totalorder %v1114_v8, %v973_v20  ;;  %v616_v51 = vsel %vm614_vm13, %v615_v5, %v613_v18 }
  0xd7   :  { %v308_v52 = vmin.f32 %v306_v57, %v307_v21  ;;  %vm1747_vm4 = vmand %vm2212_vm6, %vm2211_vm7  ;;  %v1752_v43 = vadd.f32 1.0, %v1735_v6  ;;  %v424_v16 = vmin.f32 %v422_v49, %v423_v55  ;;  %v487_v28 = vmin.f32 %v485_v14, %v486_v45  ;;  %v2220_v55 = vld [vmem:[#allocation25_spill] sm:$0xff]  ;;  %v2221_v45 = vld [vmem:[#allocation26_spill] sm:$0xff] }
  0xd8   :  { %v369_v59 = vadd.f32 %v366_v61, %v1592_v29  ;;  %vm2215_vm3 = vmmov %vm2212_vm6  ;;  %v618_v18 = vsel %vm617_vm2, 0.0, %v2168_v33  ;;  %v550_v11 = vmin.f32 %v548_v47, %v549_v10  ;;  %v375_v1 = vsel %vm374_vm10, 0.0, %v2168_v33  ;;  %v2224_v47 = vld [vmem:[#allocation23_spill] sm:$0xff] }
  0xd9   :  { %vm1761_vm0 = vmand %vm473_vm12, %vm2215_vm3  ;;  %v310_v39 = vmin.f32 %v308_v52, %v1266_v48  ;;  %v368_v61 = vmin.f32 %v305_v0, %v1752_v43  ;;  %v426_v48 = vmin.f32 %v424_v16, %v2220_v55  ;;  %v489_v5 = vmin.f32 %v487_v28, %v2221_v45 }
  0xda   :  { %vm1776_vm6 = vmand %vm536_vm5, %vm473_vm12  ;;  %vm2222_vm13 = vcmp.eq.s32.totalorder %v1000_v32, %v987_v27  ;;  %vm2223_vm12 = vcmp.eq.s32.totalorder %v998_v31, %v985_v26  ;;  %v619_v58 = vadd.f32 1.0, %v616_v51  ;;  %v429_v0 = vsel %vm428_vm14, 0.0, %v2168_v33 }
  0xdb   :  { %vm309_vm5 = vmand %vm2223_vm12, %vm2222_vm13  ;;  %v492_v21 = vsel %vm491_vm8, 0.0, %v2168_v33  ;;  %v552_v57 = vmin.f32 %v550_v11, %v2224_v47  ;;  %v370_v54 = vmin.f32 %v368_v61, %v369_v59  ;;  %v427_v32 = vsel %vm1747_vm4, %v426_v48, %v424_v16 }
  0xdc   :  { %v311_v56 = vsel %vm309_vm5, %v310_v39, %v308_v52  ;;  %v490_v10 = vsel %vm1761_vm0, %v489_v5, %v487_v28  ;;  %v1806_v49 = vadd.f32 1.0, %v427_v32  ;;  %vm437_vm7 = vcmp.eq.s32.totalorder %v1114_v8, %v985_v26  ;;  %vm2225_vm0 = vmmov %vm2223_vm12 }
  0xdd   :  { %v1810_v14 = vadd.f32 1.0, %v490_v10  ;;  %v553_v51 = vsel %vm1776_vm6, %v552_v57, %v550_v11  ;;  %v558_v55 = vadd.f32 %v555_v37, %v1641_v36  ;;  %v372_v52 = vmin.f32 %v370_v54, %v1433_v12  ;;  %vm371_vm4 = vmand %vm356_vm9, %vm2225_vm0 }
  0xde   :  { %v432_v53 = vadd.f32 %v429_v0, %v1648_v7  ;;  %v556_v16 = vadd.f32 1.0, %v553_v51  ;;  %v376_v28 = vadd.f32 1.0, %v311_v56  ;;  %v431_v59 = vmin.f32 %v1752_v43, %v1806_v49  ;;  %vm1837_vm3 = vmand %vm545_vm11, %vm482_vm1 }
  0xdf   :  { %v494_v50 = vmin.f32 %v1806_v49, %v1810_v14  ;;  %v495_v36 = vadd.f32 %v492_v21, %v418_v40  ;;  %v621_v12 = vadd.f32 %v618_v18, %v1632_v30  ;;  %v1828_v37 = vsel %vm371_vm4, %v372_v52, %v370_v54  ;;  %vm1863_vm0 = vmand %vm608_vm15, %vm545_vm11  ;;  %v2235_v21 = vld [vmem:[#allocation27_spill] sm:$0xff] }
  0xe0   :  { %v557_v7 = vmin.f32 %v1810_v14, %v556_v16  ;;  %v620_v39 = vmin.f32 %v556_v16, %v619_v58  ;;  %v377_v29 = vadd.f32 1.0, %v1828_v37  ;;  %v433_v40 = vmin.f32 %v431_v59, %v432_v53 }
  0xe1   :  { %v496_v61 = vmin.f32 %v494_v50, %v495_v36  ;;  %vm500_vm6 = vcmp.eq.s32.totalorder %v1234_v23, %v981_v24  ;;  %v379_v30 = vadd.f32 %v375_v1, %v1696_v62  ;;  %vm2228_vm13 = vcmp.eq.s32.totalorder %v1114_v8, %v975_v22 }
  0xe2   :  { %vm1851_vm12 = vmand %vm482_vm1, %vm2228_vm13  ;;  %v559_v48 = vmin.f32 %v557_v7, %v558_v55  ;;  %vm563_vm5 = vcmp.eq.s32.totalorder %v1323_v3, %v975_v22  ;;  %v622_v45 = vmin.f32 %v620_v39, %v621_v12  ;;  %v378_v1 = vmin.f32 %v376_v28, %v377_v29 }
  0xe3   :  { %v435_v5 = vmin.f32 %v433_v40, %v1436_v2  ;;  %v498_v58 = vmin.f32 %v496_v61, %v1455_v41  ;;  %vm626_vm1 = vcmp.eq.s32.totalorder %v1428_v42, %v973_v20  ;;  %vm2233_vm4 = vmmov %vm2228_vm13  ;;  %v438_v15 = vsel %vm437_vm7, 0.0, %v2168_v33  ;;  %v2234_v2 = vld [vmem:[#allocation28_spill] sm:$0xff] }
  0xe4   :  { %vm434_vm13 = vmand %vm2233_vm4, %vm356_vm9  ;;  %v501_v41 = vsel %vm500_vm6, 0.0, %v2168_v33  ;;  %v561_v0 = vmin.f32 %v559_v48, %v2234_v2  ;;  %v624_v47 = vmin.f32 %v622_v45, %v2235_v21  ;;  %v380_v57 = vmin.f32 %v378_v1, %v379_v30  ;;  %v2248_v2 = vld [vmem:[#allocation29_spill] sm:$0xff] }
  0xe5   :  { %v436_v56 = vsel %vm434_vm13, %v435_v5, %v433_v40  ;;  %v499_v54 = vsel %vm1851_vm12, %v498_v58, %v496_v61  ;;  %v564_v55 = vsel %vm563_vm5, 0.0, %v2168_v33  ;;  %v627_v28 = vsel %vm626_vm1, 0.0, %v2168_v33 }
  0xe6   :  { %v1893_v52 = vadd.f32 1.0, %v436_v56  ;;  %v1895_v53 = vadd.f32 1.0, %v499_v54  ;;  %v562_v16 = vsel %vm1837_vm3, %v561_v0, %v559_v48  ;;  %v382_v59 = vmin.f32 %v380_v57, %v1520_v13 }
  0xe7   :  { %v441_v50 = vadd.f32 %v438_v15, %v1735_v6  ;;  %v565_v36 = vadd.f32 1.0, %v562_v16  ;;  %v625_v12 = vsel %vm1863_vm0, %v624_v47, %v622_v45  ;;  %v504_v11 = vadd.f32 %v501_v41, %v427_v32 }
  0xe8   :  { %v440_v7 = vmin.f32 %v377_v29, %v1893_v52  ;;  %v503_v39 = vmin.f32 %v1893_v52, %v1895_v53  ;;  %v628_v40 = vadd.f32 1.0, %v625_v12  ;;  %vm2236_vm9 = vcmp.eq.s32.totalorder %v998_v31, %v987_v27 }
  0xe9   :  { %vm2237_vm15 = vcmp.eq.s32.totalorder %v1077_v60, %v985_v26  ;;  %vm446_vm3 = vcmp.eq.s32.totalorder %v1114_v8, %v987_v27  ;;  %v566_v13 = vmin.f32 %v1895_v53, %v565_v36  ;;  %v567_v6 = vadd.f32 %v564_v55, %v490_v10 }
  0xea   :  { %vm381_vm11 = vmand %vm2237_vm15, %vm2236_vm9  ;;  %v630_v61 = vadd.f32 %v627_v28, %v553_v51  ;;  %vm2238_vm12 = vcmp.eq.s32.totalorder %v1323_v3, %v973_v20  ;;  %v442_v29 = vmin.f32 %v440_v7, %v441_v50  ;;  %v505_v30 = vmin.f32 %v503_v39, %v504_v11 }
  0xeb   :  { %vm1925_vm0 = vmand %vm617_vm2, %vm2238_vm12  ;;  %v383_v31 = vsel %vm381_vm11, %v382_v59, %v380_v57  ;;  %v629_v18 = vmin.f32 %v565_v36, %v628_v40  ;;  %vm509_vm2 = vcmp.eq.s32.totalorder %v1234_v23, %v985_v26  ;;  %v568_v19 = vmin.f32 %v566_v13, %v567_v6 }
  0xec   :  { %vm2241_vm4 = vmmov %vm2237_vm15  ;;  %v444_v51 = vmin.f32 %v442_v29, %v1523_v38  ;;  %v507_v48 = vmin.f32 %v505_v30, %v1565_v4  ;;  %vm572_vm11 = vcmp.eq.s32.totalorder %v1323_v3, %v981_v24  ;;  %v910_v1 = vmov 0.0  }
  0xed   :  { %vm1935_vm13 = vmand %vm428_vm14, %vm2241_vm4  ;;  %v631_v62 = vmin.f32 %v629_v18, %v630_v61  ;;  %v447_v38 = vsel %vm446_vm3, 0.0, %v2168_v33  ;;  %vm635_vm4 = vcmp.eq.s32.totalorder %v1428_v42, %v975_v22  ;;  %v448_v4 = vadd.f32 1.0, %v383_v31 }
  0xee   :  { %vm2244_vm9 = vmmov %vm2238_vm12  ;;  %vm2247_vm12 = vcmask 7168   ;;  %v570_v5 = vmin.f32 %v568_v19, %v1552_v34  ;;  %v445_v58 = vsel %vm1935_vm13, %v444_v51, %v442_v29  ;;  %v510_v41 = vsel %vm509_vm2, 0.0, %v2168_v33 }
  0xef   :  { %vm1949_vm15 = vmand %vm2244_vm9, %vm491_vm8  ;;  %55 = vst.msk [vmem:[#allocation3] sm:$0xff] %vm2247_vm12, %v910_v1  ;;  %v633_v0 = vmin.f32 %v631_v62, %v2248_v2  ;;  %v449_v21 = vadd.f32 1.0, %v445_v58  ;;  %v573_v57 = vsel %vm572_vm11, 0.0, %v2168_v33  ;;  %v636_v55 = vsel %vm635_vm4, 0.0, %v2168_v33 }
  0xf0   :  { %vm506_vm9 = vmand %vm491_vm8, %vm428_vm14  ;;  %56 = vst.msk [vmem:[#allocation4] sm:$0xff] %vm2247_vm12, %v910_v1  ;;  %v571_v34 = vsel %vm1949_vm15, %v570_v5, %v568_v19  ;;  %v451_v28 = vadd.f32 %v447_v38, %v1828_v37  ;;  %v513_v7 = vadd.f32 %v510_v41, %v436_v56  ;;  %v576_v40 = vadd.f32 %v573_v57, %v499_v54 }
  0xf1   :  { %v508_v15 = vsel %vm506_vm9, %v507_v48, %v505_v30  ;;  %v574_v59 = vadd.f32 1.0, %v571_v34  ;;  %v634_v50 = vsel %vm1925_vm0, %v633_v0, %v631_v62  ;;  %v450_v36 = vmin.f32 %v448_v4, %v449_v21  ;;  %vm453_vm14 = vmand %vm437_vm7, %vm374_vm10 }
  0xf2   :  { %v1979_v47 = vadd.f32 1.0, %v508_v15  ;;  %v637_v39 = vadd.f32 1.0, %v634_v50  ;;  %v639_v31 = vadd.f32 %v636_v55, %v562_v16  ;;  %vm518_vm8 = vcmp.eq.s32.totalorder %v1234_v23, %v987_v27  ;;  %vm515_vm0 = vmand %vm500_vm6, %vm437_vm7 }
  0xf3   :  { %v452_v13 = vmin.f32 %v450_v36, %v451_v28  ;;  %vm581_vm13 = vcmp.eq.s32.totalorder %v1323_v3, %v985_v26  ;;  %vm641_vm10 = vmand %vm626_vm1, %vm563_vm5  ;;  %vm644_vm15 = vcmp.eq.s32.totalorder %v1428_v42, %v981_v24  ;;  %vm653_vm1 = vcmp.eq.s32.totalorder %v1428_v42, %v985_v26 }
  0xf4   :  { %v512_v12 = vmin.f32 %v449_v21, %v1979_v47  ;;  %v575_v11 = vmin.f32 %v1979_v47, %v574_v59  ;;  %v638_v61 = vmin.f32 %v574_v59, %v637_v39  ;;  %vm578_vm7 = vmand %vm563_vm5, %vm500_vm6  ;;  %v582_v18 = vsel %vm581_vm13, 0.0, %v2168_v33 }
  0xf5   :  { %v454_v56 = vmin.f32 %v452_v13, %v1595_v35  ;;  %v645_v51 = vsel %vm644_vm15, 0.0, %v2168_v33  ;;  %vm590_vm6 = vcmp.eq.s32.totalorder %v1323_v3, %v987_v27  ;;  %vm525_vm5 = vmand %vm509_vm2, %vm446_vm3 }
  0xf6   :  { %v514_v6 = vmin.f32 %v512_v12, %v513_v7  ;;  %v577_v37 = vmin.f32 %v575_v11, %v576_v40  ;;  %v640_v60 = vmin.f32 %v638_v61, %v639_v31  ;;  %v648_v41 = vadd.f32 %v645_v51, %v571_v34  ;;  %vm587_vm9 = vmand %vm572_vm11, %vm509_vm2 }
  0xf7   :  { %v455_v35 = vsel %vm453_vm14, %v454_v56, %v452_v13  ;;  %v591_v34 = vsel %vm590_vm6, 0.0, %v2168_v33  ;;  %vm650_vm3 = vmand %vm635_vm4, %vm572_vm11  ;;  %vm662_vm2 = vcmp.eq.s32.totalorder %v1428_v42, %v987_v27  ;;  %v2251_v27 = vld [vmem:[#allocation19_spill] sm:$0xff] }
  0xf8   :  { %v516_v54 = vmin.f32 %v514_v6, %v1662_v44  ;;  %v579_v16 = vmin.f32 %v577_v37, %v1711_v17  ;;  %v519_v44 = vsel %vm518_vm8, 0.0, %v2168_v33  ;;  %v642_v20 = vmin.f32 %v640_v60, %v1688_v25  ;;  %vm597_vm11 = vmand %vm581_vm13, %vm518_vm8 }
  0xf9   :  { %v520_v17 = vadd.f32 1.0, %v455_v35  ;;  %v523_v45 = vadd.f32 %v519_v44, %v445_v58  ;;  %v585_v25 = vadd.f32 %v582_v18, %v508_v15  ;;  %vm659_vm4 = vmand %vm644_vm15, %vm581_vm13  ;;  %v663_v13 = vsel %vm662_vm2, 0.0, %v2168_v33 }
  0xfa   :  { %v517_v32 = vsel %vm515_vm0, %v516_v54, %v514_v6  ;;  %v580_v30 = vsel %vm578_vm7, %v579_v16, %v577_v37  ;;  %v643_v19 = vsel %vm641_vm10, %v642_v20, %v640_v60  ;;  %vm669_vm12 = vmand %vm653_vm1, %vm590_vm6  ;;  %v793_v60 = vld [vmem:[#allocation9] sm:$0xff]  ;;  %vm57_vm0 = vcmask 0  }
  0xfb   :  { %v521_v29 = vadd.f32 1.0, %v517_v32  ;;  %v583_v10 = vadd.f32 1.0, %v580_v30  ;;  %v646_v62 = vadd.f32 1.0, %v643_v19  ;;  %v595_v50 = vadd.f32 %v591_v34, %v517_v32  ;;  %58 = vst.msk [vmem:[#allocation5] sm:$0x1] %vm57_vm0, %v910_v1 }
  0xfc   :  { %vm2252_vm13 = vcmask 7168  }
  0xfd   :  { %v522_v48 = vmin.f32 %v520_v17, %v521_v29  ;;  %v584_v38 = vmin.f32 %v521_v29, %v583_v10  ;;  %v647_v5 = vmin.f32 %v583_v10, %v646_v62  ;;  %v81_v62 = vmul.f32 1.442695, %v80_v63  ;;  %vm2253_vm10 = vmmov %vm2252_vm13 }
  0xfe   :  { %vm2254_vm15 = vmmov %vm2253_vm10 }
  0xff   :  { %v524_v4 = vmin.f32 %v522_v48, %v523_v45  ;;  %v586_v2 = vmin.f32 %v584_v38, %v585_v25  ;;  %v649_v21 = vmin.f32 %v647_v5, %v648_v41  ;;  %v100_v48 = vld [vmem:[#allocation4] sm:$0xff]  ;;  %v83_v25 = vld [vmem:[#allocation3] sm:$0xff] }
 0x101   :  { %v526_v0 = vmin.f32 %v524_v4, %v1752_v43  ;;  %v588_v58 = vmin.f32 %v586_v2, %v1806_v49  ;;  %v651_v43 = vmin.f32 %v649_v21, %v1810_v14  ;;  %v654_v14 = vsel %vm653_vm1, 0.0, %v2168_v33  ;;  %v2249_v33 = vld [vmem:[#allocation18_spill] sm:$0xff] }
 0x102   :  { %v657_v12 = vadd.f32 %v654_v14, %v580_v30  ;;  %vm2250_vm14 = vcmp.lt.s32.totalorder %v2249_v33, 16 }
 0x103   :  { %v527_v15 = vsel %vm525_vm5, %v526_v0, %v524_v4  ;;  %v589_v8 = vsel %vm587_vm9, %v588_v58, %v586_v2  ;;  %v652_v55 = vsel %vm650_vm3, %v651_v43, %v649_v21  ;;  %v674_v0 = vld [vmem:[#allocation5] sm:$0x1] }
 0x104   :  { %v592_v49 = vadd.f32 1.0, %v527_v15  ;;  %v593_v57 = vadd.f32 1.0, %v589_v8  ;;  %v655_v28 = vadd.f32 1.0, %v652_v55  ;;  %v667_v31 = vadd.f32 %v663_v13, %v589_v8 }
 0x106   :  { %v594_v59 = vmin.f32 %v592_v49, %v593_v57  ;;  %v656_v36 = vmin.f32 %v593_v57, %v655_v28 }
 0x108   :  { %v596_v7 = vmin.f32 %v594_v59, %v595_v50  ;;  %v658_v39 = vmin.f32 %v656_v36, %v657_v12 }
 0x10a   :  { %v598_v11 = vmin.f32 %v596_v7, %v1893_v52  ;;  %v660_v22 = vmin.f32 %v658_v39, %v1895_v53 }
 0x10b   :  { %v103_v32 = vpop.permute.xlu2 %102 }
 0x10c   :  { %v599_v40 = vsel %vm597_vm11, %v598_v11, %v596_v7  ;;  %v661_v52 = vsel %vm659_vm4, %v660_v22, %v658_v39  ;;  %vm104_vm8 = vcmp.eq.s32.totalorder %v2249_v33, %v103_v32 }
 0x10d   :  { %v664_v6 = vadd.f32 1.0, %v599_v40  ;;  %v665_v61 = vadd.f32 1.0, %v661_v52 }
 0x10f   :  { %v666_v23 = vmin.f32 %v664_v6, %v665_v61 }
 0x111   :  { %v668_v37 = vmin.f32 %v666_v23, %v667_v31 }
 0x113   :  { %v670_v56 = vmin.f32 %v668_v37, %v1979_v47  ;;  %v105_v47 = vsel %vm104_vm8, %v793_v60, 0.0 }
 0x114   :  { %106 = vadd.xlane.f32.xlu2 %v105_v47 }
 0x115   :  { %v671_v53 = vsel %vm669_vm12, %v670_v56, %v668_v37 }
 0x116   :  { %v755_v24 = vadd.f32 -1.0, %v671_v53 }
 0x118   :  { %v673_v54 = vmax.f32 %v755_v24, 0.0 }
 0x11a   :  { %v675_v16 = vmul.f32 %v793_v60, %v673_v54 }
 0x11c   :  { %v676_v35 = vsel %vm2250_vm14, %v675_v16, 0.0 }
 0x11d   :  { %677 = vadd.xlane.f32.xlu0 %v676_v35 }
 0x140   :  { %v88_v44 = vpop.permute.xlu1 %87 }
 0x141   :  { %v90_v3 = vsub.f32 %v2251_v27, %v88_v44 }
 0x143   :  { %v91_v20 = vmul.f32 1.442695, %v90_v3 }
 0x145   :  { %787 = vpow2.f32 %v91_v20 }
 0x146   :  { %789 = vpow2.f32 %v81_v62 }
 0x14b   :  { %v788_v26 = vpop.eup %787 }
 0x14c   :  { %93 = vadd.xlane.f32.xlu1 %v788_v26  ;;  %v790_v38 = vpop.eup %789 }
 0x14d   :  { %v84_v4 = vmul.f32 %v790_v38, %v83_v25 }
 0x187   :  { %v107_v51 = vpop.xlane.xlu2 %106 }
 0x188   :  { %v108_v45 = vadd.f32 %v107_v51, %v100_v48 }
 0x18a   :  { %109 = vst.msk [vmem:[#allocation4] sm:$0xff] %vm2252_vm13, %v108_v45 }
 0x190   :  { %v678_v42 = vpop.xlane.xlu0 %677 }
 0x191   :  { %v679_v17 = vrot.slane %v678_v42, 4  ;;  %v698_v46 = vld [vmem:[#allocation4] sm:$0xff] }
 0x193   :  { %v680_v29 = vadd.f32 %v679_v17, %v678_v42 }
 0x195   :  { %v681_v30 = vrot.slane %v680_v29, 2 }
 0x197   :  { %v682_v18 = vadd.f32 %v681_v30, %v680_v29 }
 0x199   :  { %v683_v10 = vrot.slane %v682_v18, 1 }
 0x19b   :  { %v684_v19 = vadd.f32 %v683_v10, %v682_v18 }
 0x19d   :  { %756 = vpush %v684_v19 }
 0x1bf   :  { %v94_v5 = vpop.xlane.xlu1 %93 }
 0x1c0   :  { %v95_v41 = vadd.f32 %v94_v5, %v84_v4 }
 0x1c2   :  { %97 = vst.msk [vmem:[#allocation3] sm:$0xff] %vm2253_vm10, %v95_v41 }
 0x1c9   :  { %v694_v2 = vld [vmem:[#allocation3] sm:$0xff] }
 0x1ca   :  { %791 = vlog2.f32 %v694_v2 }
 0x1ce   :  { %s757_s3 = spop %756 }
 0x1cf   :  { %v686_v21 = vstv %s757_s3 }
 0x1d0   :  { %v687_v1 = vadd.f32 %v686_v21, %v674_v0  ;;  %v792_v58 = vpop.eup %791 }
 0x1d1   :  { %v696_v15 = vmul.f32 0.6931472, %v792_v58 }
 0x1d2   :  { %689 = vst.msk [vmem:[#allocation5] sm:$0x1] %vm57_vm0, %v687_v1 }
 0x1d3   :  { %v697_v63 = vadd.f32 %v696_v15, %v693_v9 }
 0x1d5   :  { %v699_v43 = vsub.f32 %v697_v63, %v698_v46 }
 0x1d7   :  { %v701_v34 = vsel %vm2254_vm15, %v699_v43, 0.0 }
 0x1d8   :  { %702 = vadd.xlane.f32.xlu2 %v701_v34 }
 0x1d9   :  { %v786_v8 = vld [vmem:[#allocation5] ss:$0 sm:$0xff] }
 0x1da   :  { %717 = vperm.xlu0 %785, %v786_v8  }
 0x24b   :  { %v703_v57 = vpop.xlane.xlu2 %702 }
 0x24c   :  { %v718_v49 = vpop.permute.xlu0 %717  ;;  %v704_v55 = vrot.slane %v703_v57, 4 }
 0x24d   :  { %720 = vst [vmem:[#allocation12] sm:$0xff] %v718_v49 }
 0x24e   :  { %742 = dma.vmem_to_hbm [thread:$0]  %s738_s30, 128, %s740_s8, [#allocation13]   ;;  %v705_v14 = vadd.f32 %v704_v55, %v703_v57 }
 0x250   :  { %v706_v28 = vrot.slane %v705_v14, 2 }
 0x252   :  { %v707_v59 = vadd.f32 %v706_v28, %v705_v14 }
 0x254   :  { %v708_v50 = vrot.slane %v707_v59, 1 }
 0x256   :  { %v709_v36 = vadd.f32 %v708_v50, %v707_v59 }
 0x258   :  { %758 = vpush %v709_v36 }
 0x289   :  { %s759_s5 = spop %758 }
 0x28a   :  { %v711_v12 = vstv %s759_s5 }
 0x28b   :  { %712 = vst [vmem:[#allocation11] sm:$0xff] %v711_v12 }
 0x28c   :  { %731 = dma.vmem_to_hbm [thread:$0]  %s727_s13, 128, %s729_s11, [#allocation8]  }
 0x28d   :  { %894 = dma.done.wait [#allocation8], 128  }
 0x28e   :  { %895 = vsyncadd [#allocation8], 4294967168 }
 0x28f   :  { %896 = dma.done.wait [#allocation13], 128  }
 0x290   :  { %897 = vsyncadd [#allocation13], 4294967168 }
 0x291   :  { %751 = vsyncpa [#allocation7], 1 }
 0x292   :  { %752 = vsyncpa [#allocation10], 1 }
 0x293   :  { %753 = vsyncpa [#allocation8], 1 }
 0x294   :  { %754 = vsyncpa [#allocation13], 1 }

</bundles_post_ra>
